<compile_context>
chip_gen: v6e
topology: v6e:2x2x1
jax: 0.10.0
libtpu: 0.0.40
codegen_flags: <defaults>
</compile_context>

<pallas_src>
import functools
import math

import jax
import jax.numpy as jnp
import numpy as np
from jax.experimental import pallas as pl
from jax.experimental.pallas import tpu as pltpu

DELTA = 0.2
MESH_SCALE = 0.7          # GuideConfig.mesh_scale default
PROXIMAL_SURFACE = 0.3    # GuideConfig.proximal_surface default
MAX_TILE_ROWS = 256       # 256 rows x 128 lanes = 32768 points per grid step

_PI = math.pi
_HALF_PI = 0.5 * math.pi
_LOG_001 = math.log(0.01)
_LOG_099 = math.log(0.99)


# ---------------------------------------------------------------------------
# Deterministic synthetic mesh (replaces read_obj(cfg.shape_path) + normalize)
# ---------------------------------------------------------------------------
def _make_mesh():
    # TODO(synk): original module loads an arbitrary OBJ file; a deterministic
    # regular tetrahedron (closed, outward-oriented) is baked in as constants.
    v = np.array([[1.0, 1.0, 1.0],
                  [1.0, -1.0, -1.0],
                  [-1.0, 1.0, -1.0],
                  [-1.0, -1.0, 1.0]], dtype=np.float64)
    f = np.array([[0, 1, 2],
                  [0, 3, 1],
                  [0, 2, 3],
                  [1, 3, 2]], dtype=np.int32)
    # MeshOBJ.normalize_mesh(mesh_scale)
    v = v - v.mean(axis=0, keepdims=True)
    v = v / np.max(np.linalg.norm(v, axis=1)) * MESH_SCALE
    return tuple(tuple(tuple(float(x) for x in v[idx]) for idx in face) for face in f)


TRI_LIST = _make_mesh()


# ---------------------------------------------------------------------------
# Elementwise vector-math helpers (tuples of 2-D arrays / python floats)
# ---------------------------------------------------------------------------
def _dot3(x, y):
    return x[0] * y[0] + x[1] * y[1] + x[2] * y[2]


def _sub3(x, y):
    return (x[0] - y[0], x[1] - y[1], x[2] - y[2])


def _cross3(x, y):
    return (x[1] * y[2] - x[2] * y[1],
            x[2] * y[0] - x[0] * y[2],
            x[0] * y[1] - x[1] * y[0])


def _safe_div_exact(n, d):
    # For the pure-JAX reference (outside the kernel).
    return n / jnp.where(d == 0.0, 1.0, d)


def _safe_div_fast(n, d):
    # Kernel-only: EUP approximate reciprocal, zero-denominator guarded.
    return n * pl.reciprocal(jnp.where(d == 0.0, 1.0, d), approx=True)


def _atan_poly(z):
    # Abramowitz & Stegun 4.4.47 for |z| <= 1 (|err| ~ 1e-5); VPU-only ops.
    z2 = z * z
    return z * (0.9998660 + z2 * (-0.3302995 + z2 * (0.1801410 +
                z2 * (-0.0851330 + z2 * 0.0208351))))


def _atan2(y, x):
    # TODO(synk): Mosaic has no native atan2 lowering; polynomial atan2 here.
    ay = jnp.abs(y)
    ax = jnp.abs(x)
    swap = ay > ax
    num = jnp.where(swap, ax, ay)
    den = jnp.where(swap, ay, ax)
    a = _atan_poly(_safe_div_fast(num, den))
    a = jnp.where(swap, _HALF_PI - a, a)
    a = jnp.where(x < 0.0, _PI - a, a)
    a = jnp.where(y < 0.0, -a, a)
    return jnp.where((ax == 0.0) & (ay == 0.0), 0.0, a)


def _solid_angle(p, v0, v1, v2):
    # van Oosterom & Strackee signed solid angle of triangle (v0,v1,v2) at p.
    a = _sub3(v0, p)
    b = _sub3(v1, p)
    c = _sub3(v2, p)
    la = jnp.sqrt(_dot3(a, a))
    lb = jnp.sqrt(_dot3(b, b))
    lc = jnp.sqrt(_dot3(c, c))
    num = _dot3(a, _cross3(b, c))
    den = (la * lb * lc + _dot3(a, b) * lc +
           _dot3(b, c) * la + _dot3(c, a) * lb)
    return 2.0 * _atan2(num, den)


def _point_tri_sqdist(p, a, b, c, div=_safe_div_exact):
    # Exact point -> triangle squared distance (Ericson, branchless via where).
    ab = _sub3(b, a)
    ac = _sub3(c, a)
    bc = _sub3(c, b)
    ap = _sub3(p, a)
    bp = _sub3(p, b)
    cp = _sub3(p, c)
    d1 = _dot3(ab, ap)
    d2 = _dot3(ac, ap)
    d3 = _dot3(ab, bp)
    d4 = _dot3(ac, bp)
    d5 = _dot3(ab, cp)
    d6 = _dot3(ac, cp)
    vc = d1 * d4 - d3 * d2
    vb = d5 * d2 - d1 * d6
    va = d3 * d6 - d5 * d4

    # interior (lowest priority)
    denom = va + vb + vc
    v_i = div(vb, denom)
    w_i = div(vc, denom)
    cx = a[0] + v_i * ab[0] + w_i * ac[0]
    cy = a[1] + v_i * ab[1] + w_i * ac[1]
    cz = a[2] + v_i * ab[2] + w_i * ac[2]

    def _override(mask, nx, ny, nz, cx, cy, cz):
        return (jnp.where(mask, nx, cx),
                jnp.where(mask, ny, cy),
                jnp.where(mask, nz, cz))

    # edge BC
    t = div(d4 - d3, (d4 - d3) + (d5 - d6))
    m = (va <= 0.0) & ((d4 - d3) >= 0.0) & ((d5 - d6) >= 0.0)
    cx, cy, cz = _override(m, b[0] + t * bc[0], b[1] + t * bc[1], b[2] + t * bc[2], cx, cy, cz)
    # edge AC
    t = div(d2, d2 - d6)
    m = (vb <= 0.0) & (d2 >= 0.0) & (d6 <= 0.0)
    cx, cy, cz = _override(m, a[0] + t * ac[0], a[1] + t * ac[1], a[2] + t * ac[2], cx, cy, cz)
    # vertex C
    m = (d6 >= 0.0) & (d5 <= d6)
    cx, cy, cz = _override(m, c[0], c[1], c[2], cx, cy, cz)
    # edge AB
    t = div(d1, d1 - d3)
    m = (vc <= 0.0) & (d1 >= 0.0) & (d3 <= 0.0)
    cx, cy, cz = _override(m, a[0] + t * ab[0], a[1] + t * ab[1], a[2] + t * ab[2], cx, cy, cz)
    # vertex B
    m = (d3 >= 0.0) & (d4 <= d3)
    cx, cy, cz = _override(m, b[0], b[1], b[2], cx, cy, cz)
    # vertex A (highest priority)
    m = (d1 <= 0.0) & (d2 <= 0.0)
    cx, cy, cz = _override(m, a[0], a[1], a[2], cx, cy, cz)

    dx = p[0] - cx
    dy = p[1] - cy
    dz = p[2] - cz
    return dx * dx + dy * dy + dz * dz


# ---------------------------------------------------------------------------
# Pallas kernel: one grid step = one dense (TILE_ROWS, 128) slab of points
# ---------------------------------------------------------------------------
def _shape_loss_kernel(data_ref, out_ref, *, tri_list, inv_two_prox_sq):
    px = data_ref[0, :, :]      # (TILE_ROWS, 128)
    py = data_ref[1, :, :]
    pz = data_ref[2, :, :]
    sig = data_ref[3, :, :]
    p = (px, py, pz)

    omega = jnp.zeros_like(px)
    min_d2 = jnp.full_like(px, 1e30)
    for (va_, vb_, vc_) in tri_list:            # unrolled over faces (constants)
        omega = omega + _solid_angle(p, va_, vb_, vc_)
        min_d2 = jnp.minimum(
            min_d2, _point_tri_sqdist(p, va_, vb_, vc_, div=_safe_div_fast))

    inside = omega > (2.0 * _PI)                          # winding number > 0.5
    # 1 - gaussian_weighted_distance; padded points sit on a mesh vertex -> 0.
    weight = 1.0 - jnp.exp(-min_d2 * inv_two_prox_sq)

    nerf_occ = jnp.clip(1.0 - jnp.exp(-DELTA * sig), 0.0, 1.1)   # p in ce_pq_loss

    # indicator is exactly 0 or 1 -> log(clamp(q)), log(clamp(1-q)) are constants.
    ce_in = -(_LOG_001 + nerf_occ * (_LOG_099 - _LOG_001))   # indicator == 1
    ce_out = -(_LOG_099 + nerf_occ * (_LOG_001 - _LOG_099))  # indicator == 0
    ce = jnp.where(inside, ce_in, ce_out)

    out_ref[0, 0] = jnp.sum(ce * weight)        # per-block partial sum


def shape_loss(xyzs, sigmas, *, tri_list=TRI_LIST, prox=PROXIMAL_SURFACE,
               max_tile_rows=MAX_TILE_ROWS):
    """xyzs: (N, 3) float32, sigmas: (N,) float32 -> scalar float32 loss."""
    n = xyzs.shape[0]
    n_rows = -(-n // 128)                                  # ceil(n / 128)
    tile_rows = min(max_tile_rows, ((n_rows + 7) // 8) * 8)
    n_rows_pad = -(-n_rows // tile_rows) * tile_rows
    n_pad = n_rows_pad * 128
    num_tiles = n_rows_pad // tile_rows

    # Pad with points placed exactly on a mesh vertex: their squared distance is
    # exactly 0, so weight == 0 and they contribute nothing (no mask needed).
    pad_xyz = jnp.broadcast_to(
        jnp.asarray(tri_list[0][0], jnp.float32), (n_pad - n, 3))
    xyz_full = jnp.concatenate([xyzs.astype(jnp.float32), pad_xyz], axis=0)
    sig_full = jnp.concatenate(
        [sigmas.astype(jnp.float32).reshape(-1),
         jnp.zeros((n_pad - n,), jnp.float32)], axis=0)

    stacked = jnp.concatenate([xyz_full.T, sig_full[None, :]], axis=0)  # (4, n_pad)
    stacked = stacked.reshape(4, n_rows_pad, 128)

    kernel = functools.partial(
        _shape_loss_kernel, tri_list=tri_list,
        inv_two_prox_sq=float(1.0 / (2.0 * prox * prox)))

    partials = pl.pallas_call(
        kernel,
        out_shape=jax.ShapeDtypeStruct((num_tiles, 1), jnp.float32),
        grid_spec=pltpu.PrefetchScalarGridSpec(
            num_scalar_prefetch=0,
            grid=(num_tiles,),
            in_specs=[pl.BlockSpec((4, tile_rows, 128), lambda i: (0, i, 0))],
            out_specs=pl.BlockSpec((1, 1), lambda i: (i, 0),
                                   memory_space=pltpu.MemorySpace.SMEM),
        ),
        compiler_params=pltpu.CompilerParams(
            dimension_semantics=("parallel",)),   # both TCs on v7x
    )(stacked)
    return jnp.sum(partials)


# ---------------------------------------------------------------------------
# Pure-JAX reference (exact arctan2 / divides) for a sanity check
# ---------------------------------------------------------------------------
def _reference_loss(xyzs, sigmas, tri_list=TRI_LIST, prox=PROXIMAL_SURFACE):
    p = (xyzs[:, 0][None, :], xyzs[:, 1][None, :], xyzs[:, 2][None, :])
    n = xyzs.shape[0]
    omega = jnp.zeros((1, n), jnp.float32)
    min_d2 = jnp.full((1, n), 1e30, jnp.float32)
    for (v0, v1, v2) in tri_list:
        a, b, c = _sub3(v0, p), _sub3(v1, p), _sub3(v2, p)
        la, lb, lc = (jnp.sqrt(_dot3(a, a)), jnp.sqrt(_dot3(b, b)), jnp.sqrt(_dot3(c, c)))
        num = _dot3(a, _cross3(b, c))
        den = la * lb * lc + _dot3(a, b) * lc + _dot3(b, c) * la + _dot3(c, a) * lb
        omega = omega + 2.0 * jnp.arctan2(num, den)
        min_d2 = jnp.minimum(min_d2, _point_tri_sqdist(p, v0, v1, v2, div=_safe_div_exact))
    indicator = (omega / (4.0 * _PI) > 0.5).astype(jnp.float32)
    weight = 1.0 - jnp.exp(-(min_d2 / (2.0 * prox * prox)))
    nerf_occ = jnp.clip(1.0 - jnp.exp(-DELTA * sigmas[None, :]), 0.0, 1.1)
    ce = -(nerf_occ * jnp.log(jnp.clip(indicator, 0.01, 0.99)) +
           (1.0 - nerf_occ) * jnp.log(jnp.clip(1.0 - indicator, 0.01, 0.99)))
    return jnp.sum(ce * weight)


if __name__ == "__main__":
    key = jax.random.PRNGKey(0)
    k1, k2 = jax.random.split(key)
    N = 256
    xyzs = jax.random.uniform(k1, (N, 3), jnp.float32, minval=-1.0, maxval=1.0)
    sigmas = jax.random.uniform(k2, (N,), jnp.float32, minval=0.0, maxval=10.0)

    loss = shape_loss(xyzs, sigmas)
    jax.block_until_ready(loss)

    ref = _reference_loss(xyzs, sigmas)
    np.testing.assert_allclose(np.asarray(loss), np.asarray(ref), rtol=5e-3, atol=5e-3)
    assert np.isfinite(np.asarray(loss))
    print("KERNEL_OK")
</pallas_src>

<mosaic_0001>
module attributes {stable_mosaic.version = 11 : i64} {
  func.func @_shape_loss_kernel(%arg0: i32, %arg1: memref<4x8x128xf32, #tpu.memory_space<vmem>>, %arg2: memref<1x1xf32, #tpu.memory_space<smem>>) attributes {dimension_semantics = [#tpu.dimension_semantics<parallel>], iteration_bounds = array<i64: 1>, scalar_prefetch = 0 : i64, scratch_operands = 0 : i64, tpu.core_type = #tpu.core_type<tc>, window_params = [{transform_indices = @transform_0, window_bounds = array<i64: 4, 8, 128>}, {transform_indices = @transform_1, window_bounds = array<i64: 1, 1>}]} {
    %c0 = arith.constant 0 : index
    %c0_0 = arith.constant 0 : index
    %c0_1 = arith.constant 0 : index
    %0 = vector.load %arg1[%c0, %c0_0, %c0_1] : memref<4x8x128xf32, #tpu.memory_space<vmem>>, vector<1x8x128xf32>
    %1 = vector.shape_cast %0 : vector<1x8x128xf32> to vector<8x128xf32>
    %c1 = arith.constant 1 : index
    %c0_2 = arith.constant 0 : index
    %c0_3 = arith.constant 0 : index
    %2 = vector.load %arg1[%c1, %c0_2, %c0_3] : memref<4x8x128xf32, #tpu.memory_space<vmem>>, vector<1x8x128xf32>
    %3 = vector.shape_cast %2 : vector<1x8x128xf32> to vector<8x128xf32>
    %c2 = arith.constant 2 : index
    %c0_4 = arith.constant 0 : index
    %c0_5 = arith.constant 0 : index
    %4 = vector.load %arg1[%c2, %c0_4, %c0_5] : memref<4x8x128xf32, #tpu.memory_space<vmem>>, vector<1x8x128xf32>
    %5 = vector.shape_cast %4 : vector<1x8x128xf32> to vector<8x128xf32>
    %c3 = arith.constant 3 : index
    %c0_6 = arith.constant 0 : index
    %c0_7 = arith.constant 0 : index
    %6 = vector.load %arg1[%c3, %c0_6, %c0_7] : memref<4x8x128xf32, #tpu.memory_space<vmem>>, vector<1x8x128xf32>
    %7 = vector.shape_cast %6 : vector<1x8x128xf32> to vector<8x128xf32>
    %cst = arith.constant 0.000000e+00 : f32
    %8 = vector.broadcast %cst : f32 to vector<8x128xf32>
    %cst_8 = arith.constant 1.000000e+30 : f32
    %9 = vector.broadcast %cst_8 : f32 to vector<8x128xf32>
    %cst_9 = arith.constant 0.404145181 : f32
    %10 = vector.broadcast %cst_9 : f32 to vector<8x128xf32>
    %11 = arith.subf %10, %1 : vector<8x128xf32>
    %cst_10 = arith.constant 0.404145181 : f32
    %12 = vector.broadcast %cst_10 : f32 to vector<8x128xf32>
    %13 = arith.subf %12, %3 : vector<8x128xf32>
    %cst_11 = arith.constant 0.404145181 : f32
    %14 = vector.broadcast %cst_11 : f32 to vector<8x128xf32>
    %15 = arith.subf %14, %5 : vector<8x128xf32>
    %cst_12 = arith.constant 0.404145181 : f32
    %16 = vector.broadcast %cst_12 : f32 to vector<8x128xf32>
    %17 = arith.subf %16, %1 : vector<8x128xf32>
    %cst_13 = arith.constant -0.404145181 : f32
    %18 = vector.broadcast %cst_13 : f32 to vector<8x128xf32>
    %19 = arith.subf %18, %3 : vector<8x128xf32>
    %cst_14 = arith.constant -0.404145181 : f32
    %20 = vector.broadcast %cst_14 : f32 to vector<8x128xf32>
    %21 = arith.subf %20, %5 : vector<8x128xf32>
    %cst_15 = arith.constant -0.404145181 : f32
    %22 = vector.broadcast %cst_15 : f32 to vector<8x128xf32>
    %23 = arith.subf %22, %1 : vector<8x128xf32>
    %cst_16 = arith.constant 0.404145181 : f32
    %24 = vector.broadcast %cst_16 : f32 to vector<8x128xf32>
    %25 = arith.subf %24, %3 : vector<8x128xf32>
    %cst_17 = arith.constant -0.404145181 : f32
    %26 = vector.broadcast %cst_17 : f32 to vector<8x128xf32>
    %27 = arith.subf %26, %5 : vector<8x128xf32>
    %28 = arith.mulf %11, %11 : vector<8x128xf32>
    %29 = arith.mulf %13, %13 : vector<8x128xf32>
    %30 = arith.addf %28, %29 : vector<8x128xf32>
    %31 = arith.mulf %15, %15 : vector<8x128xf32>
    %32 = arith.addf %30, %31 : vector<8x128xf32>
    %33 = math.sqrt %32 : vector<8x128xf32>
    %34 = arith.mulf %17, %17 : vector<8x128xf32>
    %35 = arith.mulf %19, %19 : vector<8x128xf32>
    %36 = arith.addf %34, %35 : vector<8x128xf32>
    %37 = arith.mulf %21, %21 : vector<8x128xf32>
    %38 = arith.addf %36, %37 : vector<8x128xf32>
    %39 = math.sqrt %38 : vector<8x128xf32>
    %40 = arith.mulf %23, %23 : vector<8x128xf32>
    %41 = arith.mulf %25, %25 : vector<8x128xf32>
    %42 = arith.addf %40, %41 : vector<8x128xf32>
    %43 = arith.mulf %27, %27 : vector<8x128xf32>
    %44 = arith.addf %42, %43 : vector<8x128xf32>
    %45 = math.sqrt %44 : vector<8x128xf32>
    %46 = arith.mulf %19, %27 : vector<8x128xf32>
    %47 = arith.mulf %21, %25 : vector<8x128xf32>
    %48 = arith.subf %46, %47 : vector<8x128xf32>
    %49 = arith.mulf %21, %23 : vector<8x128xf32>
    %50 = arith.mulf %17, %27 : vector<8x128xf32>
    %51 = arith.subf %49, %50 : vector<8x128xf32>
    %52 = arith.mulf %17, %25 : vector<8x128xf32>
    %53 = arith.mulf %19, %23 : vector<8x128xf32>
    %54 = arith.subf %52, %53 : vector<8x128xf32>
    %55 = arith.mulf %11, %48 : vector<8x128xf32>
    %56 = arith.mulf %13, %51 : vector<8x128xf32>
    %57 = arith.addf %55, %56 : vector<8x128xf32>
    %58 = arith.mulf %15, %54 : vector<8x128xf32>
    %59 = arith.addf %57, %58 : vector<8x128xf32>
    %60 = arith.mulf %33, %39 : vector<8x128xf32>
    %61 = arith.mulf %60, %45 : vector<8x128xf32>
    %62 = arith.mulf %11, %17 : vector<8x128xf32>
    %63 = arith.mulf %13, %19 : vector<8x128xf32>
    %64 = arith.addf %62, %63 : vector<8x128xf32>
    %65 = arith.mulf %15, %21 : vector<8x128xf32>
    %66 = arith.addf %64, %65 : vector<8x128xf32>
    %67 = arith.mulf %66, %45 : vector<8x128xf32>
    %68 = arith.addf %61, %67 : vector<8x128xf32>
    %69 = arith.mulf %17, %23 : vector<8x128xf32>
    %70 = arith.mulf %19, %25 : vector<8x128xf32>
    %71 = arith.addf %69, %70 : vector<8x128xf32>
    %72 = arith.mulf %21, %27 : vector<8x128xf32>
    %73 = arith.addf %71, %72 : vector<8x128xf32>
    %74 = arith.mulf %73, %33 : vector<8x128xf32>
    %75 = arith.addf %68, %74 : vector<8x128xf32>
    %76 = arith.mulf %23, %11 : vector<8x128xf32>
    %77 = arith.mulf %25, %13 : vector<8x128xf32>
    %78 = arith.addf %76, %77 : vector<8x128xf32>
    %79 = arith.mulf %27, %15 : vector<8x128xf32>
    %80 = arith.addf %78, %79 : vector<8x128xf32>
    %81 = arith.mulf %80, %39 : vector<8x128xf32>
    %82 = arith.addf %75, %81 : vector<8x128xf32>
    %83 = math.absf %59 : vector<8x128xf32>
    %84 = math.absf %82 : vector<8x128xf32>
    %85 = arith.cmpf ogt, %83, %84 : vector<8x128xf32>
    %86 = arith.select %85, %84, %83 : vector<8x128xi1>, vector<8x128xf32>
    %87 = arith.select %85, %83, %84 : vector<8x128xi1>, vector<8x128xf32>
    %cst_18 = arith.constant 0.000000e+00 : f32
    %88 = vector.broadcast %cst_18 : f32 to vector<8x128xf32>
    %89 = arith.cmpf oeq, %87, %88 : vector<8x128xf32>
    %cst_19 = arith.constant 1.000000e+00 : f32
    %90 = vector.broadcast %cst_19 : f32 to vector<8x128xf32>
    %91 = arith.select %89, %90, %87 : vector<8x128xi1>, vector<8x128xf32>
    %92 = tpu.reciprocal %91 {approx = true} : vector<8x128xf32> -> vector<8x128xf32>
    %93 = arith.mulf %86, %92 : vector<8x128xf32>
    %94 = arith.mulf %93, %93 : vector<8x128xf32>
    %cst_20 = arith.constant 2.083510e-02 : f32
    %95 = vector.broadcast %cst_20 : f32 to vector<8x128xf32>
    %96 = arith.mulf %94, %95 : vector<8x128xf32>
    %cst_21 = arith.constant -8.513300e-02 : f32
    %97 = vector.broadcast %cst_21 : f32 to vector<8x128xf32>
    %98 = arith.addf %97, %96 : vector<8x128xf32>
    %99 = arith.mulf %94, %98 : vector<8x128xf32>
    %cst_22 = arith.constant 1.801410e-01 : f32
    %100 = vector.broadcast %cst_22 : f32 to vector<8x128xf32>
    %101 = arith.addf %100, %99 : vector<8x128xf32>
    %102 = arith.mulf %94, %101 : vector<8x128xf32>
    %cst_23 = arith.constant -0.330299497 : f32
    %103 = vector.broadcast %cst_23 : f32 to vector<8x128xf32>
    %104 = arith.addf %103, %102 : vector<8x128xf32>
    %105 = arith.mulf %94, %104 : vector<8x128xf32>
    %cst_24 = arith.constant 9.998660e-01 : f32
    %106 = vector.broadcast %cst_24 : f32 to vector<8x128xf32>
    %107 = arith.addf %106, %105 : vector<8x128xf32>
    %108 = arith.mulf %93, %107 : vector<8x128xf32>
    %cst_25 = arith.constant 1.57079637 : f32
    %109 = vector.broadcast %cst_25 : f32 to vector<8x128xf32>
    %110 = arith.subf %109, %108 : vector<8x128xf32>
    %111 = arith.select %85, %110, %108 : vector<8x128xi1>, vector<8x128xf32>
    %cst_26 = arith.constant 0.000000e+00 : f32
    %112 = vector.broadcast %cst_26 : f32 to vector<8x128xf32>
    %113 = arith.cmpf olt, %82, %112 : vector<8x128xf32>
    %cst_27 = arith.constant 3.14159274 : f32
    %114 = vector.broadcast %cst_27 : f32 to vector<8x128xf32>
    %115 = arith.subf %114, %111 : vector<8x128xf32>
    %116 = arith.select %113, %115, %111 : vector<8x128xi1>, vector<8x128xf32>
    %cst_28 = arith.constant 0.000000e+00 : f32
    %117 = vector.broadcast %cst_28 : f32 to vector<8x128xf32>
    %118 = arith.cmpf olt, %59, %117 : vector<8x128xf32>
    %cst_29 = arith.constant 0.000000e+00 : f32
    %119 = vector.broadcast %cst_29 : f32 to vector<8x128xf32>
    %120 = arith.subf %119, %116 : vector<8x128xf32>
    %121 = arith.select %118, %120, %116 : vector<8x128xi1>, vector<8x128xf32>
    %cst_30 = arith.constant 0.000000e+00 : f32
    %122 = vector.broadcast %cst_30 : f32 to vector<8x128xf32>
    %123 = arith.cmpf oeq, %84, %122 : vector<8x128xf32>
    %cst_31 = arith.constant 0.000000e+00 : f32
    %124 = vector.broadcast %cst_31 : f32 to vector<8x128xf32>
    %125 = arith.cmpf oeq, %83, %124 : vector<8x128xf32>
    %126 = arith.andi %123, %125 : vector<8x128xi1>
    %cst_32 = arith.constant 0.000000e+00 : f32
    %127 = vector.broadcast %cst_32 : f32 to vector<8x128xf32>
    %128 = arith.select %126, %127, %121 : vector<8x128xi1>, vector<8x128xf32>
    %cst_33 = arith.constant 2.000000e+00 : f32
    %129 = vector.broadcast %cst_33 : f32 to vector<8x128xf32>
    %130 = arith.mulf %129, %128 : vector<8x128xf32>
    %131 = arith.addf %8, %130 : vector<8x128xf32>
    %cst_34 = arith.constant 0.404145181 : f32
    %132 = vector.broadcast %cst_34 : f32 to vector<8x128xf32>
    %133 = arith.subf %1, %132 : vector<8x128xf32>
    %cst_35 = arith.constant 0.404145181 : f32
    %134 = vector.broadcast %cst_35 : f32 to vector<8x128xf32>
    %135 = arith.subf %3, %134 : vector<8x128xf32>
    %cst_36 = arith.constant 0.404145181 : f32
    %136 = vector.broadcast %cst_36 : f32 to vector<8x128xf32>
    %137 = arith.subf %5, %136 : vector<8x128xf32>
    %cst_37 = arith.constant 0.404145181 : f32
    %138 = vector.broadcast %cst_37 : f32 to vector<8x128xf32>
    %139 = arith.subf %1, %138 : vector<8x128xf32>
    %cst_38 = arith.constant -0.404145181 : f32
    %140 = vector.broadcast %cst_38 : f32 to vector<8x128xf32>
    %141 = arith.subf %3, %140 : vector<8x128xf32>
    %cst_39 = arith.constant -0.404145181 : f32
    %142 = vector.broadcast %cst_39 : f32 to vector<8x128xf32>
    %143 = arith.subf %5, %142 : vector<8x128xf32>
    %cst_40 = arith.constant -0.404145181 : f32
    %144 = vector.broadcast %cst_40 : f32 to vector<8x128xf32>
    %145 = arith.subf %1, %144 : vector<8x128xf32>
    %cst_41 = arith.constant 0.404145181 : f32
    %146 = vector.broadcast %cst_41 : f32 to vector<8x128xf32>
    %147 = arith.subf %3, %146 : vector<8x128xf32>
    %cst_42 = arith.constant -0.404145181 : f32
    %148 = vector.broadcast %cst_42 : f32 to vector<8x128xf32>
    %149 = arith.subf %5, %148 : vector<8x128xf32>
    %cst_43 = arith.constant 0.000000e+00 : f32
    %150 = vector.broadcast %cst_43 : f32 to vector<8x128xf32>
    %151 = arith.mulf %150, %133 : vector<8x128xf32>
    %cst_44 = arith.constant -0.808290362 : f32
    %152 = vector.broadcast %cst_44 : f32 to vector<8x128xf32>
    %153 = arith.mulf %152, %135 : vector<8x128xf32>
    %154 = arith.addf %151, %153 : vector<8x128xf32>
    %cst_45 = arith.constant -0.808290362 : f32
    %155 = vector.broadcast %cst_45 : f32 to vector<8x128xf32>
    %156 = arith.mulf %155, %137 : vector<8x128xf32>
    %157 = arith.addf %154, %156 : vector<8x128xf32>
    %cst_46 = arith.constant -0.808290362 : f32
    %158 = vector.broadcast %cst_46 : f32 to vector<8x128xf32>
    %159 = arith.mulf %158, %133 : vector<8x128xf32>
    %cst_47 = arith.constant 0.000000e+00 : f32
    %160 = vector.broadcast %cst_47 : f32 to vector<8x128xf32>
    %161 = arith.mulf %160, %135 : vector<8x128xf32>
    %162 = arith.addf %159, %161 : vector<8x128xf32>
    %cst_48 = arith.constant -0.808290362 : f32
    %163 = vector.broadcast %cst_48 : f32 to vector<8x128xf32>
    %164 = arith.mulf %163, %137 : vector<8x128xf32>
    %165 = arith.addf %162, %164 : vector<8x128xf32>
    %cst_49 = arith.constant 0.000000e+00 : f32
    %166 = vector.broadcast %cst_49 : f32 to vector<8x128xf32>
    %167 = arith.mulf %166, %139 : vector<8x128xf32>
    %cst_50 = arith.constant -0.808290362 : f32
    %168 = vector.broadcast %cst_50 : f32 to vector<8x128xf32>
    %169 = arith.mulf %168, %141 : vector<8x128xf32>
    %170 = arith.addf %167, %169 : vector<8x128xf32>
    %cst_51 = arith.constant -0.808290362 : f32
    %171 = vector.broadcast %cst_51 : f32 to vector<8x128xf32>
    %172 = arith.mulf %171, %143 : vector<8x128xf32>
    %173 = arith.addf %170, %172 : vector<8x128xf32>
    %cst_52 = arith.constant -0.808290362 : f32
    %174 = vector.broadcast %cst_52 : f32 to vector<8x128xf32>
    %175 = arith.mulf %174, %139 : vector<8x128xf32>
    %cst_53 = arith.constant 0.000000e+00 : f32
    %176 = vector.broadcast %cst_53 : f32 to vector<8x128xf32>
    %177 = arith.mulf %176, %141 : vector<8x128xf32>
    %178 = arith.addf %175, %177 : vector<8x128xf32>
    %cst_54 = arith.constant -0.808290362 : f32
    %179 = vector.broadcast %cst_54 : f32 to vector<8x128xf32>
    %180 = arith.mulf %179, %143 : vector<8x128xf32>
    %181 = arith.addf %178, %180 : vector<8x128xf32>
    %cst_55 = arith.constant 0.000000e+00 : f32
    %182 = vector.broadcast %cst_55 : f32 to vector<8x128xf32>
    %183 = arith.mulf %182, %145 : vector<8x128xf32>
    %cst_56 = arith.constant -0.808290362 : f32
    %184 = vector.broadcast %cst_56 : f32 to vector<8x128xf32>
    %185 = arith.mulf %184, %147 : vector<8x128xf32>
    %186 = arith.addf %183, %185 : vector<8x128xf32>
    %cst_57 = arith.constant -0.808290362 : f32
    %187 = vector.broadcast %cst_57 : f32 to vector<8x128xf32>
    %188 = arith.mulf %187, %149 : vector<8x128xf32>
    %189 = arith.addf %186, %188 : vector<8x128xf32>
    %cst_58 = arith.constant -0.808290362 : f32
    %190 = vector.broadcast %cst_58 : f32 to vector<8x128xf32>
    %191 = arith.mulf %190, %145 : vector<8x128xf32>
    %cst_59 = arith.constant 0.000000e+00 : f32
    %192 = vector.broadcast %cst_59 : f32 to vector<8x128xf32>
    %193 = arith.mulf %192, %147 : vector<8x128xf32>
    %194 = arith.addf %191, %193 : vector<8x128xf32>
    %cst_60 = arith.constant -0.808290362 : f32
    %195 = vector.broadcast %cst_60 : f32 to vector<8x128xf32>
    %196 = arith.mulf %195, %149 : vector<8x128xf32>
    %197 = arith.addf %194, %196 : vector<8x128xf32>
    %198 = arith.mulf %157, %181 : vector<8x128xf32>
    %199 = arith.mulf %173, %165 : vector<8x128xf32>
    %200 = arith.subf %198, %199 : vector<8x128xf32>
    %201 = arith.mulf %189, %165 : vector<8x128xf32>
    %202 = arith.mulf %157, %197 : vector<8x128xf32>
    %203 = arith.subf %201, %202 : vector<8x128xf32>
    %204 = arith.mulf %173, %197 : vector<8x128xf32>
    %205 = arith.mulf %189, %181 : vector<8x128xf32>
    %206 = arith.subf %204, %205 : vector<8x128xf32>
    %207 = arith.addf %206, %203 : vector<8x128xf32>
    %208 = arith.addf %207, %200 : vector<8x128xf32>
    %cst_61 = arith.constant 0.000000e+00 : f32
    %209 = vector.broadcast %cst_61 : f32 to vector<8x128xf32>
    %210 = arith.cmpf oeq, %208, %209 : vector<8x128xf32>
    %cst_62 = arith.constant 1.000000e+00 : f32
    %211 = vector.broadcast %cst_62 : f32 to vector<8x128xf32>
    %212 = arith.select %210, %211, %208 : vector<8x128xi1>, vector<8x128xf32>
    %213 = tpu.reciprocal %212 {approx = true} : vector<8x128xf32> -> vector<8x128xf32>
    %214 = arith.mulf %203, %213 : vector<8x128xf32>
    %cst_63 = arith.constant 0.000000e+00 : f32
    %215 = vector.broadcast %cst_63 : f32 to vector<8x128xf32>
    %216 = arith.cmpf oeq, %208, %215 : vector<8x128xf32>
    %cst_64 = arith.constant 1.000000e+00 : f32
    %217 = vector.broadcast %cst_64 : f32 to vector<8x128xf32>
    %218 = arith.select %216, %217, %208 : vector<8x128xi1>, vector<8x128xf32>
    %219 = tpu.reciprocal %218 {approx = true} : vector<8x128xf32> -> vector<8x128xf32>
    %220 = arith.mulf %200, %219 : vector<8x128xf32>
    %cst_65 = arith.constant 0.000000e+00 : f32
    %221 = vector.broadcast %cst_65 : f32 to vector<8x128xf32>
    %222 = arith.mulf %214, %221 : vector<8x128xf32>
    %cst_66 = arith.constant 0.404145181 : f32
    %223 = vector.broadcast %cst_66 : f32 to vector<8x128xf32>
    %224 = arith.addf %223, %222 : vector<8x128xf32>
    %cst_67 = arith.constant -0.808290362 : f32
    %225 = vector.broadcast %cst_67 : f32 to vector<8x128xf32>
    %226 = arith.mulf %220, %225 : vector<8x128xf32>
    %227 = arith.addf %224, %226 : vector<8x128xf32>
    %cst_68 = arith.constant -0.808290362 : f32
    %228 = vector.broadcast %cst_68 : f32 to vector<8x128xf32>
    %229 = arith.mulf %214, %228 : vector<8x128xf32>
    %cst_69 = arith.constant 0.404145181 : f32
    %230 = vector.broadcast %cst_69 : f32 to vector<8x128xf32>
    %231 = arith.addf %230, %229 : vector<8x128xf32>
    %cst_70 = arith.constant 0.000000e+00 : f32
    %232 = vector.broadcast %cst_70 : f32 to vector<8x128xf32>
    %233 = arith.mulf %220, %232 : vector<8x128xf32>
    %234 = arith.addf %231, %233 : vector<8x128xf32>
    %cst_71 = arith.constant -0.808290362 : f32
    %235 = vector.broadcast %cst_71 : f32 to vector<8x128xf32>
    %236 = arith.mulf %214, %235 : vector<8x128xf32>
    %cst_72 = arith.constant 0.404145181 : f32
    %237 = vector.broadcast %cst_72 : f32 to vector<8x128xf32>
    %238 = arith.addf %237, %236 : vector<8x128xf32>
    %cst_73 = arith.constant -0.808290362 : f32
    %239 = vector.broadcast %cst_73 : f32 to vector<8x128xf32>
    %240 = arith.mulf %220, %239 : vector<8x128xf32>
    %241 = arith.addf %238, %240 : vector<8x128xf32>
    %242 = arith.subf %181, %173 : vector<8x128xf32>
    %243 = arith.subf %181, %173 : vector<8x128xf32>
    %244 = arith.subf %189, %197 : vector<8x128xf32>
    %245 = arith.addf %243, %244 : vector<8x128xf32>
    %cst_74 = arith.constant 0.000000e+00 : f32
    %246 = vector.broadcast %cst_74 : f32 to vector<8x128xf32>
    %247 = arith.cmpf oeq, %245, %246 : vector<8x128xf32>
    %cst_75 = arith.constant 1.000000e+00 : f32
    %248 = vector.broadcast %cst_75 : f32 to vector<8x128xf32>
    %249 = arith.select %247, %248, %245 : vector<8x128xi1>, vector<8x128xf32>
    %250 = tpu.reciprocal %249 {approx = true} : vector<8x128xf32> -> vector<8x128xf32>
    %251 = arith.mulf %242, %250 : vector<8x128xf32>
    %cst_76 = arith.constant 0.000000e+00 : f32
    %252 = vector.broadcast %cst_76 : f32 to vector<8x128xf32>
    %253 = arith.cmpf ole, %206, %252 : vector<8x128xf32>
    %254 = arith.subf %181, %173 : vector<8x128xf32>
    %cst_77 = arith.constant 0.000000e+00 : f32
    %255 = vector.broadcast %cst_77 : f32 to vector<8x128xf32>
    %256 = arith.cmpf oge, %254, %255 : vector<8x128xf32>
    %257 = arith.andi %253, %256 : vector<8x128xi1>
    %258 = arith.subf %189, %197 : vector<8x128xf32>
    %cst_78 = arith.constant 0.000000e+00 : f32
    %259 = vector.broadcast %cst_78 : f32 to vector<8x128xf32>
    %260 = arith.cmpf oge, %258, %259 : vector<8x128xf32>
    %261 = arith.andi %257, %260 : vector<8x128xi1>
    %cst_79 = arith.constant -0.808290362 : f32
    %262 = vector.broadcast %cst_79 : f32 to vector<8x128xf32>
    %263 = arith.mulf %251, %262 : vector<8x128xf32>
    %cst_80 = arith.constant 0.404145181 : f32
    %264 = vector.broadcast %cst_80 : f32 to vector<8x128xf32>
    %265 = arith.addf %264, %263 : vector<8x128xf32>
    %cst_81 = arith.constant 0.808290362 : f32
    %266 = vector.broadcast %cst_81 : f32 to vector<8x128xf32>
    %267 = arith.mulf %251, %266 : vector<8x128xf32>
    %cst_82 = arith.constant -0.404145181 : f32
    %268 = vector.broadcast %cst_82 : f32 to vector<8x128xf32>
    %269 = arith.addf %268, %267 : vector<8x128xf32>
    %cst_83 = arith.constant 0.000000e+00 : f32
    %270 = vector.broadcast %cst_83 : f32 to vector<8x128xf32>
    %271 = arith.mulf %251, %270 : vector<8x128xf32>
    %cst_84 = arith.constant -0.404145181 : f32
    %272 = vector.broadcast %cst_84 : f32 to vector<8x128xf32>
    %273 = arith.addf %272, %271 : vector<8x128xf32>
    %274 = arith.select %261, %265, %227 : vector<8x128xi1>, vector<8x128xf32>
    %275 = arith.select %261, %269, %234 : vector<8x128xi1>, vector<8x128xf32>
    %276 = arith.select %261, %273, %241 : vector<8x128xi1>, vector<8x128xf32>
    %277 = arith.subf %165, %197 : vector<8x128xf32>
    %cst_85 = arith.constant 0.000000e+00 : f32
    %278 = vector.broadcast %cst_85 : f32 to vector<8x128xf32>
    %279 = arith.cmpf oeq, %277, %278 : vector<8x128xf32>
    %cst_86 = arith.constant 1.000000e+00 : f32
    %280 = vector.broadcast %cst_86 : f32 to vector<8x128xf32>
    %281 = arith.select %279, %280, %277 : vector<8x128xi1>, vector<8x128xf32>
    %282 = tpu.reciprocal %281 {approx = true} : vector<8x128xf32> -> vector<8x128xf32>
    %283 = arith.mulf %165, %282 : vector<8x128xf32>
    %cst_87 = arith.constant 0.000000e+00 : f32
    %284 = vector.broadcast %cst_87 : f32 to vector<8x128xf32>
    %285 = arith.cmpf ole, %203, %284 : vector<8x128xf32>
    %cst_88 = arith.constant 0.000000e+00 : f32
    %286 = vector.broadcast %cst_88 : f32 to vector<8x128xf32>
    %287 = arith.cmpf oge, %165, %286 : vector<8x128xf32>
    %288 = arith.andi %285, %287 : vector<8x128xi1>
    %cst_89 = arith.constant 0.000000e+00 : f32
    %289 = vector.broadcast %cst_89 : f32 to vector<8x128xf32>
    %290 = arith.cmpf ole, %197, %289 : vector<8x128xf32>
    %291 = arith.andi %288, %290 : vector<8x128xi1>
    %cst_90 = arith.constant -0.808290362 : f32
    %292 = vector.broadcast %cst_90 : f32 to vector<8x128xf32>
    %293 = arith.mulf %283, %292 : vector<8x128xf32>
    %cst_91 = arith.constant 0.404145181 : f32
    %294 = vector.broadcast %cst_91 : f32 to vector<8x128xf32>
    %295 = arith.addf %294, %293 : vector<8x128xf32>
    %cst_92 = arith.constant 0.000000e+00 : f32
    %296 = vector.broadcast %cst_92 : f32 to vector<8x128xf32>
    %297 = arith.mulf %283, %296 : vector<8x128xf32>
    %cst_93 = arith.constant 0.404145181 : f32
    %298 = vector.broadcast %cst_93 : f32 to vector<8x128xf32>
    %299 = arith.addf %298, %297 : vector<8x128xf32>
    %cst_94 = arith.constant -0.808290362 : f32
    %300 = vector.broadcast %cst_94 : f32 to vector<8x128xf32>
    %301 = arith.mulf %283, %300 : vector<8x128xf32>
    %cst_95 = arith.constant 0.404145181 : f32
    %302 = vector.broadcast %cst_95 : f32 to vector<8x128xf32>
    %303 = arith.addf %302, %301 : vector<8x128xf32>
    %304 = arith.select %291, %295, %274 : vector<8x128xi1>, vector<8x128xf32>
    %305 = arith.select %291, %299, %275 : vector<8x128xi1>, vector<8x128xf32>
    %306 = arith.select %291, %303, %276 : vector<8x128xi1>, vector<8x128xf32>
    %cst_96 = arith.constant 0.000000e+00 : f32
    %307 = vector.broadcast %cst_96 : f32 to vector<8x128xf32>
    %308 = arith.cmpf oge, %197, %307 : vector<8x128xf32>
    %309 = arith.cmpf ole, %189, %197 : vector<8x128xf32>
    %310 = arith.andi %308, %309 : vector<8x128xi1>
    %cst_97 = arith.constant -0.404145181 : f32
    %311 = vector.broadcast %cst_97 : f32 to vector<8x128xf32>
    %312 = arith.select %310, %311, %304 : vector<8x128xi1>, vector<8x128xf32>
    %cst_98 = arith.constant 0.404145181 : f32
    %313 = vector.broadcast %cst_98 : f32 to vector<8x128xf32>
    %314 = arith.select %310, %313, %305 : vector<8x128xi1>, vector<8x128xf32>
    %cst_99 = arith.constant -0.404145181 : f32
    %315 = vector.broadcast %cst_99 : f32 to vector<8x128xf32>
    %316 = arith.select %310, %315, %306 : vector<8x128xi1>, vector<8x128xf32>
    %317 = arith.subf %157, %173 : vector<8x128xf32>
    %cst_100 = arith.constant 0.000000e+00 : f32
    %318 = vector.broadcast %cst_100 : f32 to vector<8x128xf32>
    %319 = arith.cmpf oeq, %317, %318 : vector<8x128xf32>
    %cst_101 = arith.constant 1.000000e+00 : f32
    %320 = vector.broadcast %cst_101 : f32 to vector<8x128xf32>
    %321 = arith.select %319, %320, %317 : vector<8x128xi1>, vector<8x128xf32>
    %322 = tpu.reciprocal %321 {approx = true} : vector<8x128xf32> -> vector<8x128xf32>
    %323 = arith.mulf %157, %322 : vector<8x128xf32>
    %cst_102 = arith.constant 0.000000e+00 : f32
    %324 = vector.broadcast %cst_102 : f32 to vector<8x128xf32>
    %325 = arith.cmpf ole, %200, %324 : vector<8x128xf32>
    %cst_103 = arith.constant 0.000000e+00 : f32
    %326 = vector.broadcast %cst_103 : f32 to vector<8x128xf32>
    %327 = arith.cmpf oge, %157, %326 : vector<8x128xf32>
    %328 = arith.andi %325, %327 : vector<8x128xi1>
    %cst_104 = arith.constant 0.000000e+00 : f32
    %329 = vector.broadcast %cst_104 : f32 to vector<8x128xf32>
    %330 = arith.cmpf ole, %173, %329 : vector<8x128xf32>
    %331 = arith.andi %328, %330 : vector<8x128xi1>
    %cst_105 = arith.constant 0.000000e+00 : f32
    %332 = vector.broadcast %cst_105 : f32 to vector<8x128xf32>
    %333 = arith.mulf %323, %332 : vector<8x128xf32>
    %cst_106 = arith.constant 0.404145181 : f32
    %334 = vector.broadcast %cst_106 : f32 to vector<8x128xf32>
    %335 = arith.addf %334, %333 : vector<8x128xf32>
    %cst_107 = arith.constant -0.808290362 : f32
    %336 = vector.broadcast %cst_107 : f32 to vector<8x128xf32>
    %337 = arith.mulf %323, %336 : vector<8x128xf32>
    %cst_108 = arith.constant 0.404145181 : f32
    %338 = vector.broadcast %cst_108 : f32 to vector<8x128xf32>
    %339 = arith.addf %338, %337 : vector<8x128xf32>
    %cst_109 = arith.constant -0.808290362 : f32
    %340 = vector.broadcast %cst_109 : f32 to vector<8x128xf32>
    %341 = arith.mulf %323, %340 : vector<8x128xf32>
    %cst_110 = arith.constant 0.404145181 : f32
    %342 = vector.broadcast %cst_110 : f32 to vector<8x128xf32>
    %343 = arith.addf %342, %341 : vector<8x128xf32>
    %344 = arith.select %331, %335, %312 : vector<8x128xi1>, vector<8x128xf32>
    %345 = arith.select %331, %339, %314 : vector<8x128xi1>, vector<8x128xf32>
    %346 = arith.select %331, %343, %316 : vector<8x128xi1>, vector<8x128xf32>
    %cst_111 = arith.constant 0.000000e+00 : f32
    %347 = vector.broadcast %cst_111 : f32 to vector<8x128xf32>
    %348 = arith.cmpf oge, %173, %347 : vector<8x128xf32>
    %349 = arith.cmpf ole, %181, %173 : vector<8x128xf32>
    %350 = arith.andi %348, %349 : vector<8x128xi1>
    %cst_112 = arith.constant 0.404145181 : f32
    %351 = vector.broadcast %cst_112 : f32 to vector<8x128xf32>
    %352 = arith.select %350, %351, %344 : vector<8x128xi1>, vector<8x128xf32>
    %cst_113 = arith.constant -0.404145181 : f32
    %353 = vector.broadcast %cst_113 : f32 to vector<8x128xf32>
    %354 = arith.select %350, %353, %345 : vector<8x128xi1>, vector<8x128xf32>
    %cst_114 = arith.constant -0.404145181 : f32
    %355 = vector.broadcast %cst_114 : f32 to vector<8x128xf32>
    %356 = arith.select %350, %355, %346 : vector<8x128xi1>, vector<8x128xf32>
    %cst_115 = arith.constant 0.000000e+00 : f32
    %357 = vector.broadcast %cst_115 : f32 to vector<8x128xf32>
    %358 = arith.cmpf ole, %157, %357 : vector<8x128xf32>
    %cst_116 = arith.constant 0.000000e+00 : f32
    %359 = vector.broadcast %cst_116 : f32 to vector<8x128xf32>
    %360 = arith.cmpf ole, %165, %359 : vector<8x128xf32>
    %361 = arith.andi %358, %360 : vector<8x128xi1>
    %cst_117 = arith.constant 0.404145181 : f32
    %362 = vector.broadcast %cst_117 : f32 to vector<8x128xf32>
    %363 = arith.select %361, %362, %352 : vector<8x128xi1>, vector<8x128xf32>
    %cst_118 = arith.constant 0.404145181 : f32
    %364 = vector.broadcast %cst_118 : f32 to vector<8x128xf32>
    %365 = arith.select %361, %364, %354 : vector<8x128xi1>, vector<8x128xf32>
    %cst_119 = arith.constant 0.404145181 : f32
    %366 = vector.broadcast %cst_119 : f32 to vector<8x128xf32>
    %367 = arith.select %361, %366, %356 : vector<8x128xi1>, vector<8x128xf32>
    %368 = arith.subf %1, %363 : vector<8x128xf32>
    %369 = arith.subf %3, %365 : vector<8x128xf32>
    %370 = arith.subf %5, %367 : vector<8x128xf32>
    %371 = arith.mulf %368, %368 : vector<8x128xf32>
    %372 = arith.mulf %369, %369 : vector<8x128xf32>
    %373 = arith.addf %371, %372 : vector<8x128xf32>
    %374 = arith.mulf %370, %370 : vector<8x128xf32>
    %375 = arith.addf %373, %374 : vector<8x128xf32>
    %376 = arith.minimumf %9, %375 : vector<8x128xf32>
    %cst_120 = arith.constant 0.404145181 : f32
    %377 = vector.broadcast %cst_120 : f32 to vector<8x128xf32>
    %378 = arith.subf %377, %1 : vector<8x128xf32>
    %cst_121 = arith.constant 0.404145181 : f32
    %379 = vector.broadcast %cst_121 : f32 to vector<8x128xf32>
    %380 = arith.subf %379, %3 : vector<8x128xf32>
    %cst_122 = arith.constant 0.404145181 : f32
    %381 = vector.broadcast %cst_122 : f32 to vector<8x128xf32>
    %382 = arith.subf %381, %5 : vector<8x128xf32>
    %cst_123 = arith.constant -0.404145181 : f32
    %383 = vector.broadcast %cst_123 : f32 to vector<8x128xf32>
    %384 = arith.subf %383, %1 : vector<8x128xf32>
    %cst_124 = arith.constant -0.404145181 : f32
    %385 = vector.broadcast %cst_124 : f32 to vector<8x128xf32>
    %386 = arith.subf %385, %3 : vector<8x128xf32>
    %cst_125 = arith.constant 0.404145181 : f32
    %387 = vector.broadcast %cst_125 : f32 to vector<8x128xf32>
    %388 = arith.subf %387, %5 : vector<8x128xf32>
    %cst_126 = arith.constant 0.404145181 : f32
    %389 = vector.broadcast %cst_126 : f32 to vector<8x128xf32>
    %390 = arith.subf %389, %1 : vector<8x128xf32>
    %cst_127 = arith.constant -0.404145181 : f32
    %391 = vector.broadcast %cst_127 : f32 to vector<8x128xf32>
    %392 = arith.subf %391, %3 : vector<8x128xf32>
    %cst_128 = arith.constant -0.404145181 : f32
    %393 = vector.broadcast %cst_128 : f32 to vector<8x128xf32>
    %394 = arith.subf %393, %5 : vector<8x128xf32>
    %395 = arith.mulf %378, %378 : vector<8x128xf32>
    %396 = arith.mulf %380, %380 : vector<8x128xf32>
    %397 = arith.addf %395, %396 : vector<8x128xf32>
    %398 = arith.mulf %382, %382 : vector<8x128xf32>
    %399 = arith.addf %397, %398 : vector<8x128xf32>
    %400 = math.sqrt %399 : vector<8x128xf32>
    %401 = arith.mulf %384, %384 : vector<8x128xf32>
    %402 = arith.mulf %386, %386 : vector<8x128xf32>
    %403 = arith.addf %401, %402 : vector<8x128xf32>
    %404 = arith.mulf %388, %388 : vector<8x128xf32>
    %405 = arith.addf %403, %404 : vector<8x128xf32>
    %406 = math.sqrt %405 : vector<8x128xf32>
    %407 = arith.mulf %390, %390 : vector<8x128xf32>
    %408 = arith.mulf %392, %392 : vector<8x128xf32>
    %409 = arith.addf %407, %408 : vector<8x128xf32>
    %410 = arith.mulf %394, %394 : vector<8x128xf32>
    %411 = arith.addf %409, %410 : vector<8x128xf32>
    %412 = math.sqrt %411 : vector<8x128xf32>
    %413 = arith.mulf %386, %394 : vector<8x128xf32>
    %414 = arith.mulf %388, %392 : vector<8x128xf32>
    %415 = arith.subf %413, %414 : vector<8x128xf32>
    %416 = arith.mulf %388, %390 : vector<8x128xf32>
    %417 = arith.mulf %384, %394 : vector<8x128xf32>
    %418 = arith.subf %416, %417 : vector<8x128xf32>
    %419 = arith.mulf %384, %392 : vector<8x128xf32>
    %420 = arith.mulf %386, %390 : vector<8x128xf32>
    %421 = arith.subf %419, %420 : vector<8x128xf32>
    %422 = arith.mulf %378, %415 : vector<8x128xf32>
    %423 = arith.mulf %380, %418 : vector<8x128xf32>
    %424 = arith.addf %422, %423 : vector<8x128xf32>
    %425 = arith.mulf %382, %421 : vector<8x128xf32>
    %426 = arith.addf %424, %425 : vector<8x128xf32>
    %427 = arith.mulf %400, %406 : vector<8x128xf32>
    %428 = arith.mulf %427, %412 : vector<8x128xf32>
    %429 = arith.mulf %378, %384 : vector<8x128xf32>
    %430 = arith.mulf %380, %386 : vector<8x128xf32>
    %431 = arith.addf %429, %430 : vector<8x128xf32>
    %432 = arith.mulf %382, %388 : vector<8x128xf32>
    %433 = arith.addf %431, %432 : vector<8x128xf32>
    %434 = arith.mulf %433, %412 : vector<8x128xf32>
    %435 = arith.addf %428, %434 : vector<8x128xf32>
    %436 = arith.mulf %384, %390 : vector<8x128xf32>
    %437 = arith.mulf %386, %392 : vector<8x128xf32>
    %438 = arith.addf %436, %437 : vector<8x128xf32>
    %439 = arith.mulf %388, %394 : vector<8x128xf32>
    %440 = arith.addf %438, %439 : vector<8x128xf32>
    %441 = arith.mulf %440, %400 : vector<8x128xf32>
    %442 = arith.addf %435, %441 : vector<8x128xf32>
    %443 = arith.mulf %390, %378 : vector<8x128xf32>
    %444 = arith.mulf %392, %380 : vector<8x128xf32>
    %445 = arith.addf %443, %444 : vector<8x128xf32>
    %446 = arith.mulf %394, %382 : vector<8x128xf32>
    %447 = arith.addf %445, %446 : vector<8x128xf32>
    %448 = arith.mulf %447, %406 : vector<8x128xf32>
    %449 = arith.addf %442, %448 : vector<8x128xf32>
    %450 = math.absf %426 : vector<8x128xf32>
    %451 = math.absf %449 : vector<8x128xf32>
    %452 = arith.cmpf ogt, %450, %451 : vector<8x128xf32>
    %453 = arith.select %452, %451, %450 : vector<8x128xi1>, vector<8x128xf32>
    %454 = arith.select %452, %450, %451 : vector<8x128xi1>, vector<8x128xf32>
    %cst_129 = arith.constant 0.000000e+00 : f32
    %455 = vector.broadcast %cst_129 : f32 to vector<8x128xf32>
    %456 = arith.cmpf oeq, %454, %455 : vector<8x128xf32>
    %cst_130 = arith.constant 1.000000e+00 : f32
    %457 = vector.broadcast %cst_130 : f32 to vector<8x128xf32>
    %458 = arith.select %456, %457, %454 : vector<8x128xi1>, vector<8x128xf32>
    %459 = tpu.reciprocal %458 {approx = true} : vector<8x128xf32> -> vector<8x128xf32>
    %460 = arith.mulf %453, %459 : vector<8x128xf32>
    %461 = arith.mulf %460, %460 : vector<8x128xf32>
    %cst_131 = arith.constant 2.083510e-02 : f32
    %462 = vector.broadcast %cst_131 : f32 to vector<8x128xf32>
    %463 = arith.mulf %461, %462 : vector<8x128xf32>
    %cst_132 = arith.constant -8.513300e-02 : f32
    %464 = vector.broadcast %cst_132 : f32 to vector<8x128xf32>
    %465 = arith.addf %464, %463 : vector<8x128xf32>
    %466 = arith.mulf %461, %465 : vector<8x128xf32>
    %cst_133 = arith.constant 1.801410e-01 : f32
    %467 = vector.broadcast %cst_133 : f32 to vector<8x128xf32>
    %468 = arith.addf %467, %466 : vector<8x128xf32>
    %469 = arith.mulf %461, %468 : vector<8x128xf32>
    %cst_134 = arith.constant -0.330299497 : f32
    %470 = vector.broadcast %cst_134 : f32 to vector<8x128xf32>
    %471 = arith.addf %470, %469 : vector<8x128xf32>
    %472 = arith.mulf %461, %471 : vector<8x128xf32>
    %cst_135 = arith.constant 9.998660e-01 : f32
    %473 = vector.broadcast %cst_135 : f32 to vector<8x128xf32>
    %474 = arith.addf %473, %472 : vector<8x128xf32>
    %475 = arith.mulf %460, %474 : vector<8x128xf32>
    %cst_136 = arith.constant 1.57079637 : f32
    %476 = vector.broadcast %cst_136 : f32 to vector<8x128xf32>
    %477 = arith.subf %476, %475 : vector<8x128xf32>
    %478 = arith.select %452, %477, %475 : vector<8x128xi1>, vector<8x128xf32>
    %cst_137 = arith.constant 0.000000e+00 : f32
    %479 = vector.broadcast %cst_137 : f32 to vector<8x128xf32>
    %480 = arith.cmpf olt, %449, %479 : vector<8x128xf32>
    %cst_138 = arith.constant 3.14159274 : f32
    %481 = vector.broadcast %cst_138 : f32 to vector<8x128xf32>
    %482 = arith.subf %481, %478 : vector<8x128xf32>
    %483 = arith.select %480, %482, %478 : vector<8x128xi1>, vector<8x128xf32>
    %cst_139 = arith.constant 0.000000e+00 : f32
    %484 = vector.broadcast %cst_139 : f32 to vector<8x128xf32>
    %485 = arith.cmpf olt, %426, %484 : vector<8x128xf32>
    %cst_140 = arith.constant 0.000000e+00 : f32
    %486 = vector.broadcast %cst_140 : f32 to vector<8x128xf32>
    %487 = arith.subf %486, %483 : vector<8x128xf32>
    %488 = arith.select %485, %487, %483 : vector<8x128xi1>, vector<8x128xf32>
    %cst_141 = arith.constant 0.000000e+00 : f32
    %489 = vector.broadcast %cst_141 : f32 to vector<8x128xf32>
    %490 = arith.cmpf oeq, %451, %489 : vector<8x128xf32>
    %cst_142 = arith.constant 0.000000e+00 : f32
    %491 = vector.broadcast %cst_142 : f32 to vector<8x128xf32>
    %492 = arith.cmpf oeq, %450, %491 : vector<8x128xf32>
    %493 = arith.andi %490, %492 : vector<8x128xi1>
    %cst_143 = arith.constant 0.000000e+00 : f32
    %494 = vector.broadcast %cst_143 : f32 to vector<8x128xf32>
    %495 = arith.select %493, %494, %488 : vector<8x128xi1>, vector<8x128xf32>
    %cst_144 = arith.constant 2.000000e+00 : f32
    %496 = vector.broadcast %cst_144 : f32 to vector<8x128xf32>
    %497 = arith.mulf %496, %495 : vector<8x128xf32>
    %498 = arith.addf %131, %497 : vector<8x128xf32>
    %cst_145 = arith.constant 0.404145181 : f32
    %499 = vector.broadcast %cst_145 : f32 to vector<8x128xf32>
    %500 = arith.subf %1, %499 : vector<8x128xf32>
    %cst_146 = arith.constant 0.404145181 : f32
    %501 = vector.broadcast %cst_146 : f32 to vector<8x128xf32>
    %502 = arith.subf %3, %501 : vector<8x128xf32>
    %cst_147 = arith.constant 0.404145181 : f32
    %503 = vector.broadcast %cst_147 : f32 to vector<8x128xf32>
    %504 = arith.subf %5, %503 : vector<8x128xf32>
    %cst_148 = arith.constant -0.404145181 : f32
    %505 = vector.broadcast %cst_148 : f32 to vector<8x128xf32>
    %506 = arith.subf %1, %505 : vector<8x128xf32>
    %cst_149 = arith.constant -0.404145181 : f32
    %507 = vector.broadcast %cst_149 : f32 to vector<8x128xf32>
    %508 = arith.subf %3, %507 : vector<8x128xf32>
    %cst_150 = arith.constant 0.404145181 : f32
    %509 = vector.broadcast %cst_150 : f32 to vector<8x128xf32>
    %510 = arith.subf %5, %509 : vector<8x128xf32>
    %cst_151 = arith.constant 0.404145181 : f32
    %511 = vector.broadcast %cst_151 : f32 to vector<8x128xf32>
    %512 = arith.subf %1, %511 : vector<8x128xf32>
    %cst_152 = arith.constant -0.404145181 : f32
    %513 = vector.broadcast %cst_152 : f32 to vector<8x128xf32>
    %514 = arith.subf %3, %513 : vector<8x128xf32>
    %cst_153 = arith.constant -0.404145181 : f32
    %515 = vector.broadcast %cst_153 : f32 to vector<8x128xf32>
    %516 = arith.subf %5, %515 : vector<8x128xf32>
    %cst_154 = arith.constant -0.808290362 : f32
    %517 = vector.broadcast %cst_154 : f32 to vector<8x128xf32>
    %518 = arith.mulf %517, %500 : vector<8x128xf32>
    %cst_155 = arith.constant -0.808290362 : f32
    %519 = vector.broadcast %cst_155 : f32 to vector<8x128xf32>
    %520 = arith.mulf %519, %502 : vector<8x128xf32>
    %521 = arith.addf %518, %520 : vector<8x128xf32>
    %cst_156 = arith.constant 0.000000e+00 : f32
    %522 = vector.broadcast %cst_156 : f32 to vector<8x128xf32>
    %523 = arith.mulf %522, %504 : vector<8x128xf32>
    %524 = arith.addf %521, %523 : vector<8x128xf32>
    %cst_157 = arith.constant 0.000000e+00 : f32
    %525 = vector.broadcast %cst_157 : f32 to vector<8x128xf32>
    %526 = arith.mulf %525, %500 : vector<8x128xf32>
    %cst_158 = arith.constant -0.808290362 : f32
    %527 = vector.broadcast %cst_158 : f32 to vector<8x128xf32>
    %528 = arith.mulf %527, %502 : vector<8x128xf32>
    %529 = arith.addf %526, %528 : vector<8x128xf32>
    %cst_159 = arith.constant -0.808290362 : f32
    %530 = vector.broadcast %cst_159 : f32 to vector<8x128xf32>
    %531 = arith.mulf %530, %504 : vector<8x128xf32>
    %532 = arith.addf %529, %531 : vector<8x128xf32>
    %cst_160 = arith.constant -0.808290362 : f32
    %533 = vector.broadcast %cst_160 : f32 to vector<8x128xf32>
    %534 = arith.mulf %533, %506 : vector<8x128xf32>
    %cst_161 = arith.constant -0.808290362 : f32
    %535 = vector.broadcast %cst_161 : f32 to vector<8x128xf32>
    %536 = arith.mulf %535, %508 : vector<8x128xf32>
    %537 = arith.addf %534, %536 : vector<8x128xf32>
    %cst_162 = arith.constant 0.000000e+00 : f32
    %538 = vector.broadcast %cst_162 : f32 to vector<8x128xf32>
    %539 = arith.mulf %538, %510 : vector<8x128xf32>
    %540 = arith.addf %537, %539 : vector<8x128xf32>
    %cst_163 = arith.constant 0.000000e+00 : f32
    %541 = vector.broadcast %cst_163 : f32 to vector<8x128xf32>
    %542 = arith.mulf %541, %506 : vector<8x128xf32>
    %cst_164 = arith.constant -0.808290362 : f32
    %543 = vector.broadcast %cst_164 : f32 to vector<8x128xf32>
    %544 = arith.mulf %543, %508 : vector<8x128xf32>
    %545 = arith.addf %542, %544 : vector<8x128xf32>
    %cst_165 = arith.constant -0.808290362 : f32
    %546 = vector.broadcast %cst_165 : f32 to vector<8x128xf32>
    %547 = arith.mulf %546, %510 : vector<8x128xf32>
    %548 = arith.addf %545, %547 : vector<8x128xf32>
    %cst_166 = arith.constant -0.808290362 : f32
    %549 = vector.broadcast %cst_166 : f32 to vector<8x128xf32>
    %550 = arith.mulf %549, %512 : vector<8x128xf32>
    %cst_167 = arith.constant -0.808290362 : f32
    %551 = vector.broadcast %cst_167 : f32 to vector<8x128xf32>
    %552 = arith.mulf %551, %514 : vector<8x128xf32>
    %553 = arith.addf %550, %552 : vector<8x128xf32>
    %cst_168 = arith.constant 0.000000e+00 : f32
    %554 = vector.broadcast %cst_168 : f32 to vector<8x128xf32>
    %555 = arith.mulf %554, %516 : vector<8x128xf32>
    %556 = arith.addf %553, %555 : vector<8x128xf32>
    %cst_169 = arith.constant 0.000000e+00 : f32
    %557 = vector.broadcast %cst_169 : f32 to vector<8x128xf32>
    %558 = arith.mulf %557, %512 : vector<8x128xf32>
    %cst_170 = arith.constant -0.808290362 : f32
    %559 = vector.broadcast %cst_170 : f32 to vector<8x128xf32>
    %560 = arith.mulf %559, %514 : vector<8x128xf32>
    %561 = arith.addf %558, %560 : vector<8x128xf32>
    %cst_171 = arith.constant -0.808290362 : f32
    %562 = vector.broadcast %cst_171 : f32 to vector<8x128xf32>
    %563 = arith.mulf %562, %516 : vector<8x128xf32>
    %564 = arith.addf %561, %563 : vector<8x128xf32>
    %565 = arith.mulf %524, %548 : vector<8x128xf32>
    %566 = arith.mulf %540, %532 : vector<8x128xf32>
    %567 = arith.subf %565, %566 : vector<8x128xf32>
    %568 = arith.mulf %556, %532 : vector<8x128xf32>
    %569 = arith.mulf %524, %564 : vector<8x128xf32>
    %570 = arith.subf %568, %569 : vector<8x128xf32>
    %571 = arith.mulf %540, %564 : vector<8x128xf32>
    %572 = arith.mulf %556, %548 : vector<8x128xf32>
    %573 = arith.subf %571, %572 : vector<8x128xf32>
    %574 = arith.addf %573, %570 : vector<8x128xf32>
    %575 = arith.addf %574, %567 : vector<8x128xf32>
    %cst_172 = arith.constant 0.000000e+00 : f32
    %576 = vector.broadcast %cst_172 : f32 to vector<8x128xf32>
    %577 = arith.cmpf oeq, %575, %576 : vector<8x128xf32>
    %cst_173 = arith.constant 1.000000e+00 : f32
    %578 = vector.broadcast %cst_173 : f32 to vector<8x128xf32>
    %579 = arith.select %577, %578, %575 : vector<8x128xi1>, vector<8x128xf32>
    %580 = tpu.reciprocal %579 {approx = true} : vector<8x128xf32> -> vector<8x128xf32>
    %581 = arith.mulf %570, %580 : vector<8x128xf32>
    %cst_174 = arith.constant 0.000000e+00 : f32
    %582 = vector.broadcast %cst_174 : f32 to vector<8x128xf32>
    %583 = arith.cmpf oeq, %575, %582 : vector<8x128xf32>
    %cst_175 = arith.constant 1.000000e+00 : f32
    %584 = vector.broadcast %cst_175 : f32 to vector<8x128xf32>
    %585 = arith.select %583, %584, %575 : vector<8x128xi1>, vector<8x128xf32>
    %586 = tpu.reciprocal %585 {approx = true} : vector<8x128xf32> -> vector<8x128xf32>
    %587 = arith.mulf %567, %586 : vector<8x128xf32>
    %cst_176 = arith.constant -0.808290362 : f32
    %588 = vector.broadcast %cst_176 : f32 to vector<8x128xf32>
    %589 = arith.mulf %581, %588 : vector<8x128xf32>
    %cst_177 = arith.constant 0.404145181 : f32
    %590 = vector.broadcast %cst_177 : f32 to vector<8x128xf32>
    %591 = arith.addf %590, %589 : vector<8x128xf32>
    %cst_178 = arith.constant 0.000000e+00 : f32
    %592 = vector.broadcast %cst_178 : f32 to vector<8x128xf32>
    %593 = arith.mulf %587, %592 : vector<8x128xf32>
    %594 = arith.addf %591, %593 : vector<8x128xf32>
    %cst_179 = arith.constant -0.808290362 : f32
    %595 = vector.broadcast %cst_179 : f32 to vector<8x128xf32>
    %596 = arith.mulf %581, %595 : vector<8x128xf32>
    %cst_180 = arith.constant 0.404145181 : f32
    %597 = vector.broadcast %cst_180 : f32 to vector<8x128xf32>
    %598 = arith.addf %597, %596 : vector<8x128xf32>
    %cst_181 = arith.constant -0.808290362 : f32
    %599 = vector.broadcast %cst_181 : f32 to vector<8x128xf32>
    %600 = arith.mulf %587, %599 : vector<8x128xf32>
    %601 = arith.addf %598, %600 : vector<8x128xf32>
    %cst_182 = arith.constant 0.000000e+00 : f32
    %602 = vector.broadcast %cst_182 : f32 to vector<8x128xf32>
    %603 = arith.mulf %581, %602 : vector<8x128xf32>
    %cst_183 = arith.constant 0.404145181 : f32
    %604 = vector.broadcast %cst_183 : f32 to vector<8x128xf32>
    %605 = arith.addf %604, %603 : vector<8x128xf32>
    %cst_184 = arith.constant -0.808290362 : f32
    %606 = vector.broadcast %cst_184 : f32 to vector<8x128xf32>
    %607 = arith.mulf %587, %606 : vector<8x128xf32>
    %608 = arith.addf %605, %607 : vector<8x128xf32>
    %609 = arith.subf %548, %540 : vector<8x128xf32>
    %610 = arith.subf %548, %540 : vector<8x128xf32>
    %611 = arith.subf %556, %564 : vector<8x128xf32>
    %612 = arith.addf %610, %611 : vector<8x128xf32>
    %cst_185 = arith.constant 0.000000e+00 : f32
    %613 = vector.broadcast %cst_185 : f32 to vector<8x128xf32>
    %614 = arith.cmpf oeq, %612, %613 : vector<8x128xf32>
    %cst_186 = arith.constant 1.000000e+00 : f32
    %615 = vector.broadcast %cst_186 : f32 to vector<8x128xf32>
    %616 = arith.select %614, %615, %612 : vector<8x128xi1>, vector<8x128xf32>
    %617 = tpu.reciprocal %616 {approx = true} : vector<8x128xf32> -> vector<8x128xf32>
    %618 = arith.mulf %609, %617 : vector<8x128xf32>
    %cst_187 = arith.constant 0.000000e+00 : f32
    %619 = vector.broadcast %cst_187 : f32 to vector<8x128xf32>
    %620 = arith.cmpf ole, %573, %619 : vector<8x128xf32>
    %621 = arith.subf %548, %540 : vector<8x128xf32>
    %cst_188 = arith.constant 0.000000e+00 : f32
    %622 = vector.broadcast %cst_188 : f32 to vector<8x128xf32>
    %623 = arith.cmpf oge, %621, %622 : vector<8x128xf32>
    %624 = arith.andi %620, %623 : vector<8x128xi1>
    %625 = arith.subf %556, %564 : vector<8x128xf32>
    %cst_189 = arith.constant 0.000000e+00 : f32
    %626 = vector.broadcast %cst_189 : f32 to vector<8x128xf32>
    %627 = arith.cmpf oge, %625, %626 : vector<8x128xf32>
    %628 = arith.andi %624, %627 : vector<8x128xi1>
    %cst_190 = arith.constant 0.808290362 : f32
    %629 = vector.broadcast %cst_190 : f32 to vector<8x128xf32>
    %630 = arith.mulf %618, %629 : vector<8x128xf32>
    %cst_191 = arith.constant -0.404145181 : f32
    %631 = vector.broadcast %cst_191 : f32 to vector<8x128xf32>
    %632 = arith.addf %631, %630 : vector<8x128xf32>
    %cst_192 = arith.constant 0.000000e+00 : f32
    %633 = vector.broadcast %cst_192 : f32 to vector<8x128xf32>
    %634 = arith.mulf %618, %633 : vector<8x128xf32>
    %cst_193 = arith.constant -0.404145181 : f32
    %635 = vector.broadcast %cst_193 : f32 to vector<8x128xf32>
    %636 = arith.addf %635, %634 : vector<8x128xf32>
    %cst_194 = arith.constant -0.808290362 : f32
    %637 = vector.broadcast %cst_194 : f32 to vector<8x128xf32>
    %638 = arith.mulf %618, %637 : vector<8x128xf32>
    %cst_195 = arith.constant 0.404145181 : f32
    %639 = vector.broadcast %cst_195 : f32 to vector<8x128xf32>
    %640 = arith.addf %639, %638 : vector<8x128xf32>
    %641 = arith.select %628, %632, %594 : vector<8x128xi1>, vector<8x128xf32>
    %642 = arith.select %628, %636, %601 : vector<8x128xi1>, vector<8x128xf32>
    %643 = arith.select %628, %640, %608 : vector<8x128xi1>, vector<8x128xf32>
    %644 = arith.subf %532, %564 : vector<8x128xf32>
    %cst_196 = arith.constant 0.000000e+00 : f32
    %645 = vector.broadcast %cst_196 : f32 to vector<8x128xf32>
    %646 = arith.cmpf oeq, %644, %645 : vector<8x128xf32>
    %cst_197 = arith.constant 1.000000e+00 : f32
    %647 = vector.broadcast %cst_197 : f32 to vector<8x128xf32>
    %648 = arith.select %646, %647, %644 : vector<8x128xi1>, vector<8x128xf32>
    %649 = tpu.reciprocal %648 {approx = true} : vector<8x128xf32> -> vector<8x128xf32>
    %650 = arith.mulf %532, %649 : vector<8x128xf32>
    %cst_198 = arith.constant 0.000000e+00 : f32
    %651 = vector.broadcast %cst_198 : f32 to vector<8x128xf32>
    %652 = arith.cmpf ole, %570, %651 : vector<8x128xf32>
    %cst_199 = arith.constant 0.000000e+00 : f32
    %653 = vector.broadcast %cst_199 : f32 to vector<8x128xf32>
    %654 = arith.cmpf oge, %532, %653 : vector<8x128xf32>
    %655 = arith.andi %652, %654 : vector<8x128xi1>
    %cst_200 = arith.constant 0.000000e+00 : f32
    %656 = vector.broadcast %cst_200 : f32 to vector<8x128xf32>
    %657 = arith.cmpf ole, %564, %656 : vector<8x128xf32>
    %658 = arith.andi %655, %657 : vector<8x128xi1>
    %cst_201 = arith.constant 0.000000e+00 : f32
    %659 = vector.broadcast %cst_201 : f32 to vector<8x128xf32>
    %660 = arith.mulf %650, %659 : vector<8x128xf32>
    %cst_202 = arith.constant 0.404145181 : f32
    %661 = vector.broadcast %cst_202 : f32 to vector<8x128xf32>
    %662 = arith.addf %661, %660 : vector<8x128xf32>
    %cst_203 = arith.constant -0.808290362 : f32
    %663 = vector.broadcast %cst_203 : f32 to vector<8x128xf32>
    %664 = arith.mulf %650, %663 : vector<8x128xf32>
    %cst_204 = arith.constant 0.404145181 : f32
    %665 = vector.broadcast %cst_204 : f32 to vector<8x128xf32>
    %666 = arith.addf %665, %664 : vector<8x128xf32>
    %cst_205 = arith.constant -0.808290362 : f32
    %667 = vector.broadcast %cst_205 : f32 to vector<8x128xf32>
    %668 = arith.mulf %650, %667 : vector<8x128xf32>
    %cst_206 = arith.constant 0.404145181 : f32
    %669 = vector.broadcast %cst_206 : f32 to vector<8x128xf32>
    %670 = arith.addf %669, %668 : vector<8x128xf32>
    %671 = arith.select %658, %662, %641 : vector<8x128xi1>, vector<8x128xf32>
    %672 = arith.select %658, %666, %642 : vector<8x128xi1>, vector<8x128xf32>
    %673 = arith.select %658, %670, %643 : vector<8x128xi1>, vector<8x128xf32>
    %cst_207 = arith.constant 0.000000e+00 : f32
    %674 = vector.broadcast %cst_207 : f32 to vector<8x128xf32>
    %675 = arith.cmpf oge, %564, %674 : vector<8x128xf32>
    %676 = arith.cmpf ole, %556, %564 : vector<8x128xf32>
    %677 = arith.andi %675, %676 : vector<8x128xi1>
    %cst_208 = arith.constant 0.404145181 : f32
    %678 = vector.broadcast %cst_208 : f32 to vector<8x128xf32>
    %679 = arith.select %677, %678, %671 : vector<8x128xi1>, vector<8x128xf32>
    %cst_209 = arith.constant -0.404145181 : f32
    %680 = vector.broadcast %cst_209 : f32 to vector<8x128xf32>
    %681 = arith.select %677, %680, %672 : vector<8x128xi1>, vector<8x128xf32>
    %cst_210 = arith.constant -0.404145181 : f32
    %682 = vector.broadcast %cst_210 : f32 to vector<8x128xf32>
    %683 = arith.select %677, %682, %673 : vector<8x128xi1>, vector<8x128xf32>
    %684 = arith.subf %524, %540 : vector<8x128xf32>
    %cst_211 = arith.constant 0.000000e+00 : f32
    %685 = vector.broadcast %cst_211 : f32 to vector<8x128xf32>
    %686 = arith.cmpf oeq, %684, %685 : vector<8x128xf32>
    %cst_212 = arith.constant 1.000000e+00 : f32
    %687 = vector.broadcast %cst_212 : f32 to vector<8x128xf32>
    %688 = arith.select %686, %687, %684 : vector<8x128xi1>, vector<8x128xf32>
    %689 = tpu.reciprocal %688 {approx = true} : vector<8x128xf32> -> vector<8x128xf32>
    %690 = arith.mulf %524, %689 : vector<8x128xf32>
    %cst_213 = arith.constant 0.000000e+00 : f32
    %691 = vector.broadcast %cst_213 : f32 to vector<8x128xf32>
    %692 = arith.cmpf ole, %567, %691 : vector<8x128xf32>
    %cst_214 = arith.constant 0.000000e+00 : f32
    %693 = vector.broadcast %cst_214 : f32 to vector<8x128xf32>
    %694 = arith.cmpf oge, %524, %693 : vector<8x128xf32>
    %695 = arith.andi %692, %694 : vector<8x128xi1>
    %cst_215 = arith.constant 0.000000e+00 : f32
    %696 = vector.broadcast %cst_215 : f32 to vector<8x128xf32>
    %697 = arith.cmpf ole, %540, %696 : vector<8x128xf32>
    %698 = arith.andi %695, %697 : vector<8x128xi1>
    %cst_216 = arith.constant -0.808290362 : f32
    %699 = vector.broadcast %cst_216 : f32 to vector<8x128xf32>
    %700 = arith.mulf %690, %699 : vector<8x128xf32>
    %cst_217 = arith.constant 0.404145181 : f32
    %701 = vector.broadcast %cst_217 : f32 to vector<8x128xf32>
    %702 = arith.addf %701, %700 : vector<8x128xf32>
    %cst_218 = arith.constant -0.808290362 : f32
    %703 = vector.broadcast %cst_218 : f32 to vector<8x128xf32>
    %704 = arith.mulf %690, %703 : vector<8x128xf32>
    %cst_219 = arith.constant 0.404145181 : f32
    %705 = vector.broadcast %cst_219 : f32 to vector<8x128xf32>
    %706 = arith.addf %705, %704 : vector<8x128xf32>
    %cst_220 = arith.constant 0.000000e+00 : f32
    %707 = vector.broadcast %cst_220 : f32 to vector<8x128xf32>
    %708 = arith.mulf %690, %707 : vector<8x128xf32>
    %cst_221 = arith.constant 0.404145181 : f32
    %709 = vector.broadcast %cst_221 : f32 to vector<8x128xf32>
    %710 = arith.addf %709, %708 : vector<8x128xf32>
    %711 = arith.select %698, %702, %679 : vector<8x128xi1>, vector<8x128xf32>
    %712 = arith.select %698, %706, %681 : vector<8x128xi1>, vector<8x128xf32>
    %713 = arith.select %698, %710, %683 : vector<8x128xi1>, vector<8x128xf32>
    %cst_222 = arith.constant 0.000000e+00 : f32
    %714 = vector.broadcast %cst_222 : f32 to vector<8x128xf32>
    %715 = arith.cmpf oge, %540, %714 : vector<8x128xf32>
    %716 = arith.cmpf ole, %548, %540 : vector<8x128xf32>
    %717 = arith.andi %715, %716 : vector<8x128xi1>
    %cst_223 = arith.constant -0.404145181 : f32
    %718 = vector.broadcast %cst_223 : f32 to vector<8x128xf32>
    %719 = arith.select %717, %718, %711 : vector<8x128xi1>, vector<8x128xf32>
    %cst_224 = arith.constant -0.404145181 : f32
    %720 = vector.broadcast %cst_224 : f32 to vector<8x128xf32>
    %721 = arith.select %717, %720, %712 : vector<8x128xi1>, vector<8x128xf32>
    %cst_225 = arith.constant 0.404145181 : f32
    %722 = vector.broadcast %cst_225 : f32 to vector<8x128xf32>
    %723 = arith.select %717, %722, %713 : vector<8x128xi1>, vector<8x128xf32>
    %cst_226 = arith.constant 0.000000e+00 : f32
    %724 = vector.broadcast %cst_226 : f32 to vector<8x128xf32>
    %725 = arith.cmpf ole, %524, %724 : vector<8x128xf32>
    %cst_227 = arith.constant 0.000000e+00 : f32
    %726 = vector.broadcast %cst_227 : f32 to vector<8x128xf32>
    %727 = arith.cmpf ole, %532, %726 : vector<8x128xf32>
    %728 = arith.andi %725, %727 : vector<8x128xi1>
    %cst_228 = arith.constant 0.404145181 : f32
    %729 = vector.broadcast %cst_228 : f32 to vector<8x128xf32>
    %730 = arith.select %728, %729, %719 : vector<8x128xi1>, vector<8x128xf32>
    %cst_229 = arith.constant 0.404145181 : f32
    %731 = vector.broadcast %cst_229 : f32 to vector<8x128xf32>
    %732 = arith.select %728, %731, %721 : vector<8x128xi1>, vector<8x128xf32>
    %cst_230 = arith.constant 0.404145181 : f32
    %733 = vector.broadcast %cst_230 : f32 to vector<8x128xf32>
    %734 = arith.select %728, %733, %723 : vector<8x128xi1>, vector<8x128xf32>
    %735 = arith.subf %1, %730 : vector<8x128xf32>
    %736 = arith.subf %3, %732 : vector<8x128xf32>
    %737 = arith.subf %5, %734 : vector<8x128xf32>
    %738 = arith.mulf %735, %735 : vector<8x128xf32>
    %739 = arith.mulf %736, %736 : vector<8x128xf32>
    %740 = arith.addf %738, %739 : vector<8x128xf32>
    %741 = arith.mulf %737, %737 : vector<8x128xf32>
    %742 = arith.addf %740, %741 : vector<8x128xf32>
    %743 = arith.minimumf %376, %742 : vector<8x128xf32>
    %cst_231 = arith.constant 0.404145181 : f32
    %744 = vector.broadcast %cst_231 : f32 to vector<8x128xf32>
    %745 = arith.subf %744, %1 : vector<8x128xf32>
    %cst_232 = arith.constant 0.404145181 : f32
    %746 = vector.broadcast %cst_232 : f32 to vector<8x128xf32>
    %747 = arith.subf %746, %3 : vector<8x128xf32>
    %cst_233 = arith.constant 0.404145181 : f32
    %748 = vector.broadcast %cst_233 : f32 to vector<8x128xf32>
    %749 = arith.subf %748, %5 : vector<8x128xf32>
    %cst_234 = arith.constant -0.404145181 : f32
    %750 = vector.broadcast %cst_234 : f32 to vector<8x128xf32>
    %751 = arith.subf %750, %1 : vector<8x128xf32>
    %cst_235 = arith.constant 0.404145181 : f32
    %752 = vector.broadcast %cst_235 : f32 to vector<8x128xf32>
    %753 = arith.subf %752, %3 : vector<8x128xf32>
    %cst_236 = arith.constant -0.404145181 : f32
    %754 = vector.broadcast %cst_236 : f32 to vector<8x128xf32>
    %755 = arith.subf %754, %5 : vector<8x128xf32>
    %cst_237 = arith.constant -0.404145181 : f32
    %756 = vector.broadcast %cst_237 : f32 to vector<8x128xf32>
    %757 = arith.subf %756, %1 : vector<8x128xf32>
    %cst_238 = arith.constant -0.404145181 : f32
    %758 = vector.broadcast %cst_238 : f32 to vector<8x128xf32>
    %759 = arith.subf %758, %3 : vector<8x128xf32>
    %cst_239 = arith.constant 0.404145181 : f32
    %760 = vector.broadcast %cst_239 : f32 to vector<8x128xf32>
    %761 = arith.subf %760, %5 : vector<8x128xf32>
    %762 = arith.mulf %745, %745 : vector<8x128xf32>
    %763 = arith.mulf %747, %747 : vector<8x128xf32>
    %764 = arith.addf %762, %763 : vector<8x128xf32>
    %765 = arith.mulf %749, %749 : vector<8x128xf32>
    %766 = arith.addf %764, %765 : vector<8x128xf32>
    %767 = math.sqrt %766 : vector<8x128xf32>
    %768 = arith.mulf %751, %751 : vector<8x128xf32>
    %769 = arith.mulf %753, %753 : vector<8x128xf32>
    %770 = arith.addf %768, %769 : vector<8x128xf32>
    %771 = arith.mulf %755, %755 : vector<8x128xf32>
    %772 = arith.addf %770, %771 : vector<8x128xf32>
    %773 = math.sqrt %772 : vector<8x128xf32>
    %774 = arith.mulf %757, %757 : vector<8x128xf32>
    %775 = arith.mulf %759, %759 : vector<8x128xf32>
    %776 = arith.addf %774, %775 : vector<8x128xf32>
    %777 = arith.mulf %761, %761 : vector<8x128xf32>
    %778 = arith.addf %776, %777 : vector<8x128xf32>
    %779 = math.sqrt %778 : vector<8x128xf32>
    %780 = arith.mulf %753, %761 : vector<8x128xf32>
    %781 = arith.mulf %755, %759 : vector<8x128xf32>
    %782 = arith.subf %780, %781 : vector<8x128xf32>
    %783 = arith.mulf %755, %757 : vector<8x128xf32>
    %784 = arith.mulf %751, %761 : vector<8x128xf32>
    %785 = arith.subf %783, %784 : vector<8x128xf32>
    %786 = arith.mulf %751, %759 : vector<8x128xf32>
    %787 = arith.mulf %753, %757 : vector<8x128xf32>
    %788 = arith.subf %786, %787 : vector<8x128xf32>
    %789 = arith.mulf %745, %782 : vector<8x128xf32>
    %790 = arith.mulf %747, %785 : vector<8x128xf32>
    %791 = arith.addf %789, %790 : vector<8x128xf32>
    %792 = arith.mulf %749, %788 : vector<8x128xf32>
    %793 = arith.addf %791, %792 : vector<8x128xf32>
    %794 = arith.mulf %767, %773 : vector<8x128xf32>
    %795 = arith.mulf %794, %779 : vector<8x128xf32>
    %796 = arith.mulf %745, %751 : vector<8x128xf32>
    %797 = arith.mulf %747, %753 : vector<8x128xf32>
    %798 = arith.addf %796, %797 : vector<8x128xf32>
    %799 = arith.mulf %749, %755 : vector<8x128xf32>
    %800 = arith.addf %798, %799 : vector<8x128xf32>
    %801 = arith.mulf %800, %779 : vector<8x128xf32>
    %802 = arith.addf %795, %801 : vector<8x128xf32>
    %803 = arith.mulf %751, %757 : vector<8x128xf32>
    %804 = arith.mulf %753, %759 : vector<8x128xf32>
    %805 = arith.addf %803, %804 : vector<8x128xf32>
    %806 = arith.mulf %755, %761 : vector<8x128xf32>
    %807 = arith.addf %805, %806 : vector<8x128xf32>
    %808 = arith.mulf %807, %767 : vector<8x128xf32>
    %809 = arith.addf %802, %808 : vector<8x128xf32>
    %810 = arith.mulf %757, %745 : vector<8x128xf32>
    %811 = arith.mulf %759, %747 : vector<8x128xf32>
    %812 = arith.addf %810, %811 : vector<8x128xf32>
    %813 = arith.mulf %761, %749 : vector<8x128xf32>
    %814 = arith.addf %812, %813 : vector<8x128xf32>
    %815 = arith.mulf %814, %773 : vector<8x128xf32>
    %816 = arith.addf %809, %815 : vector<8x128xf32>
    %817 = math.absf %793 : vector<8x128xf32>
    %818 = math.absf %816 : vector<8x128xf32>
    %819 = arith.cmpf ogt, %817, %818 : vector<8x128xf32>
    %820 = arith.select %819, %818, %817 : vector<8x128xi1>, vector<8x128xf32>
    %821 = arith.select %819, %817, %818 : vector<8x128xi1>, vector<8x128xf32>
    %cst_240 = arith.constant 0.000000e+00 : f32
    %822 = vector.broadcast %cst_240 : f32 to vector<8x128xf32>
    %823 = arith.cmpf oeq, %821, %822 : vector<8x128xf32>
    %cst_241 = arith.constant 1.000000e+00 : f32
    %824 = vector.broadcast %cst_241 : f32 to vector<8x128xf32>
    %825 = arith.select %823, %824, %821 : vector<8x128xi1>, vector<8x128xf32>
    %826 = tpu.reciprocal %825 {approx = true} : vector<8x128xf32> -> vector<8x128xf32>
    %827 = arith.mulf %820, %826 : vector<8x128xf32>
    %828 = arith.mulf %827, %827 : vector<8x128xf32>
    %cst_242 = arith.constant 2.083510e-02 : f32
    %829 = vector.broadcast %cst_242 : f32 to vector<8x128xf32>
    %830 = arith.mulf %828, %829 : vector<8x128xf32>
    %cst_243 = arith.constant -8.513300e-02 : f32
    %831 = vector.broadcast %cst_243 : f32 to vector<8x128xf32>
    %832 = arith.addf %831, %830 : vector<8x128xf32>
    %833 = arith.mulf %828, %832 : vector<8x128xf32>
    %cst_244 = arith.constant 1.801410e-01 : f32
    %834 = vector.broadcast %cst_244 : f32 to vector<8x128xf32>
    %835 = arith.addf %834, %833 : vector<8x128xf32>
    %836 = arith.mulf %828, %835 : vector<8x128xf32>
    %cst_245 = arith.constant -0.330299497 : f32
    %837 = vector.broadcast %cst_245 : f32 to vector<8x128xf32>
    %838 = arith.addf %837, %836 : vector<8x128xf32>
    %839 = arith.mulf %828, %838 : vector<8x128xf32>
    %cst_246 = arith.constant 9.998660e-01 : f32
    %840 = vector.broadcast %cst_246 : f32 to vector<8x128xf32>
    %841 = arith.addf %840, %839 : vector<8x128xf32>
    %842 = arith.mulf %827, %841 : vector<8x128xf32>
    %cst_247 = arith.constant 1.57079637 : f32
    %843 = vector.broadcast %cst_247 : f32 to vector<8x128xf32>
    %844 = arith.subf %843, %842 : vector<8x128xf32>
    %845 = arith.select %819, %844, %842 : vector<8x128xi1>, vector<8x128xf32>
    %cst_248 = arith.constant 0.000000e+00 : f32
    %846 = vector.broadcast %cst_248 : f32 to vector<8x128xf32>
    %847 = arith.cmpf olt, %816, %846 : vector<8x128xf32>
    %cst_249 = arith.constant 3.14159274 : f32
    %848 = vector.broadcast %cst_249 : f32 to vector<8x128xf32>
    %849 = arith.subf %848, %845 : vector<8x128xf32>
    %850 = arith.select %847, %849, %845 : vector<8x128xi1>, vector<8x128xf32>
    %cst_250 = arith.constant 0.000000e+00 : f32
    %851 = vector.broadcast %cst_250 : f32 to vector<8x128xf32>
    %852 = arith.cmpf olt, %793, %851 : vector<8x128xf32>
    %cst_251 = arith.constant 0.000000e+00 : f32
    %853 = vector.broadcast %cst_251 : f32 to vector<8x128xf32>
    %854 = arith.subf %853, %850 : vector<8x128xf32>
    %855 = arith.select %852, %854, %850 : vector<8x128xi1>, vector<8x128xf32>
    %cst_252 = arith.constant 0.000000e+00 : f32
    %856 = vector.broadcast %cst_252 : f32 to vector<8x128xf32>
    %857 = arith.cmpf oeq, %818, %856 : vector<8x128xf32>
    %cst_253 = arith.constant 0.000000e+00 : f32
    %858 = vector.broadcast %cst_253 : f32 to vector<8x128xf32>
    %859 = arith.cmpf oeq, %817, %858 : vector<8x128xf32>
    %860 = arith.andi %857, %859 : vector<8x128xi1>
    %cst_254 = arith.constant 0.000000e+00 : f32
    %861 = vector.broadcast %cst_254 : f32 to vector<8x128xf32>
    %862 = arith.select %860, %861, %855 : vector<8x128xi1>, vector<8x128xf32>
    %cst_255 = arith.constant 2.000000e+00 : f32
    %863 = vector.broadcast %cst_255 : f32 to vector<8x128xf32>
    %864 = arith.mulf %863, %862 : vector<8x128xf32>
    %865 = arith.addf %498, %864 : vector<8x128xf32>
    %cst_256 = arith.constant 0.404145181 : f32
    %866 = vector.broadcast %cst_256 : f32 to vector<8x128xf32>
    %867 = arith.subf %1, %866 : vector<8x128xf32>
    %cst_257 = arith.constant 0.404145181 : f32
    %868 = vector.broadcast %cst_257 : f32 to vector<8x128xf32>
    %869 = arith.subf %3, %868 : vector<8x128xf32>
    %cst_258 = arith.constant 0.404145181 : f32
    %870 = vector.broadcast %cst_258 : f32 to vector<8x128xf32>
    %871 = arith.subf %5, %870 : vector<8x128xf32>
    %cst_259 = arith.constant -0.404145181 : f32
    %872 = vector.broadcast %cst_259 : f32 to vector<8x128xf32>
    %873 = arith.subf %1, %872 : vector<8x128xf32>
    %cst_260 = arith.constant 0.404145181 : f32
    %874 = vector.broadcast %cst_260 : f32 to vector<8x128xf32>
    %875 = arith.subf %3, %874 : vector<8x128xf32>
    %cst_261 = arith.constant -0.404145181 : f32
    %876 = vector.broadcast %cst_261 : f32 to vector<8x128xf32>
    %877 = arith.subf %5, %876 : vector<8x128xf32>
    %cst_262 = arith.constant -0.404145181 : f32
    %878 = vector.broadcast %cst_262 : f32 to vector<8x128xf32>
    %879 = arith.subf %1, %878 : vector<8x128xf32>
    %cst_263 = arith.constant -0.404145181 : f32
    %880 = vector.broadcast %cst_263 : f32 to vector<8x128xf32>
    %881 = arith.subf %3, %880 : vector<8x128xf32>
    %cst_264 = arith.constant 0.404145181 : f32
    %882 = vector.broadcast %cst_264 : f32 to vector<8x128xf32>
    %883 = arith.subf %5, %882 : vector<8x128xf32>
    %cst_265 = arith.constant -0.808290362 : f32
    %884 = vector.broadcast %cst_265 : f32 to vector<8x128xf32>
    %885 = arith.mulf %884, %867 : vector<8x128xf32>
    %cst_266 = arith.constant 0.000000e+00 : f32
    %886 = vector.broadcast %cst_266 : f32 to vector<8x128xf32>
    %887 = arith.mulf %886, %869 : vector<8x128xf32>
    %888 = arith.addf %885, %887 : vector<8x128xf32>
    %cst_267 = arith.constant -0.808290362 : f32
    %889 = vector.broadcast %cst_267 : f32 to vector<8x128xf32>
    %890 = arith.mulf %889, %871 : vector<8x128xf32>
    %891 = arith.addf %888, %890 : vector<8x128xf32>
    %cst_268 = arith.constant -0.808290362 : f32
    %892 = vector.broadcast %cst_268 : f32 to vector<8x128xf32>
    %893 = arith.mulf %892, %867 : vector<8x128xf32>
    %cst_269 = arith.constant -0.808290362 : f32
    %894 = vector.broadcast %cst_269 : f32 to vector<8x128xf32>
    %895 = arith.mulf %894, %869 : vector<8x128xf32>
    %896 = arith.addf %893, %895 : vector<8x128xf32>
    %cst_270 = arith.constant 0.000000e+00 : f32
    %897 = vector.broadcast %cst_270 : f32 to vector<8x128xf32>
    %898 = arith.mulf %897, %871 : vector<8x128xf32>
    %899 = arith.addf %896, %898 : vector<8x128xf32>
    %cst_271 = arith.constant -0.808290362 : f32
    %900 = vector.broadcast %cst_271 : f32 to vector<8x128xf32>
    %901 = arith.mulf %900, %873 : vector<8x128xf32>
    %cst_272 = arith.constant 0.000000e+00 : f32
    %902 = vector.broadcast %cst_272 : f32 to vector<8x128xf32>
    %903 = arith.mulf %902, %875 : vector<8x128xf32>
    %904 = arith.addf %901, %903 : vector<8x128xf32>
    %cst_273 = arith.constant -0.808290362 : f32
    %905 = vector.broadcast %cst_273 : f32 to vector<8x128xf32>
    %906 = arith.mulf %905, %877 : vector<8x128xf32>
    %907 = arith.addf %904, %906 : vector<8x128xf32>
    %cst_274 = arith.constant -0.808290362 : f32
    %908 = vector.broadcast %cst_274 : f32 to vector<8x128xf32>
    %909 = arith.mulf %908, %873 : vector<8x128xf32>
    %cst_275 = arith.constant -0.808290362 : f32
    %910 = vector.broadcast %cst_275 : f32 to vector<8x128xf32>
    %911 = arith.mulf %910, %875 : vector<8x128xf32>
    %912 = arith.addf %909, %911 : vector<8x128xf32>
    %cst_276 = arith.constant 0.000000e+00 : f32
    %913 = vector.broadcast %cst_276 : f32 to vector<8x128xf32>
    %914 = arith.mulf %913, %877 : vector<8x128xf32>
    %915 = arith.addf %912, %914 : vector<8x128xf32>
    %cst_277 = arith.constant -0.808290362 : f32
    %916 = vector.broadcast %cst_277 : f32 to vector<8x128xf32>
    %917 = arith.mulf %916, %879 : vector<8x128xf32>
    %cst_278 = arith.constant 0.000000e+00 : f32
    %918 = vector.broadcast %cst_278 : f32 to vector<8x128xf32>
    %919 = arith.mulf %918, %881 : vector<8x128xf32>
    %920 = arith.addf %917, %919 : vector<8x128xf32>
    %cst_279 = arith.constant -0.808290362 : f32
    %921 = vector.broadcast %cst_279 : f32 to vector<8x128xf32>
    %922 = arith.mulf %921, %883 : vector<8x128xf32>
    %923 = arith.addf %920, %922 : vector<8x128xf32>
    %cst_280 = arith.constant -0.808290362 : f32
    %924 = vector.broadcast %cst_280 : f32 to vector<8x128xf32>
    %925 = arith.mulf %924, %879 : vector<8x128xf32>
    %cst_281 = arith.constant -0.808290362 : f32
    %926 = vector.broadcast %cst_281 : f32 to vector<8x128xf32>
    %927 = arith.mulf %926, %881 : vector<8x128xf32>
    %928 = arith.addf %925, %927 : vector<8x128xf32>
    %cst_282 = arith.constant 0.000000e+00 : f32
    %929 = vector.broadcast %cst_282 : f32 to vector<8x128xf32>
    %930 = arith.mulf %929, %883 : vector<8x128xf32>
    %931 = arith.addf %928, %930 : vector<8x128xf32>
    %932 = arith.mulf %891, %915 : vector<8x128xf32>
    %933 = arith.mulf %907, %899 : vector<8x128xf32>
    %934 = arith.subf %932, %933 : vector<8x128xf32>
    %935 = arith.mulf %923, %899 : vector<8x128xf32>
    %936 = arith.mulf %891, %931 : vector<8x128xf32>
    %937 = arith.subf %935, %936 : vector<8x128xf32>
    %938 = arith.mulf %907, %931 : vector<8x128xf32>
    %939 = arith.mulf %923, %915 : vector<8x128xf32>
    %940 = arith.subf %938, %939 : vector<8x128xf32>
    %941 = arith.addf %940, %937 : vector<8x128xf32>
    %942 = arith.addf %941, %934 : vector<8x128xf32>
    %cst_283 = arith.constant 0.000000e+00 : f32
    %943 = vector.broadcast %cst_283 : f32 to vector<8x128xf32>
    %944 = arith.cmpf oeq, %942, %943 : vector<8x128xf32>
    %cst_284 = arith.constant 1.000000e+00 : f32
    %945 = vector.broadcast %cst_284 : f32 to vector<8x128xf32>
    %946 = arith.select %944, %945, %942 : vector<8x128xi1>, vector<8x128xf32>
    %947 = tpu.reciprocal %946 {approx = true} : vector<8x128xf32> -> vector<8x128xf32>
    %948 = arith.mulf %937, %947 : vector<8x128xf32>
    %cst_285 = arith.constant 0.000000e+00 : f32
    %949 = vector.broadcast %cst_285 : f32 to vector<8x128xf32>
    %950 = arith.cmpf oeq, %942, %949 : vector<8x128xf32>
    %cst_286 = arith.constant 1.000000e+00 : f32
    %951 = vector.broadcast %cst_286 : f32 to vector<8x128xf32>
    %952 = arith.select %950, %951, %942 : vector<8x128xi1>, vector<8x128xf32>
    %953 = tpu.reciprocal %952 {approx = true} : vector<8x128xf32> -> vector<8x128xf32>
    %954 = arith.mulf %934, %953 : vector<8x128xf32>
    %cst_287 = arith.constant -0.808290362 : f32
    %955 = vector.broadcast %cst_287 : f32 to vector<8x128xf32>
    %956 = arith.mulf %948, %955 : vector<8x128xf32>
    %cst_288 = arith.constant 0.404145181 : f32
    %957 = vector.broadcast %cst_288 : f32 to vector<8x128xf32>
    %958 = arith.addf %957, %956 : vector<8x128xf32>
    %cst_289 = arith.constant -0.808290362 : f32
    %959 = vector.broadcast %cst_289 : f32 to vector<8x128xf32>
    %960 = arith.mulf %954, %959 : vector<8x128xf32>
    %961 = arith.addf %958, %960 : vector<8x128xf32>
    %cst_290 = arith.constant 0.000000e+00 : f32
    %962 = vector.broadcast %cst_290 : f32 to vector<8x128xf32>
    %963 = arith.mulf %948, %962 : vector<8x128xf32>
    %cst_291 = arith.constant 0.404145181 : f32
    %964 = vector.broadcast %cst_291 : f32 to vector<8x128xf32>
    %965 = arith.addf %964, %963 : vector<8x128xf32>
    %cst_292 = arith.constant -0.808290362 : f32
    %966 = vector.broadcast %cst_292 : f32 to vector<8x128xf32>
    %967 = arith.mulf %954, %966 : vector<8x128xf32>
    %968 = arith.addf %965, %967 : vector<8x128xf32>
    %cst_293 = arith.constant -0.808290362 : f32
    %969 = vector.broadcast %cst_293 : f32 to vector<8x128xf32>
    %970 = arith.mulf %948, %969 : vector<8x128xf32>
    %cst_294 = arith.constant 0.404145181 : f32
    %971 = vector.broadcast %cst_294 : f32 to vector<8x128xf32>
    %972 = arith.addf %971, %970 : vector<8x128xf32>
    %cst_295 = arith.constant 0.000000e+00 : f32
    %973 = vector.broadcast %cst_295 : f32 to vector<8x128xf32>
    %974 = arith.mulf %954, %973 : vector<8x128xf32>
    %975 = arith.addf %972, %974 : vector<8x128xf32>
    %976 = arith.subf %915, %907 : vector<8x128xf32>
    %977 = arith.subf %915, %907 : vector<8x128xf32>
    %978 = arith.subf %923, %931 : vector<8x128xf32>
    %979 = arith.addf %977, %978 : vector<8x128xf32>
    %cst_296 = arith.constant 0.000000e+00 : f32
    %980 = vector.broadcast %cst_296 : f32 to vector<8x128xf32>
    %981 = arith.cmpf oeq, %979, %980 : vector<8x128xf32>
    %cst_297 = arith.constant 1.000000e+00 : f32
    %982 = vector.broadcast %cst_297 : f32 to vector<8x128xf32>
    %983 = arith.select %981, %982, %979 : vector<8x128xi1>, vector<8x128xf32>
    %984 = tpu.reciprocal %983 {approx = true} : vector<8x128xf32> -> vector<8x128xf32>
    %985 = arith.mulf %976, %984 : vector<8x128xf32>
    %cst_298 = arith.constant 0.000000e+00 : f32
    %986 = vector.broadcast %cst_298 : f32 to vector<8x128xf32>
    %987 = arith.cmpf ole, %940, %986 : vector<8x128xf32>
    %988 = arith.subf %915, %907 : vector<8x128xf32>
    %cst_299 = arith.constant 0.000000e+00 : f32
    %989 = vector.broadcast %cst_299 : f32 to vector<8x128xf32>
    %990 = arith.cmpf oge, %988, %989 : vector<8x128xf32>
    %991 = arith.andi %987, %990 : vector<8x128xi1>
    %992 = arith.subf %923, %931 : vector<8x128xf32>
    %cst_300 = arith.constant 0.000000e+00 : f32
    %993 = vector.broadcast %cst_300 : f32 to vector<8x128xf32>
    %994 = arith.cmpf oge, %992, %993 : vector<8x128xf32>
    %995 = arith.andi %991, %994 : vector<8x128xi1>
    %cst_301 = arith.constant 0.000000e+00 : f32
    %996 = vector.broadcast %cst_301 : f32 to vector<8x128xf32>
    %997 = arith.mulf %985, %996 : vector<8x128xf32>
    %cst_302 = arith.constant -0.404145181 : f32
    %998 = vector.broadcast %cst_302 : f32 to vector<8x128xf32>
    %999 = arith.addf %998, %997 : vector<8x128xf32>
    %cst_303 = arith.constant -0.808290362 : f32
    %1000 = vector.broadcast %cst_303 : f32 to vector<8x128xf32>
    %1001 = arith.mulf %985, %1000 : vector<8x128xf32>
    %cst_304 = arith.constant 0.404145181 : f32
    %1002 = vector.broadcast %cst_304 : f32 to vector<8x128xf32>
    %1003 = arith.addf %1002, %1001 : vector<8x128xf32>
    %cst_305 = arith.constant 0.808290362 : f32
    %1004 = vector.broadcast %cst_305 : f32 to vector<8x128xf32>
    %1005 = arith.mulf %985, %1004 : vector<8x128xf32>
    %cst_306 = arith.constant -0.404145181 : f32
    %1006 = vector.broadcast %cst_306 : f32 to vector<8x128xf32>
    %1007 = arith.addf %1006, %1005 : vector<8x128xf32>
    %1008 = arith.select %995, %999, %961 : vector<8x128xi1>, vector<8x128xf32>
    %1009 = arith.select %995, %1003, %968 : vector<8x128xi1>, vector<8x128xf32>
    %1010 = arith.select %995, %1007, %975 : vector<8x128xi1>, vector<8x128xf32>
    %1011 = arith.subf %899, %931 : vector<8x128xf32>
    %cst_307 = arith.constant 0.000000e+00 : f32
    %1012 = vector.broadcast %cst_307 : f32 to vector<8x128xf32>
    %1013 = arith.cmpf oeq, %1011, %1012 : vector<8x128xf32>
    %cst_308 = arith.constant 1.000000e+00 : f32
    %1014 = vector.broadcast %cst_308 : f32 to vector<8x128xf32>
    %1015 = arith.select %1013, %1014, %1011 : vector<8x128xi1>, vector<8x128xf32>
    %1016 = tpu.reciprocal %1015 {approx = true} : vector<8x128xf32> -> vector<8x128xf32>
    %1017 = arith.mulf %899, %1016 : vector<8x128xf32>
    %cst_309 = arith.constant 0.000000e+00 : f32
    %1018 = vector.broadcast %cst_309 : f32 to vector<8x128xf32>
    %1019 = arith.cmpf ole, %937, %1018 : vector<8x128xf32>
    %cst_310 = arith.constant 0.000000e+00 : f32
    %1020 = vector.broadcast %cst_310 : f32 to vector<8x128xf32>
    %1021 = arith.cmpf oge, %899, %1020 : vector<8x128xf32>
    %1022 = arith.andi %1019, %1021 : vector<8x128xi1>
    %cst_311 = arith.constant 0.000000e+00 : f32
    %1023 = vector.broadcast %cst_311 : f32 to vector<8x128xf32>
    %1024 = arith.cmpf ole, %931, %1023 : vector<8x128xf32>
    %1025 = arith.andi %1022, %1024 : vector<8x128xi1>
    %cst_312 = arith.constant -0.808290362 : f32
    %1026 = vector.broadcast %cst_312 : f32 to vector<8x128xf32>
    %1027 = arith.mulf %1017, %1026 : vector<8x128xf32>
    %cst_313 = arith.constant 0.404145181 : f32
    %1028 = vector.broadcast %cst_313 : f32 to vector<8x128xf32>
    %1029 = arith.addf %1028, %1027 : vector<8x128xf32>
    %cst_314 = arith.constant -0.808290362 : f32
    %1030 = vector.broadcast %cst_314 : f32 to vector<8x128xf32>
    %1031 = arith.mulf %1017, %1030 : vector<8x128xf32>
    %cst_315 = arith.constant 0.404145181 : f32
    %1032 = vector.broadcast %cst_315 : f32 to vector<8x128xf32>
    %1033 = arith.addf %1032, %1031 : vector<8x128xf32>
    %cst_316 = arith.constant 0.000000e+00 : f32
    %1034 = vector.broadcast %cst_316 : f32 to vector<8x128xf32>
    %1035 = arith.mulf %1017, %1034 : vector<8x128xf32>
    %cst_317 = arith.constant 0.404145181 : f32
    %1036 = vector.broadcast %cst_317 : f32 to vector<8x128xf32>
    %1037 = arith.addf %1036, %1035 : vector<8x128xf32>
    %1038 = arith.select %1025, %1029, %1008 : vector<8x128xi1>, vector<8x128xf32>
    %1039 = arith.select %1025, %1033, %1009 : vector<8x128xi1>, vector<8x128xf32>
    %1040 = arith.select %1025, %1037, %1010 : vector<8x128xi1>, vector<8x128xf32>
    %cst_318 = arith.constant 0.000000e+00 : f32
    %1041 = vector.broadcast %cst_318 : f32 to vector<8x128xf32>
    %1042 = arith.cmpf oge, %931, %1041 : vector<8x128xf32>
    %1043 = arith.cmpf ole, %923, %931 : vector<8x128xf32>
    %1044 = arith.andi %1042, %1043 : vector<8x128xi1>
    %cst_319 = arith.constant -0.404145181 : f32
    %1045 = vector.broadcast %cst_319 : f32 to vector<8x128xf32>
    %1046 = arith.select %1044, %1045, %1038 : vector<8x128xi1>, vector<8x128xf32>
    %cst_320 = arith.constant -0.404145181 : f32
    %1047 = vector.broadcast %cst_320 : f32 to vector<8x128xf32>
    %1048 = arith.select %1044, %1047, %1039 : vector<8x128xi1>, vector<8x128xf32>
    %cst_321 = arith.constant 0.404145181 : f32
    %1049 = vector.broadcast %cst_321 : f32 to vector<8x128xf32>
    %1050 = arith.select %1044, %1049, %1040 : vector<8x128xi1>, vector<8x128xf32>
    %1051 = arith.subf %891, %907 : vector<8x128xf32>
    %cst_322 = arith.constant 0.000000e+00 : f32
    %1052 = vector.broadcast %cst_322 : f32 to vector<8x128xf32>
    %1053 = arith.cmpf oeq, %1051, %1052 : vector<8x128xf32>
    %cst_323 = arith.constant 1.000000e+00 : f32
    %1054 = vector.broadcast %cst_323 : f32 to vector<8x128xf32>
    %1055 = arith.select %1053, %1054, %1051 : vector<8x128xi1>, vector<8x128xf32>
    %1056 = tpu.reciprocal %1055 {approx = true} : vector<8x128xf32> -> vector<8x128xf32>
    %1057 = arith.mulf %891, %1056 : vector<8x128xf32>
    %cst_324 = arith.constant 0.000000e+00 : f32
    %1058 = vector.broadcast %cst_324 : f32 to vector<8x128xf32>
    %1059 = arith.cmpf ole, %934, %1058 : vector<8x128xf32>
    %cst_325 = arith.constant 0.000000e+00 : f32
    %1060 = vector.broadcast %cst_325 : f32 to vector<8x128xf32>
    %1061 = arith.cmpf oge, %891, %1060 : vector<8x128xf32>
    %1062 = arith.andi %1059, %1061 : vector<8x128xi1>
    %cst_326 = arith.constant 0.000000e+00 : f32
    %1063 = vector.broadcast %cst_326 : f32 to vector<8x128xf32>
    %1064 = arith.cmpf ole, %907, %1063 : vector<8x128xf32>
    %1065 = arith.andi %1062, %1064 : vector<8x128xi1>
    %cst_327 = arith.constant -0.808290362 : f32
    %1066 = vector.broadcast %cst_327 : f32 to vector<8x128xf32>
    %1067 = arith.mulf %1057, %1066 : vector<8x128xf32>
    %cst_328 = arith.constant 0.404145181 : f32
    %1068 = vector.broadcast %cst_328 : f32 to vector<8x128xf32>
    %1069 = arith.addf %1068, %1067 : vector<8x128xf32>
    %cst_329 = arith.constant 0.000000e+00 : f32
    %1070 = vector.broadcast %cst_329 : f32 to vector<8x128xf32>
    %1071 = arith.mulf %1057, %1070 : vector<8x128xf32>
    %cst_330 = arith.constant 0.404145181 : f32
    %1072 = vector.broadcast %cst_330 : f32 to vector<8x128xf32>
    %1073 = arith.addf %1072, %1071 : vector<8x128xf32>
    %cst_331 = arith.constant -0.808290362 : f32
    %1074 = vector.broadcast %cst_331 : f32 to vector<8x128xf32>
    %1075 = arith.mulf %1057, %1074 : vector<8x128xf32>
    %cst_332 = arith.constant 0.404145181 : f32
    %1076 = vector.broadcast %cst_332 : f32 to vector<8x128xf32>
    %1077 = arith.addf %1076, %1075 : vector<8x128xf32>
    %1078 = arith.select %1065, %1069, %1046 : vector<8x128xi1>, vector<8x128xf32>
    %1079 = arith.select %1065, %1073, %1048 : vector<8x128xi1>, vector<8x128xf32>
    %1080 = arith.select %1065, %1077, %1050 : vector<8x128xi1>, vector<8x128xf32>
    %cst_333 = arith.constant 0.000000e+00 : f32
    %1081 = vector.broadcast %cst_333 : f32 to vector<8x128xf32>
    %1082 = arith.cmpf oge, %907, %1081 : vector<8x128xf32>
    %1083 = arith.cmpf ole, %915, %907 : vector<8x128xf32>
    %1084 = arith.andi %1082, %1083 : vector<8x128xi1>
    %cst_334 = arith.constant -0.404145181 : f32
    %1085 = vector.broadcast %cst_334 : f32 to vector<8x128xf32>
    %1086 = arith.select %1084, %1085, %1078 : vector<8x128xi1>, vector<8x128xf32>
    %cst_335 = arith.constant 0.404145181 : f32
    %1087 = vector.broadcast %cst_335 : f32 to vector<8x128xf32>
    %1088 = arith.select %1084, %1087, %1079 : vector<8x128xi1>, vector<8x128xf32>
    %cst_336 = arith.constant -0.404145181 : f32
    %1089 = vector.broadcast %cst_336 : f32 to vector<8x128xf32>
    %1090 = arith.select %1084, %1089, %1080 : vector<8x128xi1>, vector<8x128xf32>
    %cst_337 = arith.constant 0.000000e+00 : f32
    %1091 = vector.broadcast %cst_337 : f32 to vector<8x128xf32>
    %1092 = arith.cmpf ole, %891, %1091 : vector<8x128xf32>
    %cst_338 = arith.constant 0.000000e+00 : f32
    %1093 = vector.broadcast %cst_338 : f32 to vector<8x128xf32>
    %1094 = arith.cmpf ole, %899, %1093 : vector<8x128xf32>
    %1095 = arith.andi %1092, %1094 : vector<8x128xi1>
    %cst_339 = arith.constant 0.404145181 : f32
    %1096 = vector.broadcast %cst_339 : f32 to vector<8x128xf32>
    %1097 = arith.select %1095, %1096, %1086 : vector<8x128xi1>, vector<8x128xf32>
    %cst_340 = arith.constant 0.404145181 : f32
    %1098 = vector.broadcast %cst_340 : f32 to vector<8x128xf32>
    %1099 = arith.select %1095, %1098, %1088 : vector<8x128xi1>, vector<8x128xf32>
    %cst_341 = arith.constant 0.404145181 : f32
    %1100 = vector.broadcast %cst_341 : f32 to vector<8x128xf32>
    %1101 = arith.select %1095, %1100, %1090 : vector<8x128xi1>, vector<8x128xf32>
    %1102 = arith.subf %1, %1097 : vector<8x128xf32>
    %1103 = arith.subf %3, %1099 : vector<8x128xf32>
    %1104 = arith.subf %5, %1101 : vector<8x128xf32>
    %1105 = arith.mulf %1102, %1102 : vector<8x128xf32>
    %1106 = arith.mulf %1103, %1103 : vector<8x128xf32>
    %1107 = arith.addf %1105, %1106 : vector<8x128xf32>
    %1108 = arith.mulf %1104, %1104 : vector<8x128xf32>
    %1109 = arith.addf %1107, %1108 : vector<8x128xf32>
    %1110 = arith.minimumf %743, %1109 : vector<8x128xf32>
    %cst_342 = arith.constant 0.404145181 : f32
    %1111 = vector.broadcast %cst_342 : f32 to vector<8x128xf32>
    %1112 = arith.subf %1111, %1 : vector<8x128xf32>
    %cst_343 = arith.constant -0.404145181 : f32
    %1113 = vector.broadcast %cst_343 : f32 to vector<8x128xf32>
    %1114 = arith.subf %1113, %3 : vector<8x128xf32>
    %cst_344 = arith.constant -0.404145181 : f32
    %1115 = vector.broadcast %cst_344 : f32 to vector<8x128xf32>
    %1116 = arith.subf %1115, %5 : vector<8x128xf32>
    %cst_345 = arith.constant -0.404145181 : f32
    %1117 = vector.broadcast %cst_345 : f32 to vector<8x128xf32>
    %1118 = arith.subf %1117, %1 : vector<8x128xf32>
    %cst_346 = arith.constant -0.404145181 : f32
    %1119 = vector.broadcast %cst_346 : f32 to vector<8x128xf32>
    %1120 = arith.subf %1119, %3 : vector<8x128xf32>
    %cst_347 = arith.constant 0.404145181 : f32
    %1121 = vector.broadcast %cst_347 : f32 to vector<8x128xf32>
    %1122 = arith.subf %1121, %5 : vector<8x128xf32>
    %cst_348 = arith.constant -0.404145181 : f32
    %1123 = vector.broadcast %cst_348 : f32 to vector<8x128xf32>
    %1124 = arith.subf %1123, %1 : vector<8x128xf32>
    %cst_349 = arith.constant 0.404145181 : f32
    %1125 = vector.broadcast %cst_349 : f32 to vector<8x128xf32>
    %1126 = arith.subf %1125, %3 : vector<8x128xf32>
    %cst_350 = arith.constant -0.404145181 : f32
    %1127 = vector.broadcast %cst_350 : f32 to vector<8x128xf32>
    %1128 = arith.subf %1127, %5 : vector<8x128xf32>
    %1129 = arith.mulf %1112, %1112 : vector<8x128xf32>
    %1130 = arith.mulf %1114, %1114 : vector<8x128xf32>
    %1131 = arith.addf %1129, %1130 : vector<8x128xf32>
    %1132 = arith.mulf %1116, %1116 : vector<8x128xf32>
    %1133 = arith.addf %1131, %1132 : vector<8x128xf32>
    %1134 = math.sqrt %1133 : vector<8x128xf32>
    %1135 = arith.mulf %1118, %1118 : vector<8x128xf32>
    %1136 = arith.mulf %1120, %1120 : vector<8x128xf32>
    %1137 = arith.addf %1135, %1136 : vector<8x128xf32>
    %1138 = arith.mulf %1122, %1122 : vector<8x128xf32>
    %1139 = arith.addf %1137, %1138 : vector<8x128xf32>
    %1140 = math.sqrt %1139 : vector<8x128xf32>
    %1141 = arith.mulf %1124, %1124 : vector<8x128xf32>
    %1142 = arith.mulf %1126, %1126 : vector<8x128xf32>
    %1143 = arith.addf %1141, %1142 : vector<8x128xf32>
    %1144 = arith.mulf %1128, %1128 : vector<8x128xf32>
    %1145 = arith.addf %1143, %1144 : vector<8x128xf32>
    %1146 = math.sqrt %1145 : vector<8x128xf32>
    %1147 = arith.mulf %1120, %1128 : vector<8x128xf32>
    %1148 = arith.mulf %1122, %1126 : vector<8x128xf32>
    %1149 = arith.subf %1147, %1148 : vector<8x128xf32>
    %1150 = arith.mulf %1122, %1124 : vector<8x128xf32>
    %1151 = arith.mulf %1118, %1128 : vector<8x128xf32>
    %1152 = arith.subf %1150, %1151 : vector<8x128xf32>
    %1153 = arith.mulf %1118, %1126 : vector<8x128xf32>
    %1154 = arith.mulf %1120, %1124 : vector<8x128xf32>
    %1155 = arith.subf %1153, %1154 : vector<8x128xf32>
    %1156 = arith.mulf %1112, %1149 : vector<8x128xf32>
    %1157 = arith.mulf %1114, %1152 : vector<8x128xf32>
    %1158 = arith.addf %1156, %1157 : vector<8x128xf32>
    %1159 = arith.mulf %1116, %1155 : vector<8x128xf32>
    %1160 = arith.addf %1158, %1159 : vector<8x128xf32>
    %1161 = arith.mulf %1134, %1140 : vector<8x128xf32>
    %1162 = arith.mulf %1161, %1146 : vector<8x128xf32>
    %1163 = arith.mulf %1112, %1118 : vector<8x128xf32>
    %1164 = arith.mulf %1114, %1120 : vector<8x128xf32>
    %1165 = arith.addf %1163, %1164 : vector<8x128xf32>
    %1166 = arith.mulf %1116, %1122 : vector<8x128xf32>
    %1167 = arith.addf %1165, %1166 : vector<8x128xf32>
    %1168 = arith.mulf %1167, %1146 : vector<8x128xf32>
    %1169 = arith.addf %1162, %1168 : vector<8x128xf32>
    %1170 = arith.mulf %1118, %1124 : vector<8x128xf32>
    %1171 = arith.mulf %1120, %1126 : vector<8x128xf32>
    %1172 = arith.addf %1170, %1171 : vector<8x128xf32>
    %1173 = arith.mulf %1122, %1128 : vector<8x128xf32>
    %1174 = arith.addf %1172, %1173 : vector<8x128xf32>
    %1175 = arith.mulf %1174, %1134 : vector<8x128xf32>
    %1176 = arith.addf %1169, %1175 : vector<8x128xf32>
    %1177 = arith.mulf %1124, %1112 : vector<8x128xf32>
    %1178 = arith.mulf %1126, %1114 : vector<8x128xf32>
    %1179 = arith.addf %1177, %1178 : vector<8x128xf32>
    %1180 = arith.mulf %1128, %1116 : vector<8x128xf32>
    %1181 = arith.addf %1179, %1180 : vector<8x128xf32>
    %1182 = arith.mulf %1181, %1140 : vector<8x128xf32>
    %1183 = arith.addf %1176, %1182 : vector<8x128xf32>
    %1184 = math.absf %1160 : vector<8x128xf32>
    %1185 = math.absf %1183 : vector<8x128xf32>
    %1186 = arith.cmpf ogt, %1184, %1185 : vector<8x128xf32>
    %1187 = arith.select %1186, %1185, %1184 : vector<8x128xi1>, vector<8x128xf32>
    %1188 = arith.select %1186, %1184, %1185 : vector<8x128xi1>, vector<8x128xf32>
    %cst_351 = arith.constant 0.000000e+00 : f32
    %1189 = vector.broadcast %cst_351 : f32 to vector<8x128xf32>
    %1190 = arith.cmpf oeq, %1188, %1189 : vector<8x128xf32>
    %cst_352 = arith.constant 1.000000e+00 : f32
    %1191 = vector.broadcast %cst_352 : f32 to vector<8x128xf32>
    %1192 = arith.select %1190, %1191, %1188 : vector<8x128xi1>, vector<8x128xf32>
    %1193 = tpu.reciprocal %1192 {approx = true} : vector<8x128xf32> -> vector<8x128xf32>
    %1194 = arith.mulf %1187, %1193 : vector<8x128xf32>
    %1195 = arith.mulf %1194, %1194 : vector<8x128xf32>
    %cst_353 = arith.constant 2.083510e-02 : f32
    %1196 = vector.broadcast %cst_353 : f32 to vector<8x128xf32>
    %1197 = arith.mulf %1195, %1196 : vector<8x128xf32>
    %cst_354 = arith.constant -8.513300e-02 : f32
    %1198 = vector.broadcast %cst_354 : f32 to vector<8x128xf32>
    %1199 = arith.addf %1198, %1197 : vector<8x128xf32>
    %1200 = arith.mulf %1195, %1199 : vector<8x128xf32>
    %cst_355 = arith.constant 1.801410e-01 : f32
    %1201 = vector.broadcast %cst_355 : f32 to vector<8x128xf32>
    %1202 = arith.addf %1201, %1200 : vector<8x128xf32>
    %1203 = arith.mulf %1195, %1202 : vector<8x128xf32>
    %cst_356 = arith.constant -0.330299497 : f32
    %1204 = vector.broadcast %cst_356 : f32 to vector<8x128xf32>
    %1205 = arith.addf %1204, %1203 : vector<8x128xf32>
    %1206 = arith.mulf %1195, %1205 : vector<8x128xf32>
    %cst_357 = arith.constant 9.998660e-01 : f32
    %1207 = vector.broadcast %cst_357 : f32 to vector<8x128xf32>
    %1208 = arith.addf %1207, %1206 : vector<8x128xf32>
    %1209 = arith.mulf %1194, %1208 : vector<8x128xf32>
    %cst_358 = arith.constant 1.57079637 : f32
    %1210 = vector.broadcast %cst_358 : f32 to vector<8x128xf32>
    %1211 = arith.subf %1210, %1209 : vector<8x128xf32>
    %1212 = arith.select %1186, %1211, %1209 : vector<8x128xi1>, vector<8x128xf32>
    %cst_359 = arith.constant 0.000000e+00 : f32
    %1213 = vector.broadcast %cst_359 : f32 to vector<8x128xf32>
    %1214 = arith.cmpf olt, %1183, %1213 : vector<8x128xf32>
    %cst_360 = arith.constant 3.14159274 : f32
    %1215 = vector.broadcast %cst_360 : f32 to vector<8x128xf32>
    %1216 = arith.subf %1215, %1212 : vector<8x128xf32>
    %1217 = arith.select %1214, %1216, %1212 : vector<8x128xi1>, vector<8x128xf32>
    %cst_361 = arith.constant 0.000000e+00 : f32
    %1218 = vector.broadcast %cst_361 : f32 to vector<8x128xf32>
    %1219 = arith.cmpf olt, %1160, %1218 : vector<8x128xf32>
    %cst_362 = arith.constant 0.000000e+00 : f32
    %1220 = vector.broadcast %cst_362 : f32 to vector<8x128xf32>
    %1221 = arith.subf %1220, %1217 : vector<8x128xf32>
    %1222 = arith.select %1219, %1221, %1217 : vector<8x128xi1>, vector<8x128xf32>
    %cst_363 = arith.constant 0.000000e+00 : f32
    %1223 = vector.broadcast %cst_363 : f32 to vector<8x128xf32>
    %1224 = arith.cmpf oeq, %1185, %1223 : vector<8x128xf32>
    %cst_364 = arith.constant 0.000000e+00 : f32
    %1225 = vector.broadcast %cst_364 : f32 to vector<8x128xf32>
    %1226 = arith.cmpf oeq, %1184, %1225 : vector<8x128xf32>
    %1227 = arith.andi %1224, %1226 : vector<8x128xi1>
    %cst_365 = arith.constant 0.000000e+00 : f32
    %1228 = vector.broadcast %cst_365 : f32 to vector<8x128xf32>
    %1229 = arith.select %1227, %1228, %1222 : vector<8x128xi1>, vector<8x128xf32>
    %cst_366 = arith.constant 2.000000e+00 : f32
    %1230 = vector.broadcast %cst_366 : f32 to vector<8x128xf32>
    %1231 = arith.mulf %1230, %1229 : vector<8x128xf32>
    %1232 = arith.addf %865, %1231 : vector<8x128xf32>
    %cst_367 = arith.constant 0.404145181 : f32
    %1233 = vector.broadcast %cst_367 : f32 to vector<8x128xf32>
    %1234 = arith.subf %1, %1233 : vector<8x128xf32>
    %cst_368 = arith.constant -0.404145181 : f32
    %1235 = vector.broadcast %cst_368 : f32 to vector<8x128xf32>
    %1236 = arith.subf %3, %1235 : vector<8x128xf32>
    %cst_369 = arith.constant -0.404145181 : f32
    %1237 = vector.broadcast %cst_369 : f32 to vector<8x128xf32>
    %1238 = arith.subf %5, %1237 : vector<8x128xf32>
    %cst_370 = arith.constant -0.404145181 : f32
    %1239 = vector.broadcast %cst_370 : f32 to vector<8x128xf32>
    %1240 = arith.subf %1, %1239 : vector<8x128xf32>
    %cst_371 = arith.constant -0.404145181 : f32
    %1241 = vector.broadcast %cst_371 : f32 to vector<8x128xf32>
    %1242 = arith.subf %3, %1241 : vector<8x128xf32>
    %cst_372 = arith.constant 0.404145181 : f32
    %1243 = vector.broadcast %cst_372 : f32 to vector<8x128xf32>
    %1244 = arith.subf %5, %1243 : vector<8x128xf32>
    %cst_373 = arith.constant -0.404145181 : f32
    %1245 = vector.broadcast %cst_373 : f32 to vector<8x128xf32>
    %1246 = arith.subf %1, %1245 : vector<8x128xf32>
    %cst_374 = arith.constant 0.404145181 : f32
    %1247 = vector.broadcast %cst_374 : f32 to vector<8x128xf32>
    %1248 = arith.subf %3, %1247 : vector<8x128xf32>
    %cst_375 = arith.constant -0.404145181 : f32
    %1249 = vector.broadcast %cst_375 : f32 to vector<8x128xf32>
    %1250 = arith.subf %5, %1249 : vector<8x128xf32>
    %cst_376 = arith.constant -0.808290362 : f32
    %1251 = vector.broadcast %cst_376 : f32 to vector<8x128xf32>
    %1252 = arith.mulf %1251, %1234 : vector<8x128xf32>
    %cst_377 = arith.constant 0.000000e+00 : f32
    %1253 = vector.broadcast %cst_377 : f32 to vector<8x128xf32>
    %1254 = arith.mulf %1253, %1236 : vector<8x128xf32>
    %1255 = arith.addf %1252, %1254 : vector<8x128xf32>
    %cst_378 = arith.constant 0.808290362 : f32
    %1256 = vector.broadcast %cst_378 : f32 to vector<8x128xf32>
    %1257 = arith.mulf %1256, %1238 : vector<8x128xf32>
    %1258 = arith.addf %1255, %1257 : vector<8x128xf32>
    %cst_379 = arith.constant -0.808290362 : f32
    %1259 = vector.broadcast %cst_379 : f32 to vector<8x128xf32>
    %1260 = arith.mulf %1259, %1234 : vector<8x128xf32>
    %cst_380 = arith.constant 0.808290362 : f32
    %1261 = vector.broadcast %cst_380 : f32 to vector<8x128xf32>
    %1262 = arith.mulf %1261, %1236 : vector<8x128xf32>
    %1263 = arith.addf %1260, %1262 : vector<8x128xf32>
    %cst_381 = arith.constant 0.000000e+00 : f32
    %1264 = vector.broadcast %cst_381 : f32 to vector<8x128xf32>
    %1265 = arith.mulf %1264, %1238 : vector<8x128xf32>
    %1266 = arith.addf %1263, %1265 : vector<8x128xf32>
    %cst_382 = arith.constant -0.808290362 : f32
    %1267 = vector.broadcast %cst_382 : f32 to vector<8x128xf32>
    %1268 = arith.mulf %1267, %1240 : vector<8x128xf32>
    %cst_383 = arith.constant 0.000000e+00 : f32
    %1269 = vector.broadcast %cst_383 : f32 to vector<8x128xf32>
    %1270 = arith.mulf %1269, %1242 : vector<8x128xf32>
    %1271 = arith.addf %1268, %1270 : vector<8x128xf32>
    %cst_384 = arith.constant 0.808290362 : f32
    %1272 = vector.broadcast %cst_384 : f32 to vector<8x128xf32>
    %1273 = arith.mulf %1272, %1244 : vector<8x128xf32>
    %1274 = arith.addf %1271, %1273 : vector<8x128xf32>
    %cst_385 = arith.constant -0.808290362 : f32
    %1275 = vector.broadcast %cst_385 : f32 to vector<8x128xf32>
    %1276 = arith.mulf %1275, %1240 : vector<8x128xf32>
    %cst_386 = arith.constant 0.808290362 : f32
    %1277 = vector.broadcast %cst_386 : f32 to vector<8x128xf32>
    %1278 = arith.mulf %1277, %1242 : vector<8x128xf32>
    %1279 = arith.addf %1276, %1278 : vector<8x128xf32>
    %cst_387 = arith.constant 0.000000e+00 : f32
    %1280 = vector.broadcast %cst_387 : f32 to vector<8x128xf32>
    %1281 = arith.mulf %1280, %1244 : vector<8x128xf32>
    %1282 = arith.addf %1279, %1281 : vector<8x128xf32>
    %cst_388 = arith.constant -0.808290362 : f32
    %1283 = vector.broadcast %cst_388 : f32 to vector<8x128xf32>
    %1284 = arith.mulf %1283, %1246 : vector<8x128xf32>
    %cst_389 = arith.constant 0.000000e+00 : f32
    %1285 = vector.broadcast %cst_389 : f32 to vector<8x128xf32>
    %1286 = arith.mulf %1285, %1248 : vector<8x128xf32>
    %1287 = arith.addf %1284, %1286 : vector<8x128xf32>
    %cst_390 = arith.constant 0.808290362 : f32
    %1288 = vector.broadcast %cst_390 : f32 to vector<8x128xf32>
    %1289 = arith.mulf %1288, %1250 : vector<8x128xf32>
    %1290 = arith.addf %1287, %1289 : vector<8x128xf32>
    %cst_391 = arith.constant -0.808290362 : f32
    %1291 = vector.broadcast %cst_391 : f32 to vector<8x128xf32>
    %1292 = arith.mulf %1291, %1246 : vector<8x128xf32>
    %cst_392 = arith.constant 0.808290362 : f32
    %1293 = vector.broadcast %cst_392 : f32 to vector<8x128xf32>
    %1294 = arith.mulf %1293, %1248 : vector<8x128xf32>
    %1295 = arith.addf %1292, %1294 : vector<8x128xf32>
    %cst_393 = arith.constant 0.000000e+00 : f32
    %1296 = vector.broadcast %cst_393 : f32 to vector<8x128xf32>
    %1297 = arith.mulf %1296, %1250 : vector<8x128xf32>
    %1298 = arith.addf %1295, %1297 : vector<8x128xf32>
    %1299 = arith.mulf %1258, %1282 : vector<8x128xf32>
    %1300 = arith.mulf %1274, %1266 : vector<8x128xf32>
    %1301 = arith.subf %1299, %1300 : vector<8x128xf32>
    %1302 = arith.mulf %1290, %1266 : vector<8x128xf32>
    %1303 = arith.mulf %1258, %1298 : vector<8x128xf32>
    %1304 = arith.subf %1302, %1303 : vector<8x128xf32>
    %1305 = arith.mulf %1274, %1298 : vector<8x128xf32>
    %1306 = arith.mulf %1290, %1282 : vector<8x128xf32>
    %1307 = arith.subf %1305, %1306 : vector<8x128xf32>
    %1308 = arith.addf %1307, %1304 : vector<8x128xf32>
    %1309 = arith.addf %1308, %1301 : vector<8x128xf32>
    %cst_394 = arith.constant 0.000000e+00 : f32
    %1310 = vector.broadcast %cst_394 : f32 to vector<8x128xf32>
    %1311 = arith.cmpf oeq, %1309, %1310 : vector<8x128xf32>
    %cst_395 = arith.constant 1.000000e+00 : f32
    %1312 = vector.broadcast %cst_395 : f32 to vector<8x128xf32>
    %1313 = arith.select %1311, %1312, %1309 : vector<8x128xi1>, vector<8x128xf32>
    %1314 = tpu.reciprocal %1313 {approx = true} : vector<8x128xf32> -> vector<8x128xf32>
    %1315 = arith.mulf %1304, %1314 : vector<8x128xf32>
    %cst_396 = arith.constant 0.000000e+00 : f32
    %1316 = vector.broadcast %cst_396 : f32 to vector<8x128xf32>
    %1317 = arith.cmpf oeq, %1309, %1316 : vector<8x128xf32>
    %cst_397 = arith.constant 1.000000e+00 : f32
    %1318 = vector.broadcast %cst_397 : f32 to vector<8x128xf32>
    %1319 = arith.select %1317, %1318, %1309 : vector<8x128xi1>, vector<8x128xf32>
    %1320 = tpu.reciprocal %1319 {approx = true} : vector<8x128xf32> -> vector<8x128xf32>
    %1321 = arith.mulf %1301, %1320 : vector<8x128xf32>
    %cst_398 = arith.constant -0.808290362 : f32
    %1322 = vector.broadcast %cst_398 : f32 to vector<8x128xf32>
    %1323 = arith.mulf %1315, %1322 : vector<8x128xf32>
    %cst_399 = arith.constant 0.404145181 : f32
    %1324 = vector.broadcast %cst_399 : f32 to vector<8x128xf32>
    %1325 = arith.addf %1324, %1323 : vector<8x128xf32>
    %cst_400 = arith.constant -0.808290362 : f32
    %1326 = vector.broadcast %cst_400 : f32 to vector<8x128xf32>
    %1327 = arith.mulf %1321, %1326 : vector<8x128xf32>
    %1328 = arith.addf %1325, %1327 : vector<8x128xf32>
    %cst_401 = arith.constant 0.000000e+00 : f32
    %1329 = vector.broadcast %cst_401 : f32 to vector<8x128xf32>
    %1330 = arith.mulf %1315, %1329 : vector<8x128xf32>
    %cst_402 = arith.constant -0.404145181 : f32
    %1331 = vector.broadcast %cst_402 : f32 to vector<8x128xf32>
    %1332 = arith.addf %1331, %1330 : vector<8x128xf32>
    %cst_403 = arith.constant 0.808290362 : f32
    %1333 = vector.broadcast %cst_403 : f32 to vector<8x128xf32>
    %1334 = arith.mulf %1321, %1333 : vector<8x128xf32>
    %1335 = arith.addf %1332, %1334 : vector<8x128xf32>
    %cst_404 = arith.constant 0.808290362 : f32
    %1336 = vector.broadcast %cst_404 : f32 to vector<8x128xf32>
    %1337 = arith.mulf %1315, %1336 : vector<8x128xf32>
    %cst_405 = arith.constant -0.404145181 : f32
    %1338 = vector.broadcast %cst_405 : f32 to vector<8x128xf32>
    %1339 = arith.addf %1338, %1337 : vector<8x128xf32>
    %cst_406 = arith.constant 0.000000e+00 : f32
    %1340 = vector.broadcast %cst_406 : f32 to vector<8x128xf32>
    %1341 = arith.mulf %1321, %1340 : vector<8x128xf32>
    %1342 = arith.addf %1339, %1341 : vector<8x128xf32>
    %1343 = arith.subf %1282, %1274 : vector<8x128xf32>
    %1344 = arith.subf %1282, %1274 : vector<8x128xf32>
    %1345 = arith.subf %1290, %1298 : vector<8x128xf32>
    %1346 = arith.addf %1344, %1345 : vector<8x128xf32>
    %cst_407 = arith.constant 0.000000e+00 : f32
    %1347 = vector.broadcast %cst_407 : f32 to vector<8x128xf32>
    %1348 = arith.cmpf oeq, %1346, %1347 : vector<8x128xf32>
    %cst_408 = arith.constant 1.000000e+00 : f32
    %1349 = vector.broadcast %cst_408 : f32 to vector<8x128xf32>
    %1350 = arith.select %1348, %1349, %1346 : vector<8x128xi1>, vector<8x128xf32>
    %1351 = tpu.reciprocal %1350 {approx = true} : vector<8x128xf32> -> vector<8x128xf32>
    %1352 = arith.mulf %1343, %1351 : vector<8x128xf32>
    %cst_409 = arith.constant 0.000000e+00 : f32
    %1353 = vector.broadcast %cst_409 : f32 to vector<8x128xf32>
    %1354 = arith.cmpf ole, %1307, %1353 : vector<8x128xf32>
    %1355 = arith.subf %1282, %1274 : vector<8x128xf32>
    %cst_410 = arith.constant 0.000000e+00 : f32
    %1356 = vector.broadcast %cst_410 : f32 to vector<8x128xf32>
    %1357 = arith.cmpf oge, %1355, %1356 : vector<8x128xf32>
    %1358 = arith.andi %1354, %1357 : vector<8x128xi1>
    %1359 = arith.subf %1290, %1298 : vector<8x128xf32>
    %cst_411 = arith.constant 0.000000e+00 : f32
    %1360 = vector.broadcast %cst_411 : f32 to vector<8x128xf32>
    %1361 = arith.cmpf oge, %1359, %1360 : vector<8x128xf32>
    %1362 = arith.andi %1358, %1361 : vector<8x128xi1>
    %cst_412 = arith.constant 0.000000e+00 : f32
    %1363 = vector.broadcast %cst_412 : f32 to vector<8x128xf32>
    %1364 = arith.mulf %1352, %1363 : vector<8x128xf32>
    %cst_413 = arith.constant -0.404145181 : f32
    %1365 = vector.broadcast %cst_413 : f32 to vector<8x128xf32>
    %1366 = arith.addf %1365, %1364 : vector<8x128xf32>
    %cst_414 = arith.constant 0.808290362 : f32
    %1367 = vector.broadcast %cst_414 : f32 to vector<8x128xf32>
    %1368 = arith.mulf %1352, %1367 : vector<8x128xf32>
    %cst_415 = arith.constant -0.404145181 : f32
    %1369 = vector.broadcast %cst_415 : f32 to vector<8x128xf32>
    %1370 = arith.addf %1369, %1368 : vector<8x128xf32>
    %cst_416 = arith.constant -0.808290362 : f32
    %1371 = vector.broadcast %cst_416 : f32 to vector<8x128xf32>
    %1372 = arith.mulf %1352, %1371 : vector<8x128xf32>
    %cst_417 = arith.constant 0.404145181 : f32
    %1373 = vector.broadcast %cst_417 : f32 to vector<8x128xf32>
    %1374 = arith.addf %1373, %1372 : vector<8x128xf32>
    %1375 = arith.select %1362, %1366, %1328 : vector<8x128xi1>, vector<8x128xf32>
    %1376 = arith.select %1362, %1370, %1335 : vector<8x128xi1>, vector<8x128xf32>
    %1377 = arith.select %1362, %1374, %1342 : vector<8x128xi1>, vector<8x128xf32>
    %1378 = arith.subf %1266, %1298 : vector<8x128xf32>
    %cst_418 = arith.constant 0.000000e+00 : f32
    %1379 = vector.broadcast %cst_418 : f32 to vector<8x128xf32>
    %1380 = arith.cmpf oeq, %1378, %1379 : vector<8x128xf32>
    %cst_419 = arith.constant 1.000000e+00 : f32
    %1381 = vector.broadcast %cst_419 : f32 to vector<8x128xf32>
    %1382 = arith.select %1380, %1381, %1378 : vector<8x128xi1>, vector<8x128xf32>
    %1383 = tpu.reciprocal %1382 {approx = true} : vector<8x128xf32> -> vector<8x128xf32>
    %1384 = arith.mulf %1266, %1383 : vector<8x128xf32>
    %cst_420 = arith.constant 0.000000e+00 : f32
    %1385 = vector.broadcast %cst_420 : f32 to vector<8x128xf32>
    %1386 = arith.cmpf ole, %1304, %1385 : vector<8x128xf32>
    %cst_421 = arith.constant 0.000000e+00 : f32
    %1387 = vector.broadcast %cst_421 : f32 to vector<8x128xf32>
    %1388 = arith.cmpf oge, %1266, %1387 : vector<8x128xf32>
    %1389 = arith.andi %1386, %1388 : vector<8x128xi1>
    %cst_422 = arith.constant 0.000000e+00 : f32
    %1390 = vector.broadcast %cst_422 : f32 to vector<8x128xf32>
    %1391 = arith.cmpf ole, %1298, %1390 : vector<8x128xf32>
    %1392 = arith.andi %1389, %1391 : vector<8x128xi1>
    %cst_423 = arith.constant -0.808290362 : f32
    %1393 = vector.broadcast %cst_423 : f32 to vector<8x128xf32>
    %1394 = arith.mulf %1384, %1393 : vector<8x128xf32>
    %cst_424 = arith.constant 0.404145181 : f32
    %1395 = vector.broadcast %cst_424 : f32 to vector<8x128xf32>
    %1396 = arith.addf %1395, %1394 : vector<8x128xf32>
    %cst_425 = arith.constant 0.808290362 : f32
    %1397 = vector.broadcast %cst_425 : f32 to vector<8x128xf32>
    %1398 = arith.mulf %1384, %1397 : vector<8x128xf32>
    %cst_426 = arith.constant -0.404145181 : f32
    %1399 = vector.broadcast %cst_426 : f32 to vector<8x128xf32>
    %1400 = arith.addf %1399, %1398 : vector<8x128xf32>
    %cst_427 = arith.constant 0.000000e+00 : f32
    %1401 = vector.broadcast %cst_427 : f32 to vector<8x128xf32>
    %1402 = arith.mulf %1384, %1401 : vector<8x128xf32>
    %cst_428 = arith.constant -0.404145181 : f32
    %1403 = vector.broadcast %cst_428 : f32 to vector<8x128xf32>
    %1404 = arith.addf %1403, %1402 : vector<8x128xf32>
    %1405 = arith.select %1392, %1396, %1375 : vector<8x128xi1>, vector<8x128xf32>
    %1406 = arith.select %1392, %1400, %1376 : vector<8x128xi1>, vector<8x128xf32>
    %1407 = arith.select %1392, %1404, %1377 : vector<8x128xi1>, vector<8x128xf32>
    %cst_429 = arith.constant 0.000000e+00 : f32
    %1408 = vector.broadcast %cst_429 : f32 to vector<8x128xf32>
    %1409 = arith.cmpf oge, %1298, %1408 : vector<8x128xf32>
    %1410 = arith.cmpf ole, %1290, %1298 : vector<8x128xf32>
    %1411 = arith.andi %1409, %1410 : vector<8x128xi1>
    %cst_430 = arith.constant -0.404145181 : f32
    %1412 = vector.broadcast %cst_430 : f32 to vector<8x128xf32>
    %1413 = arith.select %1411, %1412, %1405 : vector<8x128xi1>, vector<8x128xf32>
    %cst_431 = arith.constant 0.404145181 : f32
    %1414 = vector.broadcast %cst_431 : f32 to vector<8x128xf32>
    %1415 = arith.select %1411, %1414, %1406 : vector<8x128xi1>, vector<8x128xf32>
    %cst_432 = arith.constant -0.404145181 : f32
    %1416 = vector.broadcast %cst_432 : f32 to vector<8x128xf32>
    %1417 = arith.select %1411, %1416, %1407 : vector<8x128xi1>, vector<8x128xf32>
    %1418 = arith.subf %1258, %1274 : vector<8x128xf32>
    %cst_433 = arith.constant 0.000000e+00 : f32
    %1419 = vector.broadcast %cst_433 : f32 to vector<8x128xf32>
    %1420 = arith.cmpf oeq, %1418, %1419 : vector<8x128xf32>
    %cst_434 = arith.constant 1.000000e+00 : f32
    %1421 = vector.broadcast %cst_434 : f32 to vector<8x128xf32>
    %1422 = arith.select %1420, %1421, %1418 : vector<8x128xi1>, vector<8x128xf32>
    %1423 = tpu.reciprocal %1422 {approx = true} : vector<8x128xf32> -> vector<8x128xf32>
    %1424 = arith.mulf %1258, %1423 : vector<8x128xf32>
    %cst_435 = arith.constant 0.000000e+00 : f32
    %1425 = vector.broadcast %cst_435 : f32 to vector<8x128xf32>
    %1426 = arith.cmpf ole, %1301, %1425 : vector<8x128xf32>
    %cst_436 = arith.constant 0.000000e+00 : f32
    %1427 = vector.broadcast %cst_436 : f32 to vector<8x128xf32>
    %1428 = arith.cmpf oge, %1258, %1427 : vector<8x128xf32>
    %1429 = arith.andi %1426, %1428 : vector<8x128xi1>
    %cst_437 = arith.constant 0.000000e+00 : f32
    %1430 = vector.broadcast %cst_437 : f32 to vector<8x128xf32>
    %1431 = arith.cmpf ole, %1274, %1430 : vector<8x128xf32>
    %1432 = arith.andi %1429, %1431 : vector<8x128xi1>
    %cst_438 = arith.constant -0.808290362 : f32
    %1433 = vector.broadcast %cst_438 : f32 to vector<8x128xf32>
    %1434 = arith.mulf %1424, %1433 : vector<8x128xf32>
    %cst_439 = arith.constant 0.404145181 : f32
    %1435 = vector.broadcast %cst_439 : f32 to vector<8x128xf32>
    %1436 = arith.addf %1435, %1434 : vector<8x128xf32>
    %cst_440 = arith.constant 0.000000e+00 : f32
    %1437 = vector.broadcast %cst_440 : f32 to vector<8x128xf32>
    %1438 = arith.mulf %1424, %1437 : vector<8x128xf32>
    %cst_441 = arith.constant -0.404145181 : f32
    %1439 = vector.broadcast %cst_441 : f32 to vector<8x128xf32>
    %1440 = arith.addf %1439, %1438 : vector<8x128xf32>
    %cst_442 = arith.constant 0.808290362 : f32
    %1441 = vector.broadcast %cst_442 : f32 to vector<8x128xf32>
    %1442 = arith.mulf %1424, %1441 : vector<8x128xf32>
    %cst_443 = arith.constant -0.404145181 : f32
    %1443 = vector.broadcast %cst_443 : f32 to vector<8x128xf32>
    %1444 = arith.addf %1443, %1442 : vector<8x128xf32>
    %1445 = arith.select %1432, %1436, %1413 : vector<8x128xi1>, vector<8x128xf32>
    %1446 = arith.select %1432, %1440, %1415 : vector<8x128xi1>, vector<8x128xf32>
    %1447 = arith.select %1432, %1444, %1417 : vector<8x128xi1>, vector<8x128xf32>
    %cst_444 = arith.constant 0.000000e+00 : f32
    %1448 = vector.broadcast %cst_444 : f32 to vector<8x128xf32>
    %1449 = arith.cmpf oge, %1274, %1448 : vector<8x128xf32>
    %1450 = arith.cmpf ole, %1282, %1274 : vector<8x128xf32>
    %1451 = arith.andi %1449, %1450 : vector<8x128xi1>
    %cst_445 = arith.constant -0.404145181 : f32
    %1452 = vector.broadcast %cst_445 : f32 to vector<8x128xf32>
    %1453 = arith.select %1451, %1452, %1445 : vector<8x128xi1>, vector<8x128xf32>
    %cst_446 = arith.constant -0.404145181 : f32
    %1454 = vector.broadcast %cst_446 : f32 to vector<8x128xf32>
    %1455 = arith.select %1451, %1454, %1446 : vector<8x128xi1>, vector<8x128xf32>
    %cst_447 = arith.constant 0.404145181 : f32
    %1456 = vector.broadcast %cst_447 : f32 to vector<8x128xf32>
    %1457 = arith.select %1451, %1456, %1447 : vector<8x128xi1>, vector<8x128xf32>
    %cst_448 = arith.constant 0.000000e+00 : f32
    %1458 = vector.broadcast %cst_448 : f32 to vector<8x128xf32>
    %1459 = arith.cmpf ole, %1258, %1458 : vector<8x128xf32>
    %cst_449 = arith.constant 0.000000e+00 : f32
    %1460 = vector.broadcast %cst_449 : f32 to vector<8x128xf32>
    %1461 = arith.cmpf ole, %1266, %1460 : vector<8x128xf32>
    %1462 = arith.andi %1459, %1461 : vector<8x128xi1>
    %cst_450 = arith.constant 0.404145181 : f32
    %1463 = vector.broadcast %cst_450 : f32 to vector<8x128xf32>
    %1464 = arith.select %1462, %1463, %1453 : vector<8x128xi1>, vector<8x128xf32>
    %cst_451 = arith.constant -0.404145181 : f32
    %1465 = vector.broadcast %cst_451 : f32 to vector<8x128xf32>
    %1466 = arith.select %1462, %1465, %1455 : vector<8x128xi1>, vector<8x128xf32>
    %cst_452 = arith.constant -0.404145181 : f32
    %1467 = vector.broadcast %cst_452 : f32 to vector<8x128xf32>
    %1468 = arith.select %1462, %1467, %1457 : vector<8x128xi1>, vector<8x128xf32>
    %1469 = arith.subf %1, %1464 : vector<8x128xf32>
    %1470 = arith.subf %3, %1466 : vector<8x128xf32>
    %1471 = arith.subf %5, %1468 : vector<8x128xf32>
    %1472 = arith.mulf %1469, %1469 : vector<8x128xf32>
    %1473 = arith.mulf %1470, %1470 : vector<8x128xf32>
    %1474 = arith.addf %1472, %1473 : vector<8x128xf32>
    %1475 = arith.mulf %1471, %1471 : vector<8x128xf32>
    %1476 = arith.addf %1474, %1475 : vector<8x128xf32>
    %1477 = arith.minimumf %1110, %1476 : vector<8x128xf32>
    %cst_453 = arith.constant 6.28318548 : f32
    %1478 = vector.broadcast %cst_453 : f32 to vector<8x128xf32>
    %1479 = arith.cmpf ogt, %1232, %1478 : vector<8x128xf32>
    %cst_454 = arith.constant 0.000000e+00 : f32
    %1480 = vector.broadcast %cst_454 : f32 to vector<8x128xf32>
    %1481 = arith.subf %1480, %1477 : vector<8x128xf32>
    %cst_455 = arith.constant 5.55555534 : f32
    %1482 = vector.broadcast %cst_455 : f32 to vector<8x128xf32>
    %1483 = arith.mulf %1481, %1482 : vector<8x128xf32>
    %1484 = math.exp %1483 : vector<8x128xf32>
    %cst_456 = arith.constant 1.000000e+00 : f32
    %1485 = vector.broadcast %cst_456 : f32 to vector<8x128xf32>
    %1486 = arith.subf %1485, %1484 : vector<8x128xf32>
    %cst_457 = arith.constant -2.000000e-01 : f32
    %1487 = vector.broadcast %cst_457 : f32 to vector<8x128xf32>
    %1488 = arith.mulf %1487, %7 : vector<8x128xf32>
    %1489 = math.exp %1488 : vector<8x128xf32>
    %cst_458 = arith.constant 1.000000e+00 : f32
    %1490 = vector.broadcast %cst_458 : f32 to vector<8x128xf32>
    %1491 = arith.subf %1490, %1489 : vector<8x128xf32>
    %cst_459 = arith.constant 0.000000e+00 : f32
    %cst_460 = arith.constant 1.100000e+00 : f32
    %1492 = vector.broadcast %cst_459 : f32 to vector<8x128xf32>
    %1493 = arith.maximumf %1492, %1491 : vector<8x128xf32>
    %1494 = vector.broadcast %cst_460 : f32 to vector<8x128xf32>
    %1495 = arith.minimumf %1494, %1493 : vector<8x128xf32>
    %cst_461 = arith.constant 4.595120e+00 : f32
    %1496 = vector.broadcast %cst_461 : f32 to vector<8x128xf32>
    %1497 = arith.mulf %1495, %1496 : vector<8x128xf32>
    %cst_462 = arith.constant -4.60517025 : f32
    %1498 = vector.broadcast %cst_462 : f32 to vector<8x128xf32>
    %1499 = arith.addf %1498, %1497 : vector<8x128xf32>
    %cst_463 = arith.constant 0.000000e+00 : f32
    %1500 = vector.broadcast %cst_463 : f32 to vector<8x128xf32>
    %1501 = arith.subf %1500, %1499 : vector<8x128xf32>
    %cst_464 = arith.constant -4.595120e+00 : f32
    %1502 = vector.broadcast %cst_464 : f32 to vector<8x128xf32>
    %1503 = arith.mulf %1495, %1502 : vector<8x128xf32>
    %cst_465 = arith.constant -0.0100503359 : f32
    %1504 = vector.broadcast %cst_465 : f32 to vector<8x128xf32>
    %1505 = arith.addf %1504, %1503 : vector<8x128xf32>
    %cst_466 = arith.constant 0.000000e+00 : f32
    %1506 = vector.broadcast %cst_466 : f32 to vector<8x128xf32>
    %1507 = arith.subf %1506, %1505 : vector<8x128xf32>
    %1508 = arith.select %1479, %1501, %1507 : vector<8x128xi1>, vector<8x128xf32>
    %1509 = arith.mulf %1508, %1486 : vector<8x128xf32>
    %1510 = vector.shape_cast %1509 : vector<8x128xf32> to vector<1x8x128xf32>
    %cst_467 = arith.constant dense<0.000000e+00> : vector<1xf32>
    %1511 = vector.multi_reduction <add>, %1510, %cst_467 [1, 2] : vector<1x8x128xf32> to vector<1xf32>
    %1512 = vector.shape_cast %1511 : vector<1xf32> to vector<1x1x1xf32>
    %1513 = vector.extract %1512[0, 0, 0] : f32 from vector<1x1x1xf32>
    %c0_468 = arith.constant 0 : index
    %c0_469 = arith.constant 0 : index
    %1514 = memref.load %arg2[%c0_468, %c0_469] : memref<1x1xf32, #tpu.memory_space<smem>>
    memref.store %1513, %arg2[%c0_468, %c0_469] : memref<1x1xf32, #tpu.memory_space<smem>>
    return
  }
  func.func @transform_0(%arg0: i32) -> (i32, i32, i32) {
    %c0_i32 = arith.constant 0 : i32
    %c0_i32_0 = arith.constant 0 : i32
    %c0_i32_1 = arith.constant 0 : i32
    return %c0_i32, %arg0, %c0_i32_0 : i32, i32, i32
  }
  func.func @transform_1(%arg0: i32) -> (i32, i32) {
    %c0_i32 = arith.constant 0 : i32
    %c0_i32_0 = arith.constant 0 : i32
    return %arg0, %c0_i32 : i32, i32
  }
}

</mosaic_0001>

<bundles_post_ra>
// kernel: tpu_custom_call.1
= control target key start
LH: loop header
LB: loop body
LE: loop exit
PB: predicated region body
PF: predicated region fallthrough
CT: control target
= control target key end

     0   :  { %6 = vsyncpa [#allocation3], 0  ;;  %s2199_s0 = inlined_call_operand.hbm [shape: f32[4,8,128], index: 0, kind: input, shape index: {}]   ;;  %s2200_s1 = inlined_call_operand.hbm [shape: f32[1,1], index: 1, kind: output, shape index: {}]  }
   0x1   :  { %7 = vsyncpa [#allocation4], 0  ;;  %s889_s6 = smov [#allocation2]  }
   0x2   :  { %s13_s7 = sshll.u32 %s889_s6, 4  ;;  %s14_s7 = int_to_ptr.vmem [resolvable:$true] %s13_s7 }
   0x3   :  { %s865_s8 = scalar_lea.vmem %s14_s7, 512  ;;  %p870_p1 = scmp.lt.s32.totalorder %s14_s7, %s14_s7 }
   0x4   :  { %p866_p0 = scmp.ne.s32.totalorder %s14_s7, %s865_s8  ;;  %p871_p2 = scmp.lt.s32.totalorder %s865_s8, %s865_s8 }
   0x6   :  { %p872_p3 = por %p871_p2, %p870_p1 }
   0x8   :  { %p873_p4 = pnand %p872_p3, %p866_p0 }
   0xa   :  { %876 = shalt.err (!%p873_p4)
}
   0xb   :  { %s890_s9 = smov 128   ;;  %s891_s10 = smov 8  }
   0xc   :  { %19 = dma.hbm_to_vmem [thread:$0]  %s2199_s0, 512, %s14_s7, [#allocation3], %s890_s9, %s890_s9, %s891_s10  }
   0xd   :  { %885 = dma.done.wait [#allocation3], 512  }
   0xe   :  { %886 = vsyncadd [#allocation3], 4294966784  ;;  %v906_v0 = vld [vmem:[#allocation2] sm:$0xff]  ;;  %v908_v1 = vld [vmem:[#allocation2 + $0x8] sm:$0xff]  ;;  %s892_s13 = smov [#allocation5]  }
   0xf   :  { %v910_v2 = vld [vmem:[#allocation2 + $0x10] sm:$0xff]  ;;  %v913_v3 = vsub.f32 0.40414518, %v906_v0  ;;  %v916_v4 = vsub.f32 0.40414518, %v908_v1 }
  0x10   :  { %v919_v5 = vsub.f32 0.40414518, %v910_v2  ;;  %v922_v6 = vsub.f32 -0.40414518, %v908_v1  ;;  %v925_v7 = vsub.f32 -0.40414518, %v910_v2 }
  0x11   :  { %v928_v8 = vsub.f32 -0.40414518, %v906_v0  ;;  %v36_v9 = vmul.f32 %v913_v3, %v913_v3  ;;  %v934_v10 = vmul.f32 %v916_v4, %v916_v4  ;;  %v75_v17 = vmul.f32 %v916_v4, %v913_v3 }
  0x12   :  { %2243 = vst [vmem:[#allocation8_spill] sm:$0xff] %v922_v6  ;;  %2244 = vst [vmem:[#allocation9_spill] sm:$0xff] %v925_v7  ;;  %v938_v11 = vmul.f32 %v919_v5, %v919_v5  ;;  %v942_v12 = vmul.f32 %v922_v6, %v922_v6  ;;  %v946_v13 = vmul.f32 %v925_v7, %v925_v7  ;;  %v796_v31 = vadd.f32 -0.40414518, %v906_v0 }
  0x13   :  { %v38_v14 = vadd.f32 %v934_v10, %v36_v9  ;;  %v951_v15 = vmul.f32 %v928_v8, %v928_v8  ;;  %v963_v20 = vmul.f32 %v925_v7, %v922_v6  ;;  %v70_v21 = vmul.f32 %v925_v7, %v916_v4 }
  0x14   :  { %v49_v16 = vadd.f32 %v942_v12, %v36_v9  ;;  %v972_v23 = vmul.f32 %v928_v8, %v925_v7  ;;  %v73_v24 = vmul.f32 %v925_v7, %v913_v3  ;;  %v978_v25 = vmul.f32 %v928_v8, %v922_v6 }
  0x15   :  { %v957_v18 = vadd.f32 %v938_v11, %v38_v14  ;;  %v60_v19 = vadd.f32 %v951_v15, %v934_v10  ;;  %v983_v26 = vmul.f32 %v922_v6, %v916_v4  ;;  %v71_v28 = vsub.f32 %v963_v20, %v70_v21 }
  0x16   :  { %v968_v22 = vadd.f32 %v946_v13, %v49_v16  ;;  %v74_v29 = vsub.f32 %v972_v23, %v73_v24  ;;  %v77_v30 = vsub.f32 %v75_v17, %v978_v25  ;;  %v997_v33 = vmul.f32 %v925_v7, %v919_v5 }
  0x17   :  { %808 = vrsqrt.f32 %v957_v18  ;;  %v987_v27 = vadd.f32 %v60_v19, %v946_v13  ;;  %v86_v32 = vadd.f32 %v983_v26, %v36_v9  ;;  %v1000_v34 = vadd.f32 -0.40414518, %v908_v1 }
  0x18   :  { %810 = vrsqrt.f32 %v968_v22  ;;  %vm43_vm0 = vcmp.eq.f32.partialorder %v957_v18, inf  ;;  %v46_v35 = vand.u32 2147483648, %v957_v18  ;;  %v57_v36 = vand.u32 2147483648, %v968_v22 }
  0x19   :  { %812 = vrsqrt.f32 %v987_v27  ;;  %2245 = vst [vmem:[#allocation10_spill] sm:$0xff] %v1000_v34  ;;  %v1006_v37 = vadd.f32 -0.40414518, %v910_v2  ;;  %vm45_vm1 = vcmp.eq.f32.partialorder %v957_v18, 0.0  ;;  %vm54_vm2 = vcmp.eq.f32.partialorder %v968_v22, inf }
  0x1a   :  { %v1011_v38 = vadd.f32 0.40414518, %v908_v1  ;;  %v1014_v39 = vadd.f32 0.40414518, %v910_v2  ;;  %v801_v40 = vadd.f32 0.40414518, %v906_v0  ;;  %v268_v41 = vadd.f32 %v951_v15, %v942_v12 }
  0x1b   :  { %2246 = vst [vmem:[#allocation11_spill] sm:$0xff] %v1006_v37  ;;  %vm56_vm3 = vcmp.eq.f32.partialorder %v968_v22, 0.0  ;;  %v78_v42 = vmul.f32 %v71_v28, %v913_v3  ;;  %v79_v43 = vmul.f32 %v74_v29, %v916_v4  ;;  %v1023_v44 = vmul.f32 %v77_v30, %v919_v5 }
  0x1c   :  { %2247 = vst [vmem:[#allocation12_spill] sm:$0xff] %v1011_v38  ;;  %2248 = vst [vmem:[#allocation13_spill] sm:$0xff] %v1014_v39  ;;  %v139_v45 = vmul.f32 0.0, %v796_v31  ;;  %v1026_v46 = vadd.f32 %v997_v33, %v86_v32  ;;  %v1029_v47 = vmul.f32 -0.80829036, %v1000_v34  ;;  %v1038_v50 = vmul.f32 %v928_v8, %v913_v3 }
  0x1d   :  { %v1032_v48 = vmul.f32 -0.80829036, %v1006_v37  ;;  %v1034_v49 = vmul.f32 -0.80829036, %v796_v31  ;;  %v145_v51 = vmul.f32 0.0, %v1000_v34  ;;  %v1045_v53 = vadd.f32 %v268_v41, %v938_v11 }
  0x1e   :  { %v1042_v52 = vmul.f32 -0.80829036, %v1011_v38  ;;  %v141_v54 = vadd.f32 %v1029_v47, %v139_v45  ;;  %v150_v55 = vmul.f32 -0.80829036, %v1014_v39  ;;  %v1050_v56 = vmul.f32 0.0, %v1011_v38 }
  0x1f   :  { %2249 = vst [vmem:[#allocation14_spill] sm:$0xff] %v1034_v49  ;;  %v1052_v57 = vmul.f32 0.0, %v801_v40  ;;  %vm64_vm4 = vcmp.eq.f32.partialorder %v987_v27, inf  ;;  %v146_v58 = vadd.f32 %v145_v51, %v1034_v49  ;;  %v1057_v60 = vmul.f32 -0.80829036, %v801_v40 }
  0x20   :  { %v149_v59 = vadd.f32 %v1042_v52, %v139_v45  ;;  %vm66_vm5 = vcmp.eq.f32.partialorder %v987_v27, 0.0  ;;  %v1061_v61 = vadd.f32 %v1032_v48, %v141_v54  ;;  %v1065_v62 = vadd.f32 %v1050_v56, %v1034_v49 }
  0x21   :  { %v156_v63 = vadd.f32 %v1052_v57, %v1029_v47  ;;  %v1070_v14 = vadd.f32 %v146_v58, %v1032_v48  ;;  %v1075_v17 = vadd.f32 %v1057_v60, %v145_v51  ;;  %814 = vrsqrt.f32 %v1045_v53 }
  0x22   :  { %2250 = vst [vmem:[#allocation15_spill] sm:$0xff] %v1065_v62  ;;  %v1072_v16 = vadd.f32 %v150_v55, %v149_v59  ;;  %v67_v24 = vand.u32 2147483648, %v987_v27  ;;  %v1081_v28 = vadd.f32 %v1065_v62, %v150_v55  ;;  %v92_v31 = vadd.f32 %v1038_v50, %v983_v26 }
  0x23   :  { %2251 = vst [vmem:[#allocation16_spill] sm:$0xff] %v1075_v17  ;;  %v1083_v29 = vadd.f32 %v156_v63, %v150_v55  ;;  %v1089_v32 = vadd.f32 %v1075_v17, %v150_v55  ;;  %vm272_vm9 = vcmp.eq.f32.partialorder %v1045_v53, inf  ;;  %vm274_vm10 = vcmp.eq.f32.partialorder %v1045_v53, 0.0 }
  0x24   :  { %v809_v9 = vpop.eup %808  ;;  %v162_v40 = vmul.f32 %v1072_v16, %v1070_v14  ;;  %v161_v45 = vmul.f32 %v1081_v28, %v1061_v61  ;;  %vm213_vm15 = vcmp.ge.f32.partialorder %v1070_v14, 0.0 }
  0x25   :  { %v811_v19 = vpop.eup %810  ;;  %v42_v21 = vmul.f32 %v809_v9, %v957_v18  ;;  %v164_v51 = vmul.f32 %v1083_v29, %v1070_v14  ;;  %v168_v54 = vmul.f32 %v1083_v29, %v1081_v28  ;;  %v165_v63 = vmul.f32 %v1089_v32, %v1061_v61 }
  0x26   :  { %v53_v30 = vmul.f32 %v811_v19, %v968_v22  ;;  %v813_v58 = vpop.eup %812  ;;  %v167_v9 = vmul.f32 %v1089_v32, %v1072_v16 }
  0x27   :  { %v44_v41 = vsel %vm43_vm0, %v957_v18, %v42_v21  ;;  %v63_v21 = vmul.f32 %v813_v58, %v987_v27  ;;  %v1119_v18 = vadd.f32 %v92_v31, %v946_v13  ;;  %v1127_v62 = vsub.f32 %v164_v51, %v165_v63 }
  0x28   :  { %v1104_v55 = vsel %vm45_vm1, %v46_v35, %v44_v41  ;;  %v55_v59 = vsel %vm54_vm2, %v968_v22, %v53_v30  ;;  %v96_v35 = vadd.f32 %v1038_v50, %v934_v10  ;;  %v1125_v41 = vsub.f32 %v161_v45, %v162_v40 }
  0x29   :  { %v1115_v19 = vsel %vm56_vm3, %v57_v36, %v55_v59  ;;  %2253 = vst [vmem:[#allocation18_spill] sm:$0xff] %v1119_v18  ;;  %v1129_v17 = vsub.f32 %v167_v9, %v168_v54  ;;  %v65_v22 = vsel %vm64_vm4, %v987_v27, %v63_v21  ;;  %v80_v36 = vadd.f32 %v79_v43, %v78_v42 }
  0x2a   :  { %2252 = vst [vmem:[#allocation17_spill] sm:$0xff] %v1115_v19  ;;  %v83_v30 = vmul.f32 %v1115_v19, %v1104_v55  ;;  %v1136_v13 = vsub.f32 %v1081_v28, %v1072_v16  ;;  %v1140_v10 = vsub.f32 %v1083_v29, %v1089_v32  ;;  %v1144_v40 = vsel %vm66_vm5, %v67_v24, %v65_v22 }
  0x2b   :  { %v170_v45 = vadd.f32 %v1129_v17, %v1127_v62  ;;  %v89_v42 = vmul.f32 %v1026_v46, %v1144_v40  ;;  %v94_v43 = vmul.f32 %v1119_v18, %v1104_v55  ;;  %v1154_v54 = vadd.f32 %v96_v35, %v997_v33 }
  0x2c   :  { %v84_v51 = vmul.f32 %v83_v30, %v1144_v40  ;;  %v188_v27 = vadd.f32 %v1140_v10, %v1136_v13  ;;  %v207_v24 = vsub.f32 %v1070_v14, %v1089_v32  ;;  %v1162_v59 = vadd.f32 %v1023_v44, %v80_v36 }
  0x2d   :  { %v171_v58 = vadd.f32 %v170_v45, %v1125_v41  ;;  %v98_v9 = vmul.f32 %v1154_v54, %v1115_v19  ;;  %vm193_vm14 = vcmp.le.f32.partialorder %v1129_v17, 0.0  ;;  %vm212_vm1 = vcmp.le.f32.partialorder %v1127_v62, 0.0 }
  0x2e   :  { %2254 = vst [vmem:[#allocation19_spill] sm:$0xff] %v1162_v59  ;;  %v90_v63 = vadd.f32 %v89_v42, %v84_v51  ;;  %v815_v21 = vpop.eup %814  ;;  %vm189_vm7 = vcmp.eq.f32.partialorder %v188_v27, 0.0  ;;  %vm208_vm8 = vcmp.eq.f32.partialorder %v207_v24, 0.0  ;;  %v1169_v22 = vand.u32 2147483647, %v1162_v59 }
  0x2f   :  { %vm172_vm6 = vcmp.eq.f32.partialorder %v171_v58, 0.0  ;;  %v271_v44 = vmul.f32 %v815_v21, %v1045_v53  ;;  %v190_v51 = vsel %vm189_vm7, 1.0, %v188_v27  ;;  %v209_v42 = vsel %vm208_vm8, 1.0, %v207_v24  ;;  %vm1297_vm7 = vmand %vm212_vm1, %vm213_vm15 }
  0x30   :  { %v95_v30 = vadd.f32 %v94_v43, %v90_v63  ;;  %2256 = vst [vmem:[#allocation21_spill] sm:$0xff] %v1169_v22  ;;  %v173_v45 = vsel %vm172_vm6, 1.0, %v171_v58  ;;  %v275_v43 = vand.u32 2147483648, %v1045_v53  ;;  %v281_v58 = vmul.f32 %v922_v6, %v913_v3 }
  0x31   :  { %v273_v63 = vsel %vm272_vm9, %v1045_v53, %v271_v44  ;;  %816 = vrcp.f32 %v173_v45  ;;  %v1190_v27 = vadd.f32 %v92_v31, %v938_v11  ;;  %vm194_vm2 = vcmp.ge.f32.partialorder %v1136_v13, 0.0 }
  0x32   :  { %v1166_v35 = vadd.f32 %v98_v9, %v95_v30  ;;  %v277_v9 = vmul.f32 %v922_v6, %v919_v5  ;;  %v279_v30 = vmul.f32 %v919_v5, %v913_v3  ;;  %v1187_v21 = vsel %vm274_vm10, %v275_v43, %v273_v63  ;;  %vm195_vm6 = vmand %vm193_vm14, %vm194_vm2 }
  0x33   :  { %818 = vrcp.f32 %v209_v42  ;;  %v288_v45 = vmul.f32 %v1187_v21, %v1104_v55  ;;  %v291_v43 = vmul.f32 %v1190_v27, %v1115_v19  ;;  %v282_v11 = vsub.f32 %v978_v25, %v281_v58 }
  0x34   :  { %2255 = vst [vmem:[#allocation20_spill] sm:$0xff] %v1166_v35  ;;  %v1175_v36 = vand.u32 2147483647, %v1166_v35  ;;  %v278_v53 = vsub.f32 %v963_v20, %v277_v9  ;;  %v280_v24 = vsub.f32 %v279_v30, %v972_v23  ;;  %820 = vrcp.f32 %v190_v51 }
  0x35   :  { %v293_v63 = vadd.f32 %v1038_v50, %v942_v12  ;;  %v230_v9 = vsub.f32 %v1061_v61, %v1072_v16  ;;  %v289_v51 = vmul.f32 %v288_v45, %v1115_v19  ;;  %v286_v58 = vmul.f32 %v282_v11, %v919_v5 }
  0x36   :  { %2257 = vst [vmem:[#allocation22_spill] sm:$0xff] %v1175_v36  ;;  %vm102_vm11 = vcmp.gt.f32.partialorder %v1169_v22, %v1175_v36  ;;  %v283_v31 = vmul.f32 %v278_v53, %v913_v3  ;;  %v284_v42 = vmul.f32 %v280_v24, %v916_v4  ;;  %v297_v12 = vmul.f32 %v1187_v21, %v1026_v46 }
  0x37   :  { %v104_v44 = vsel %vm102_vm11, %v1169_v22, %v1175_v36  ;;  %v1212_v30 = vadd.f32 %v293_v63, %v997_v33  ;;  %v292_v59 = vadd.f32 %v291_v43, %v289_v51  ;;  %vm231_vm13 = vcmp.eq.f32.partialorder %v230_v9, 0.0 }
  0x38   :  { %vm105_vm12 = vcmp.eq.f32.partialorder %v104_v44, 0.0  ;;  %v285_v35 = vadd.f32 %v284_v42, %v283_v31  ;;  %v232_v34 = vsel %vm231_vm13, 1.0, %v230_v9  ;;  %v332_v46 = vadd.f32 %v1034_v49, %v1029_v47 }
  0x39   :  { %2258 = vst [vmem:[#allocation23_spill] sm:$0xff] %v1212_v30  ;;  %v295_v53 = vmul.f32 %v1212_v30, %v1104_v55  ;;  %v106_v24 = vsel %vm105_vm12, 1.0, %v104_v44  ;;  %vm196_vm3 = vcmp.ge.f32.partialorder %v1140_v10, 0.0  ;;  %vm215_vm4 = vcmp.le.f32.partialorder %v1089_v32, 0.0 }
  0x3a   :  { %822 = vrcp.f32 %v106_v24  ;;  %v1219_v45 = vadd.f32 %v286_v58, %v285_v35  ;;  %v339_v35 = vadd.f32 %v1042_v52, %v1034_v49  ;;  %v1246_v58 = vmul.f32 0.0, %v1014_v39  ;;  %vm1309_vm8 = vmand %vm195_vm6, %vm196_vm3 }
  0x3b   :  { %v296_v50 = vadd.f32 %v295_v53, %v292_v59  ;;  %824 = vrcp.f32 %v232_v34  ;;  %v1235_v59 = vmul.f32 0.0, %v1006_v37  ;;  %v335_v34 = vadd.f32 %v1057_v60, %v1042_v52  ;;  %vm1339_vm10 = vmand %vm1297_vm7, %vm215_vm4 }
  0x3c   :  { %2259 = vst [vmem:[#allocation24_spill] sm:$0xff] %v1219_v45  ;;  %v1224_v11 = vand.u32 2147483647, %v1219_v45  ;;  %vm236_vm9 = vcmp.ge.f32.partialorder %v1061_v61, 0.0  ;;  %vm2241_vm12 = vcmp.ge.f32.partialorder %v1089_v32, 0.0  ;;  %vm225_vm13 = vcmp.le.f32.partialorder %v1083_v29, %v1089_v32 }
  0x3d   :  { %v1221_v63 = vadd.f32 %v297_v12, %v296_v50  ;;  %2263 = vst [vmem:[#allocation28_spill] sm:$0xff] %v1235_v59  ;;  %v337_v12 = vadd.f32 %v1052_v57, %v1042_v52  ;;  %v103_v50 = vsel %vm102_vm11, %v1175_v36, %v1169_v22  ;;  %v1266_v52 = vadd.f32 %v1235_v59, %v332_v46  ;;  %vm1397_vm7 = vmand %vm2241_vm12, %vm225_vm13 }
  0x3e   :  { %v817_v38 = vpop.eup %816  ;;  %2261 = vst [vmem:[#allocation26_spill] sm:$0xff] %v1224_v11  ;;  %v1269_v57 = vadd.f32 %v335_v34, %v1235_v59  ;;  %vm235_vm14 = vcmp.le.f32.partialorder %v1125_v41, 0.0  ;;  %vm238_vm1 = vcmp.le.f32.partialorder %v1072_v16, 0.0  ;;  %vm247_vm3 = vcmp.ge.f32.partialorder %v1072_v16, 0.0 }
  0x3f   :  { %2260 = vst [vmem:[#allocation25_spill] sm:$0xff] %v1221_v63  ;;  %v175_v44 = vmul.f32 %v817_v38, %v1127_v62  ;;  %v1228_v42 = vand.u32 2147483647, %v1221_v63  ;;  %v176_v53 = vmul.f32 %v817_v38, %v1125_v41  ;;  %v1272_v63 = vadd.f32 %v1246_v58, %v339_v35 }
  0x40   :  { %v819_v43 = vpop.eup %818  ;;  %v1275_v36 = vadd.f32 %v337_v12, %v1032_v48  ;;  %vm407_vm12 = vcmp.le.f32.partialorder %v1269_v57, 0.0 }
  0x41   :  { %v821_v31 = vpop.eup %820  ;;  %2262 = vst [vmem:[#allocation27_spill] sm:$0xff] %v1228_v42  ;;  %v211_v51 = vmul.f32 %v819_v43, %v1070_v14  ;;  %vm2239_vm0 = vcmp.gt.f32.partialorder %v1224_v11, %v1228_v42  ;;  %v177_v24 = vmul.f32 0.0, %v175_v44  ;;  %v181_v43 = vmul.f32 -0.80829036, %v175_v44 }
  0x42   :  { %v192_v9 = vmul.f32 %v821_v31, %v1136_v13  ;;  %v303_v38 = vsel %vm2239_vm0, %v1224_v11, %v1228_v42  ;;  %v179_v49 = vmul.f32 -0.80829036, %v176_v53  ;;  %2264 = vst [vmem:[#allocation29_spill] sm:$0xff] %v1275_v36  ;;  %v183_v34 = vmul.f32 0.0, %v176_v53 }
  0x43   :  { %v217_v45 = vmul.f32 -0.80829036, %v211_v51  ;;  %vm304_vm5 = vcmp.eq.f32.partialorder %v303_v38, 0.0  ;;  %v178_v44 = vadd.f32 0.40414518, %v177_v24  ;;  %v219_v46 = vmul.f32 0.0, %v211_v51 }
  0x44   :  { %v198_v31 = vmul.f32 -0.80829036, %v192_v9  ;;  %v305_v39 = vsel %vm304_vm5, 1.0, %v303_v38  ;;  %v200_v22 = vmul.f32 0.80829036, %v192_v9  ;;  %v202_v18 = vmul.f32 0.0, %v192_v9 }
  0x45   :  { %826 = vrcp.f32 %v305_v39  ;;  %v182_v7 = vadd.f32 0.40414518, %v181_v43  ;;  %v342_v35 = vmul.f32 %v1275_v36, %v1266_v52  ;;  %v343_v24 = vmul.f32 %v1269_v57, %v1061_v61 }
  0x46   :  { %v345_v9 = vmul.f32 %v1272_v63, %v1061_v61  ;;  %v346_v39 = vmul.f32 %v1266_v52, %v1072_v16  ;;  %v348_v13 = vmul.f32 %v1269_v57, %v1072_v16  ;;  %v180_v17 = vadd.f32 %v179_v49, %v178_v44 }
  0x47   :  { %v823_v37 = vpop.eup %822  ;;  %v199_v51 = vadd.f32 0.40414518, %v198_v31  ;;  %v201_v31 = vadd.f32 -0.40414518, %v200_v22  ;;  %v203_v44 = vadd.f32 -0.40414518, %v202_v18  ;;  %v1318_v59 = vsub.f32 %v1272_v63, %v1072_v16 }
  0x48   :  { %v825_v38 = vpop.eup %824  ;;  %v1285_v12 = vmul.f32 %v823_v37, %v103_v50  ;;  %v349_v37 = vmul.f32 %v1272_v63, %v1275_v36  ;;  %v1305_v50 = vsub.f32 %v1275_v36, %v1269_v57  ;;  %v1314_v62 = vsub.f32 %v345_v9, %v346_v39 }
  0x49   :  { %v184_v6 = vadd.f32 %v183_v34, %v182_v7  ;;  %v234_v30 = vmul.f32 %v825_v38, %v1061_v61  ;;  %v1321_v19 = vsub.f32 %v342_v35, %v343_v24  ;;  %v185_v18 = vadd.f32 %v182_v7, %v179_v49 }
  0x4a   :  { %v1323_v10 = vsub.f32 %v348_v13, %v349_v37  ;;  %v1327_v36 = vmul.f32 %v1285_v12, %v1285_v12  ;;  %v1329_v22 = vadd.f32 0.40414518, %v217_v45  ;;  %v369_v9 = vadd.f32 %v1318_v59, %v1305_v50 }
  0x4b   :  { %v204_v39 = vsel %vm1309_vm8, %v199_v51, %v180_v17  ;;  %v1348_v49 = vadd.f32 0.40414518, %v219_v46  ;;  %v205_v45 = vsel %vm1309_vm8, %v201_v31, %v184_v6  ;;  %v240_v35 = vmul.f32 0.0, %v234_v30 }
  0x4c   :  { %2269 = vst [vmem:[#allocation30_spill] sm:$0xff] %v1329_v22  ;;  %v351_v7 = vadd.f32 %v1323_v10, %v1314_v62  ;;  %vm370_vm2 = vcmp.eq.f32.partialorder %v369_v9, 0.0  ;;  %v242_v24 = vmul.f32 -0.80829036, %v234_v30  ;;  %v110_v13 = vmul.f32 0.0208351, %v1327_v36 }
  0x4d   :  { %2272 = vst [vmem:[#allocation31_spill] sm:$0xff] %v1348_v49  ;;  %v206_v17 = vsel %vm1309_vm8, %v203_v44, %v185_v18  ;;  %v221_v46 = vsel %vm1339_vm10, %v1329_v22, %v204_v39  ;;  %vm248_vm5 = vcmp.le.f32.partialorder %v1081_v28, %v1072_v16  ;;  %v302_v6 = vsel %vm2239_vm0, %v1228_v42, %v1224_v11  ;;  %vm237_vm8 = vmand %vm235_vm14, %vm236_vm9 }
  0x4e   :  { %v352_v38 = vadd.f32 %v351_v7, %v1321_v19  ;;  %v371_v30 = vsel %vm370_vm2, 1.0, %v369_v9  ;;  %v399_v51 = vsub.f32 %v1266_v52, %v1269_v57  ;;  %v1373_v53 = vmul.f32 %v919_v5, %v916_v4 }
  0x4f   :  { %v1377_v43 = vmul.f32 %v928_v8, %v919_v5  ;;  %v1381_v31 = vmul.f32 %v928_v8, %v916_v4  ;;  %v447_v44 = vmul.f32 %v1144_v40, %v1104_v55  ;;  %v222_v9 = vsel %vm1339_vm10, %v1348_v49, %v205_v45 }
  0x50   :  { %vm353_vm6 = vcmp.eq.f32.partialorder %v352_v38, 0.0  ;;  %v437_v39 = vsub.f32 %v1373_v53, %v963_v20  ;;  %v449_v7 = vmul.f32 %v1187_v21, %v1154_v54  ;;  %v223_v29 = vsel %vm1339_vm10, %v1329_v22, %v206_v17  ;;  %vm1433_vm10 = vmand %vm237_vm8, %vm238_vm1 }
  0x51   :  { %v354_v37 = vsel %vm353_vm6, 1.0, %v352_v38  ;;  %v439_v45 = vsub.f32 %v972_v23, %v1377_v43  ;;  %v448_v42 = vmul.f32 %v447_v44, %v1187_v21  ;;  %vm400_vm13 = vcmp.eq.f32.partialorder %v399_v51, 0.0  ;;  %vm1463_vm6 = vmand %vm247_vm3, %vm248_vm5 }
  0x52   :  { %v827_v18 = vpop.eup %826  ;;  %828 = vrcp.f32 %v354_v37  ;;  %v441_v37 = vsub.f32 %v978_v25, %v1381_v31  ;;  %v442_v54 = vmul.f32 %v437_v39, %v913_v3  ;;  %v1420_v49 = vadd.f32 0.40414518, %v240_v35 }
  0x53   :  { %v1401_v38 = vmul.f32 %v827_v18, %v302_v6  ;;  %830 = vrcp.f32 %v371_v30  ;;  %v451_v6 = vadd.f32 %v983_v26, %v951_v15  ;;  %v111_v18 = vadd.f32 -0.085133, %v110_v13 }
  0x54   :  { %v443_v11 = vmul.f32 %v439_v45, %v916_v4  ;;  %v445_v44 = vmul.f32 %v441_v37, %v919_v5  ;;  %v1422_v34 = vadd.f32 0.40414518, %v242_v24  ;;  %v450_v17 = vadd.f32 %v449_v7, %v448_v42 }
  0x55   :  { %v1425_v41 = vadd.f32 %v451_v6, %v997_v33  ;;  %v227_v30 = vsel %vm1397_vm7, -0.40414518, %v221_v46  ;;  %v228_v15 = vsel %vm1397_vm7, 0.40414518, %v222_v9  ;;  %v1439_v5 = vmul.f32 %v1401_v38, %v1401_v38 }
  0x56   :  { %v444_v26 = vadd.f32 %v443_v11, %v442_v54  ;;  %v229_v33 = vsel %vm1397_vm7, -0.40414518, %v223_v29  ;;  %v401_v42 = vsel %vm400_vm13, 1.0, %v399_v51  ;;  %v455_v24 = vmul.f32 %v1190_v27, %v1144_v40 }
  0x57   :  { %v453_v35 = vmul.f32 %v1425_v41, %v1104_v55  ;;  %v112_v13 = vmul.f32 %v111_v18, %v1327_v36  ;;  %vm253_vm14 = vcmp.le.f32.partialorder %v1061_v61, 0.0  ;;  %vm2240_vm2 = vcmp.le.f32.partialorder %v1070_v14, 0.0 }
  0x58   :  { %v1450_v46 = vadd.f32 %v445_v44, %v444_v26  ;;  %v244_v11 = vsel %vm1433_vm10, %v1420_v49, %v227_v30  ;;  %v245_v51 = vsel %vm1433_vm10, %v1422_v34, %v228_v15  ;;  %v1469_v9 = vadd.f32 %v1057_v60, %v1050_v56  ;;  %vm255_vm5 = vmand %vm253_vm14, %vm2240_vm2 }
  0x59   :  { %v454_v27 = vadd.f32 %v453_v35, %v450_v17  ;;  %v246_v39 = vsel %vm1433_vm10, %v1422_v34, %v229_v33  ;;  %v309_v7 = vmul.f32 0.0208351, %v1439_v5  ;;  %832 = vrcp.f32 %v401_v42 }
  0x5a   :  { %2277 = vst [vmem:[#allocation32_spill] sm:$0xff] %v1450_v46  ;;  %v490_v28 = vadd.f32 %v1057_v60, %v1029_v47  ;;  %v113_v45 = vadd.f32 0.180141, %v112_v13  ;;  %v250_v37 = vsel %vm1463_vm6, 0.40414518, %v244_v11  ;;  %v1497_v6 = vadd.f32 %v1469_v9, %v1032_v48 }
  0x5b   :  { %v1477_v8 = vadd.f32 %v455_v24, %v454_v27  ;;  %v1486_v56 = vand.u32 2147483647, %v1450_v46  ;;  %v251_v29 = vsel %vm1463_vm6, -0.40414518, %v245_v51  ;;  %v252_v47 = vsel %vm1463_vm6, -0.40414518, %v246_v39 }
  0x5c   :  { %v310_v44 = vadd.f32 -0.085133, %v309_v7  ;;  %v1500_v17 = vadd.f32 %v490_v28, %v1246_v58  ;;  %v256_v30 = vsel %vm255_vm5, 0.40414518, %v250_v37  ;;  %v114_v26 = vmul.f32 %v113_v45, %v1327_v36 }
  0x5d   :  { %2280 = vst [vmem:[#allocation33_spill] sm:$0xff] %v1477_v8  ;;  %v1493_v54 = vand.u32 2147483647, %v1477_v8  ;;  %v257_v33 = vsel %vm255_vm5, 0.40414518, %v251_v29  ;;  %v495_v48 = vmul.f32 %v1266_v52, %v1089_v32  ;;  %v497_v35 = vmul.f32 %v1497_v6, %v1266_v52 }
  0x5e   :  { %v258_v42 = vsel %vm255_vm5, 0.40414518, %v252_v47  ;;  %v498_v24 = vmul.f32 %v1269_v57, %v1070_v14  ;;  %v500_v13 = vmul.f32 %v1269_v57, %v1089_v32  ;;  %v311_v11 = vmul.f32 %v310_v44, %v1439_v5 }
  0x5f   :  { %v829_v18 = vpop.eup %828  ;;  %vm459_vm7 = vcmp.gt.f32.partialorder %v1486_v56, %v1493_v54  ;;  %v494_v55 = vmul.f32 %v1500_v17, %v1070_v14  ;;  %v501_v27 = vmul.f32 %v1497_v6, %v1500_v17  ;;  %v259_v45 = vsub.f32 %v906_v0, %v256_v30 }
  0x60   :  { %v356_v15 = vmul.f32 %v829_v18, %v1314_v62  ;;  %v831_v4 = vpop.eup %830  ;;  %v461_v51 = vsel %vm459_vm7, %v1486_v56, %v1493_v54  ;;  %v357_v39 = vmul.f32 %v829_v18, %v1321_v19  ;;  %v1528_v37 = vsub.f32 %v908_v1, %v257_v33 }
  0x61   :  { %v373_v28 = vmul.f32 %v831_v4, %v1305_v50  ;;  %vm462_vm8 = vcmp.eq.f32.partialorder %v461_v51, 0.0  ;;  %vm375_vm13 = vcmp.ge.f32.partialorder %v1305_v50, 0.0  ;;  %vm388_vm10 = vcmp.le.f32.partialorder %v1314_v62, 0.0 }
  0x62   :  { %v358_v7 = vmul.f32 -0.80829036, %v356_v15  ;;  %v463_v29 = vsel %vm462_vm8, 1.0, %v461_v51  ;;  %v364_v47 = vmul.f32 0.0, %v356_v15  ;;  %v1532_v44 = vsub.f32 %v497_v35, %v498_v24 }
  0x63   :  { %834 = vrcp.f32 %v463_v29  ;;  %v115_v46 = vadd.f32 -0.3302995, %v114_v26  ;;  %v312_v18 = vadd.f32 0.180141, %v311_v11  ;;  %vm374_vm6 = vcmp.le.f32.partialorder %v1323_v10, 0.0 }
  0x64   :  { %v1535_v4 = vsub.f32 %v500_v13, %v501_v27  ;;  %v359_v0 = vadd.f32 0.40414518, %v358_v7  ;;  %v360_v30 = vmul.f32 0.0, %v357_v39  ;;  %v379_v1 = vmul.f32 0.80829036, %v373_v28  ;;  %vm376_vm5 = vmand %vm374_vm6, %vm375_vm13 }
  0x65   :  { %v1537_v33 = vsub.f32 %v494_v55, %v495_v48  ;;  %v362_v22 = vmul.f32 -0.80829036, %v357_v39  ;;  %v381_v51 = vmul.f32 0.0, %v373_v28  ;;  %v1541_v15 = vsub.f32 %v1500_v17, %v1089_v32  ;;  %vm1564_vm13 = vmand %vm388_vm10, %vm236_vm9 }
  0x66   :  { %v833_v8 = vpop.eup %832  ;;  %v1545_v26 = vsub.f32 %v1497_v6, %v1269_v57  ;;  %v365_v35 = vadd.f32 0.40414518, %v364_v47  ;;  %vm377_vm8 = vcmp.ge.f32.partialorder %v1318_v59, 0.0  ;;  %v383_v10 = vmul.f32 -0.80829036, %v373_v28 }
  0x67   :  { %v503_v48 = vadd.f32 %v1535_v4, %v1532_v44  ;;  %v116_v24 = vmul.f32 %v115_v46, %v1327_v36  ;;  %v1554_v13 = vsub.f32 %v910_v2, %v258_v42  ;;  %v1556_v11 = vmul.f32 %v259_v45, %v259_v45  ;;  %vm1569_vm6 = vmand %vm376_vm5, %vm377_vm8 }
  0x68   :  { %v403_v55 = vmul.f32 %v833_v8, %v1266_v52  ;;  %v313_v27 = vmul.f32 %v312_v18, %v1439_v5  ;;  %v361_v39 = vadd.f32 %v360_v30, %v359_v0  ;;  %v380_v50 = vadd.f32 -0.40414518, %v379_v1  ;;  %vm1585_vm8 = vmand %vm1564_vm13, %vm238_vm1  ;;  %v2296_v18 = vld [vmem:[#allocation18_spill] sm:$0xff] }
  0x69   :  { %v504_v36 = vadd.f32 %v503_v48, %v1537_v33  ;;  %v363_v2 = vadd.f32 %v362_v22, %v359_v0  ;;  %v382_v8 = vadd.f32 -0.40414518, %v381_v51  ;;  %vm394_vm0 = vcmp.le.f32.partialorder %v1272_v63, %v1072_v16 }
  0x6a   :  { %v521_v42 = vadd.f32 %v1545_v26, %v1541_v15  ;;  %v366_v7 = vadd.f32 %v365_v35, %v362_v22  ;;  %v384_v62 = vadd.f32 0.40414518, %v383_v10  ;;  %vm404_vm9 = vcmp.le.f32.partialorder %v1321_v19, 0.0  ;;  %v2287_v35 = vld [vmem:[#allocation29_spill] sm:$0xff]  ;;  %vm1611_vm13 = vmand %vm247_vm3, %vm394_vm0 }
  0x6b   :  { %vm405_vm10 = vcmp.ge.f32.partialorder %v1266_v52, 0.0  ;;  %v117_v28 = vadd.f32 0.999866, %v116_v24  ;;  %v409_v45 = vmul.f32 -0.80829036, %v403_v55  ;;  %vm505_vm2 = vcmp.eq.f32.partialorder %v504_v36, 0.0 }
  0x6c   :  { %vm522_vm5 = vcmp.eq.f32.partialorder %v521_v42, 0.0  ;;  %v314_v29 = vadd.f32 -0.3302995, %v313_v27  ;;  %v385_v47 = vsel %vm1569_vm6, %v380_v50, %v361_v39  ;;  %v506_v22 = vsel %vm505_vm2, 1.0, %v504_v36  ;;  %v2290_v36 = vld [vmem:[#allocation17_spill] sm:$0xff] }
  0x6d   :  { %v523_v0 = vsel %vm522_vm5, 1.0, %v521_v42  ;;  %v386_v30 = vsel %vm1569_vm6, %v382_v8, %v363_v2  ;;  %v460_v1 = vsel %vm459_vm7, %v1493_v54, %v1486_v56  ;;  %836 = vrcp.f32 %v506_v22 }
  0x6e   :  { %v387_v51 = vsel %vm1569_vm6, %v384_v62, %v366_v7  ;;  %vm416_vm1 = vcmp.ge.f32.partialorder %v1269_v57, 0.0  ;;  %vm417_vm2 = vcmp.le.f32.partialorder %v2287_v35, %v1269_v57  ;;  %838 = vrcp.f32 %v523_v0  ;;  %vm406_vm6 = vmand %vm404_vm9, %vm405_vm10 }
  0x6f   :  { %v118_v48 = vmul.f32 %v117_v28, %v1285_v12  ;;  %v391_v24 = vsel %vm1585_vm8, %v1420_v49, %v385_v47  ;;  %v1615_v39 = vadd.f32 0.40414518, %v409_v45  ;;  %v411_v50 = vmul.f32 0.0, %v403_v55  ;;  %vm1649_vm0 = vmand %vm406_vm6, %vm407_vm12 }
  0x70   :  { %v835_v10 = vpop.eup %834  ;;  %v315_v59 = vmul.f32 %v314_v29, %v1439_v5  ;;  %v392_v12 = vsel %vm1585_vm8, %v1422_v34, %v386_v30  ;;  %v575_v16 = vsub.f32 %v963_v20, %v1373_v53  ;;  %v393_v49 = vsel %vm1585_vm8, %v1422_v34, %v387_v51  ;;  %v2291_v53 = vld [vmem:[#allocation23_spill] sm:$0xff]  ;;  %vm1680_vm3 = vmand %vm416_vm1, %vm417_vm2 }
  0x71   :  { %v1625_v63 = vmul.f32 %v835_v10, %v460_v1  ;;  %v576_v5 = vsub.f32 %v1377_v43, %v972_v23  ;;  %v577_v55 = vsub.f32 %v1381_v31, %v978_v25  ;;  %v583_v2 = vmul.f32 %v1187_v21, %v2290_v36  ;;  %v2294_v25 = vld [vmem:[#allocation8_spill] sm:$0xff]  ;;  %v2295_v31 = vld [vmem:[#allocation9_spill] sm:$0xff] }
  0x72   :  { %v396_v19 = vsel %vm1611_vm13, 0.40414518, %v391_v24  ;;  %v578_v20 = vmul.f32 %v575_v16, %v913_v3  ;;  %v585_v34 = vmul.f32 %v2291_v53, %v1144_v40  ;;  %v587_v7 = vmul.f32 %v1425_v41, %v2290_v36  ;;  %v2299_v10 = vld [vmem:[#allocation21_spill] sm:$0xff]  ;;  %v2300_v24 = vld [vmem:[#allocation22_spill] sm:$0xff]  ;;  %v2301_v16 = vld [vmem:[#allocation12_spill] sm:$0xff] }
  0x73   :  { %v1642_v46 = vmul.f32 %v1625_v63, %v1625_v63  ;;  %v579_v43 = vmul.f32 %v576_v5, %v2294_v25  ;;  %v581_v8 = vmul.f32 %v577_v55, %v2295_v31  ;;  %v584_v42 = vmul.f32 %v583_v2, %v1144_v40  ;;  %v2302_v55 = vld [vmem:[#allocation10_spill] sm:$0xff]  ;;  %v2303_v31 = vld [vmem:[#allocation13_spill] sm:$0xff] }
  0x74   :  { %v119_v62 = vsub.f32 1.5707964, %v118_v48  ;;  %v263_v3 = vmul.f32 %v1528_v37, %v1528_v37  ;;  %v316_v28 = vadd.f32 0.999866, %v315_v59  ;;  %v397_v45 = vsel %vm1611_vm13, -0.40414518, %v392_v12 }
  0x75   :  { %v580_v29 = vadd.f32 %v579_v43, %v578_v20  ;;  %v586_v47 = vadd.f32 %v585_v34, %v584_v42  ;;  %v589_v22 = vmul.f32 %v1187_v21, %v2296_v18  ;;  %v1666_v0 = vmul.f32 %v1554_v13, %v1554_v13  ;;  %v2304_v42 = vld [vmem:[#allocation14_spill] sm:$0xff] }
  0x76   :  { %v398_v40 = vsel %vm1611_vm13, -0.40414518, %v393_v49  ;;  %v1670_v41 = vadd.f32 0.40414518, %v411_v50  ;;  %v413_v37 = vsel %vm1649_vm0, %v1615_v39, %v396_v19  ;;  %v1687_v13 = vsel %vm1649_vm0, %v1615_v39, %v397_v45 }
  0x77   :  { %v467_v30 = vmul.f32 0.0208351, %v1642_v46  ;;  %v1690_v1 = vadd.f32 %v581_v8, %v580_v29  ;;  %v588_v51 = vadd.f32 %v587_v7, %v586_v47  ;;  %v1695_v35 = vsel %vm102_vm11, %v119_v62, %v118_v48 }
  0x78   :  { %v1698_v27 = vadd.f32 %v263_v3, %v1556_v11  ;;  %v1701_v50 = vmul.f32 %v316_v28, %v1401_v38  ;;  %vm422_vm9 = vcmp.le.f32.partialorder %v1266_v52, 0.0  ;;  %v419_v59 = vsel %vm1680_vm3, -0.40414518, %v413_v37 }
  0x79   :  { %vm540_vm5 = vcmp.le.f32.partialorder %v1532_v44, 0.0  ;;  %v1707_v12 = vadd.f32 %v589_v22, %v588_v51  ;;  %v626_v49 = vmul.f32 0.80829036, %v2301_v16  ;;  %v1713_v11 = vsel %vm1649_vm0, %v1670_v41, %v398_v40  ;;  %v2307_v51 = vld [vmem:[#allocation11_spill] sm:$0xff]  ;;  %vm1755_vm0 = vmand %vm422_vm9, %vm253_vm14 }
  0x7a   :  { %v837_v5 = vpop.eup %836  ;;  %v420_v38 = vsel %vm1680_vm3, -0.40414518, %v1687_v13  ;;  %v1719_v48 = vand.u32 2147483647, %v1690_v1  ;;  %v634_v36 = vmul.f32 0.80829036, %v2302_v55  ;;  %vm1770_vm14 = vmand %vm540_vm5, %vm405_vm10  ;;  %vm546_vm10 = vcmp.le.f32.partialorder %v1497_v6, %v1269_v57 }
  0x7b   :  { %v839_v2 = vpop.eup %838  ;;  %v468_v19 = vadd.f32 -0.085133, %v467_v30  ;;  %v508_v20 = vmul.f32 %v837_v5, %v1532_v44  ;;  %v509_v53 = vmul.f32 %v837_v5, %v1537_v33  ;;  %v1725_v34 = vand.u32 2147483647, %v1707_v12  ;;  %vm1809_vm5 = vmand %vm1770_vm14, %vm407_vm12 }
  0x7c   :  { %v525_v23 = vmul.f32 %v839_v2, %v1541_v15  ;;  %vm526_vm11 = vcmp.le.f32.partialorder %v1535_v4, 0.0  ;;  %vm527_vm8 = vcmp.ge.f32.partialorder %v1541_v15, 0.0  ;;  %vm529_vm2 = vcmp.ge.f32.partialorder %v1545_v26, 0.0  ;;  %vm1838_vm12 = vmand %vm416_vm1, %vm546_vm10 }
  0x7d   :  { %v510_v25 = vmul.f32 -0.80829036, %v508_v20  ;;  %v514_v43 = vmul.f32 0.0, %v508_v20  ;;  %v624_v8 = vmul.f32 0.80829036, %v2303_v31  ;;  %v627_v7 = vadd.f32 %v626_v49, %v2304_v42  ;;  %vm1741_vm6 = vmand %vm526_vm11, %vm527_vm8 }
  0x7e   :  { %v512_v62 = vmul.f32 -0.80829036, %v509_v53  ;;  %v531_v3 = vmul.f32 0.0, %v525_v23  ;;  %v533_v28 = vmul.f32 -0.80829036, %v525_v23  ;;  %vm2242_vm13 = vcmp.gt.f32.partialorder %v1719_v48, %v1725_v34  ;;  %vm1778_vm8 = vmand %vm1741_vm6, %vm529_vm2 }
  0x7f   :  { %v469_v45 = vmul.f32 %v468_v19, %v1642_v46  ;;  %v511_v29 = vadd.f32 0.40414518, %v510_v25  ;;  %v515_v47 = vadd.f32 0.40414518, %v514_v43  ;;  %v635_v18 = vadd.f32 %v634_v36, %v1057_v60  ;;  %v2310_v36 = vld [vmem:[#allocation16_spill] sm:$0xff]  ;;  %v2315_v25 = vld [vmem:[#allocation15_spill] sm:$0xff] }
  0x80   :  { %v517_v22 = vmul.f32 0.0, %v509_v53  ;;  %v535_v37 = vmul.f32 0.80829036, %v525_v23  ;;  %v595_v30 = vsel %vm2242_vm13, %v1719_v48, %v1725_v34  ;;  %v629_v16 = vmul.f32 0.80829036, %v2307_v51  ;;  %v1844_v51 = vld [vmem:[#allocation2] sm:$0xff] }
  0x81   :  { %v532_v4 = vadd.f32 -0.40414518, %v531_v3  ;;  %v1760_v5 = vadd.f32 %v627_v7, %v1246_v58  ;;  %v631_v55 = vadd.f32 %v626_v49, %v1057_v60  ;;  %v1764_v2 = vadd.f32 %v624_v8, %v2310_v36 }
  0x82   :  { %v513_v19 = vadd.f32 %v512_v62, %v511_v29  ;;  %v516_v20 = vadd.f32 %v515_v47, %v512_v62  ;;  %v534_v53 = vadd.f32 0.40414518, %v533_v28  ;;  %vm596_vm11 = vcmp.eq.f32.partialorder %v595_v30, 0.0 }
  0x83   :  { %v470_v23 = vadd.f32 0.180141, %v469_v45  ;;  %v597_v49 = vsel %vm596_vm11, 1.0, %v595_v30  ;;  %v1783_v43 = vadd.f32 %v624_v8, %v2315_v25  ;;  %v1786_v44 = vadd.f32 %v635_v18, %v1246_v58  ;;  %v2316_v8 = vld [vmem:[#allocation28_spill] sm:$0xff] }
  0x84   :  { %v421_v31 = vsel %vm1680_vm3, 0.40414518, %v1713_v11  ;;  %v424_v26 = vsel %vm1755_vm0, 0.40414518, %v419_v59  ;;  %v518_v42 = vadd.f32 %v517_v22, %v511_v29  ;;  %v536_v7 = vadd.f32 -0.40414518, %v535_v37 }
  0x85   :  { %840 = vrcp.f32 %v597_v49  ;;  %v1796_v62 = vadd.f32 %v629_v16, %v1469_v9  ;;  %v1799_v3 = vadd.f32 %v631_v55, %v2316_v8  ;;  %v537_v58 = vsel %vm1778_vm8, %v532_v4, %v513_v19  ;;  %v2321_v55 = vld [vmem:[#allocation20_spill] sm:$0xff]  ;;  %v1894_v49 = vld [vmem:[#allocation2 + $0x10] sm:$0xff] }
  0x86   :  { %v538_v11 = vsel %vm1778_vm8, %v534_v53, %v516_v20  ;;  %vm551_vm2 = vcmp.le.f32.partialorder %v1537_v33, 0.0  ;;  %v640_v9 = vmul.f32 %v1764_v2, %v1760_v5  ;;  %v471_v28 = vmul.f32 %v470_v23, %v1642_v46  ;;  %v1891_v23 = vld [vmem:[#allocation2 + $0x8] sm:$0xff]  ;;  %v2324_v59 = vld [vmem:[#allocation30_spill] sm:$0xff] }
  0x87   :  { %v637_v45 = vmul.f32 %v1799_v3, %v1783_v43  ;;  %v638_v29 = vmul.f32 %v1796_v62, %v1760_v5  ;;  %v641_v47 = vmul.f32 %v1786_v44, %v1783_v43  ;;  %v122_v18 = vsub.f32 3.1415927, %v1695_v35  ;;  %vm552_vm1 = vmand %vm551_vm2, %vm213_vm15 }
  0x88   :  { %v318_v22 = vsub.f32 1.5707964, %v1701_v50  ;;  %v425_v40 = vsel %vm1755_vm0, 0.40414518, %v420_v38  ;;  %v539_v37 = vsel %vm1778_vm8, %v536_v7, %v518_v42  ;;  %v426_v21 = vsel %vm1755_vm0, 0.40414518, %v421_v31  ;;  %vm1881_vm6 = vmand %vm552_vm1, %vm215_vm4 }
  0x89   :  { %v427_v13 = vsub.f32 %v1844_v51, %v424_v26  ;;  %v543_v38 = vsel %vm1809_vm5, %v1615_v39, %v537_v58  ;;  %v544_v6 = vsel %vm1809_vm5, %v1615_v39, %v538_v11  ;;  %v1857_v57 = vsub.f32 %v640_v9, %v641_v47 }
  0x8a   :  { %v643_v16 = vmul.f32 %v1786_v44, %v1796_v62  ;;  %v644_v15 = vmul.f32 %v1764_v2, %v1799_v3  ;;  %v1865_v4 = vsub.f32 %v1799_v3, %v1796_v62  ;;  %vm121_vm3 = vcmp.lt.f32.partialorder %v2321_v55, 0.0 }
  0x8b   :  { %v472_v39 = vadd.f32 -0.3302995, %v471_v28  ;;  %v545_v33 = vsel %vm1809_vm5, %v1670_v41, %v539_v37  ;;  %vm557_vm15 = vcmp.le.f32.partialorder %v1500_v17, %v1089_v32  ;;  %v1873_v36 = vsub.f32 %v637_v45, %v638_v29  ;;  %v2325_v28 = vld [vmem:[#allocation31_spill] sm:$0xff] }
  0x8c   :  { %v548_v19 = vsel %vm1838_vm12, -0.40414518, %v543_v38  ;;  %v549_v20 = vsel %vm1838_vm12, -0.40414518, %v544_v6  ;;  %v1885_v61 = vsub.f32 %v643_v16, %v644_v15  ;;  %v1889_v41 = vsub.f32 %v1764_v2, %v1786_v44 }
  0x8d   :  { %v428_v60 = vsub.f32 %v1891_v23, %v425_v40  ;;  %v429_v25 = vsub.f32 %v1894_v49, %v426_v21  ;;  %v430_v31 = vmul.f32 %v427_v13, %v427_v13  ;;  %v686_v26 = vsub.f32 %v1760_v5, %v1786_v44 }
  0x8e   :  { %v550_v42 = vsel %vm1838_vm12, 0.40414518, %v545_v33  ;;  %v646_v7 = vadd.f32 %v1885_v61, %v1857_v57  ;;  %v667_v8 = vadd.f32 %v1889_v41, %v1865_v4  ;;  %v711_v58 = vsub.f32 %v1783_v43, %v1796_v62 }
  0x8f   :  { %v473_v11 = vmul.f32 %v472_v39, %v1642_v46  ;;  %v554_v9 = vsel %vm1881_vm6, %v2324_v59, %v548_v19  ;;  %v555_v45 = vsel %vm1881_vm6, %v2325_v28, %v549_v20  ;;  %vm2326_vm4 = vcmp.ge.f32.partialorder %v1089_v32, 0.0 }
  0x90   :  { %vm1919_vm0 = vmand %vm2326_vm4, %vm557_vm15  ;;  %vm687_vm14 = vcmp.eq.f32.partialorder %v686_v26, 0.0  ;;  %v594_v46 = vsel %vm2242_vm13, %v1725_v34, %v1719_v48  ;;  %v647_v47 = vadd.f32 %v646_v7, %v1873_v36  ;;  %vm668_vm11 = vcmp.eq.f32.partialorder %v667_v8, 0.0 }
  0x91   :  { %v688_v40 = vsel %vm687_vm14, 1.0, %v686_v26  ;;  %v431_v37 = vmul.f32 %v428_v60, %v428_v60  ;;  %v556_v32 = vsel %vm1881_vm6, %v2324_v59, %v550_v42  ;;  %v669_v17 = vsel %vm668_vm11, 1.0, %v667_v8  ;;  %v2332_v60 = vld [vmem:[#allocation26_spill] sm:$0xff]  ;;  %v2333_v26 = vld [vmem:[#allocation27_spill] sm:$0xff] }
  0x92   :  { %842 = vrcp.f32 %v688_v40  ;;  %v841_v30 = vpop.eup %840  ;;  %v559_v21 = vsel %vm1919_vm0, -0.40414518, %v554_v9  ;;  %v560_v13 = vsel %vm1919_vm0, 0.40414518, %v555_v45  ;;  %vm2329_vm8 = vcmp.le.f32.partialorder %v1070_v14, 0.0 }
  0x93   :  { %vm1940_vm10 = vmand %vm2329_vm8, %vm422_vm9  ;;  %vm648_vm5 = vcmp.eq.f32.partialorder %v647_v47, 0.0  ;;  %844 = vrcp.f32 %v669_v17  ;;  %v474_v6 = vadd.f32 0.999866, %v473_v11  ;;  %v1944_v16 = vmul.f32 %v841_v30, %v594_v46 }
  0x94   :  { %v649_v15 = vsel %vm648_vm5, 1.0, %v647_v47  ;;  %vm712_vm2 = vcmp.eq.f32.partialorder %v711_v58, 0.0  ;;  %v561_v39 = vsel %vm1919_vm0, -0.40414518, %v556_v32  ;;  %v563_v52 = vsel %vm1940_vm10, 0.40414518, %v559_v21 }
  0x95   :  { %846 = vrcp.f32 %v649_v15  ;;  %v713_v33 = vsel %vm712_vm2, 1.0, %v711_v58  ;;  %v564_v14 = vsel %vm1940_vm10, 0.40414518, %v560_v13  ;;  %v600_v19 = vmul.f32 %v1944_v16, %v1944_v16 }
  0x96   :  { %848 = vrcp.f32 %v713_v33  ;;  %v1959_v20 = vsel %vm121_vm3, %v122_v18, %v1695_v35  ;;  %v1963_v53 = vadd.f32 %v1666_v0, %v1698_v27  ;;  %vm2334_vm9 = vcmp.gt.f32.partialorder %v2332_v60, %v2333_v26  ;;  %v29_v18 = vld [vmem:[#allocation2 + $0x18] sm:$0xff] }
  0x97   :  { %v1971_v42 = vsel %vm2334_vm9, %v318_v22, %v1701_v50  ;;  %v432_v7 = vadd.f32 %v431_v37, %v430_v31  ;;  %v433_v8 = vmul.f32 %v429_v25, %v429_v25  ;;  %v1974_v58 = vmul.f32 %v474_v6, %v1625_v63 }
  0x98   :  { %v601_v55 = vmul.f32 0.0208351, %v600_v19  ;;  %v565_v35 = vsel %vm1940_vm10, 0.40414518, %v561_v39  ;;  %v566_v0 = vsub.f32 %v1844_v51, %v563_v52  ;;  %v567_v27 = vsub.f32 %v1891_v23, %v564_v14 }
  0x99   :  { %v125_v59 = vsub.f32 0.0, %v1959_v20  ;;  %v267_v50 = vmin.f32 %v1963_v53, 1e+30  ;;  %v321_v22 = vsub.f32 3.1415927, %v1971_v42  ;;  %v1983_v25 = vadd.f32 %v433_v8, %v432_v7  ;;  %v2335_v7 = vld [vmem:[#allocation25_spill] sm:$0xff] }
  0x9a   :  { %v602_v11 = vadd.f32 -0.085133, %v601_v55  ;;  %v476_v63 = vsub.f32 1.5707964, %v1974_v58  ;;  %v1987_v31 = vsub.f32 %v1894_v49, %v565_v35  ;;  %v1989_v28 = vmul.f32 %v566_v0, %v566_v0 }
  0x9b   :  { %v1991_v45 = vmul.f32 %v567_v27, %v567_v27  ;;  %vm673_vm12 = vcmp.ge.f32.partialorder %v1865_v4, 0.0  ;;  %v757_v29 = vmul.f32 -0.2, %v29_v18  ;;  %vm672_vm1 = vcmp.le.f32.partialorder %v1885_v61, 0.0 }
  0x9c   :  { %v603_v9 = vmul.f32 %v602_v11, %v600_v19  ;;  %vm691_vm3 = vcmp.le.f32.partialorder %v1857_v57, 0.0  ;;  %vm692_vm15 = vcmp.ge.f32.partialorder %v1760_v5, 0.0  ;;  %vm675_vm6 = vcmp.ge.f32.partialorder %v1889_v41, 0.0  ;;  %vm2018_vm5 = vmand %vm672_vm1, %vm673_vm12  ;;  %v2344_v41 = vld [vmem:[#allocation33_spill] sm:$0xff] }
  0x9d   :  { %vm694_vm4 = vcmp.le.f32.partialorder %v1786_v44, 0.0  ;;  %vm705_vm0 = vcmp.ge.f32.partialorder %v1786_v44, 0.0  ;;  %vm706_vm14 = vcmp.le.f32.partialorder %v1764_v2, %v1786_v44  ;;  %vm716_vm11 = vcmp.le.f32.partialorder %v1873_v36, 0.0  ;;  %vm2026_vm13 = vmand %vm691_vm3, %vm692_vm15 }
  0x9e   :  { %v604_v46 = vadd.f32 0.180141, %v603_v9  ;;  %vm717_vm8 = vcmp.ge.f32.partialorder %v1783_v43, 0.0  ;;  %vm719_vm10 = vcmp.le.f32.partialorder %v1796_v62, 0.0  ;;  %v758_v30 = vmul.f32 1.442695, %v757_v29  ;;  %vm2035_vm12 = vmand %vm2018_vm5, %vm675_vm6 }
  0x9f   :  { %v843_v47 = vpop.eup %842  ;;  %vm731_vm2 = vcmp.le.f32.partialorder %v1799_v3, %v1796_v62  ;;  %vm736_vm9 = vcmp.le.f32.partialorder %v1783_v43, 0.0  ;;  %vm2044_vm1 = vmand %vm716_vm11, %vm717_vm8  ;;  %vm478_vm3 = vcmp.lt.f32.partialorder %v2344_v41, 0.0  ;;  %vm737_vm11 = vcmp.le.f32.partialorder %v1760_v5, 0.0 }
  0xa0   :  { %v845_v40 = vpop.eup %844  ;;  %v605_v37 = vmul.f32 %v604_v46, %v600_v19  ;;  %v690_v32 = vmul.f32 %v843_v47, %v1760_v5  ;;  %850 = vpow2.f32 %v758_v30  ;;  %vm2053_vm15 = vmand %vm2026_vm13, %vm694_vm4  ;;  %vm127_vm4 = vcmp.eq.f32.partialorder %v2300_v24, 0.0 }
  0xa1   :  { %v671_v17 = vmul.f32 %v845_v40, %v1865_v4  ;;  %vm2062_vm6 = vmand %vm705_vm0, %vm706_vm14  ;;  %vm128_vm8 = vcmp.eq.f32.partialorder %v2299_v10, 0.0 }
  0xa2   :  { %v847_v21 = vpop.eup %846  ;;  %v606_v13 = vadd.f32 -0.3302995, %v605_v37  ;;  %v696_v38 = vmul.f32 -0.80829036, %v690_v32  ;;  %v698_v6 = vmul.f32 0.80829036, %v690_v32  ;;  %vm2078_vm0 = vmand %vm2044_vm1, %vm719_vm10 }
  0xa3   :  { %v849_v15 = vpop.eup %848  ;;  %v651_v39 = vmul.f32 %v847_v21, %v1857_v57  ;;  %v652_v33 = vmul.f32 %v847_v21, %v1873_v36  ;;  %v677_v52 = vmul.f32 0.0, %v671_v17  ;;  %v679_v14 = vmul.f32 0.80829036, %v671_v17 }
  0xa4   :  { %v607_v8 = vmul.f32 %v606_v13, %v600_v19  ;;  %v681_v35 = vmul.f32 -0.80829036, %v671_v17  ;;  %v697_v0 = vadd.f32 0.40414518, %v696_v38  ;;  %v699_v27 = vadd.f32 -0.40414518, %v698_v6 }
  0xa5   :  { %v653_v18 = vmul.f32 -0.80829036, %v651_v39  ;;  %v655_v11 = vmul.f32 -0.80829036, %v652_v33  ;;  %v657_v9 = vmul.f32 0.0, %v651_v39  ;;  %v663_v29 = vmul.f32 0.0, %v652_v33 }
  0xa6   :  { %v608_v46 = vadd.f32 0.999866, %v607_v8  ;;  %v659_v47 = vmul.f32 0.80829036, %v652_v33  ;;  %v661_v40 = vmul.f32 0.80829036, %v651_v39  ;;  %v715_v61 = vmul.f32 %v849_v15, %v1783_v43 }
  0xa7   :  { %v654_v19 = vadd.f32 0.40414518, %v653_v18  ;;  %v658_v37 = vadd.f32 -0.40414518, %v657_v9  ;;  %v678_v21 = vadd.f32 -0.40414518, %v677_v52  ;;  %v571_v43 = vadd.f32 %v1991_v45, %v1989_v28 }
  0xa8   :  { %v609_v57 = vmul.f32 %v608_v46, %v1944_v16  ;;  %v662_v13 = vadd.f32 -0.40414518, %v661_v40  ;;  %v680_v38 = vadd.f32 -0.40414518, %v679_v14  ;;  %v682_v6 = vadd.f32 0.40414518, %v681_v35 }
  0xa9   :  { %v656_v39 = vadd.f32 %v655_v11, %v654_v19  ;;  %v660_v33 = vadd.f32 %v659_v47, %v658_v37  ;;  %v700_v30 = vmul.f32 0.0, %v690_v32  ;;  %v721_v52 = vmul.f32 -0.80829036, %v715_v61  ;;  %v2349_v35 = vld [vmem:[#allocation19_spill] sm:$0xff]  ;;  %v2352_v9 = vld [vmem:[#allocation24_spill] sm:$0xff] }
  0xaa   :  { %v664_v14 = vadd.f32 %v663_v29, %v662_v13  ;;  %v723_v8 = vmul.f32 0.0, %v715_v61  ;;  %v725_v55 = vmul.f32 0.80829036, %v715_v61  ;;  %vm124_vm13 = vcmp.lt.f32.partialorder %v2349_v35, 0.0 }
  0xab   :  { %v683_v32 = vsel %vm2035_vm12, %v678_v21, %v656_v39  ;;  %v684_v2 = vsel %vm2035_vm12, %v680_v38, %v660_v33  ;;  %v701_v44 = vadd.f32 -0.40414518, %v700_v30  ;;  %v722_v11 = vadd.f32 0.40414518, %v721_v52 }
  0xac   :  { %vm323_vm14 = vcmp.lt.f32.partialorder %v2352_v9, 0.0  ;;  %v477_v29 = vsel %vm459_vm7, %v476_v63, %v1974_v58  ;;  %v685_v46 = vsel %vm2035_vm12, %v682_v6, %v664_v14  ;;  %v702_v47 = vsel %vm2053_vm15, %v697_v0, %v683_v32  ;;  %vm2114_vm7 = vmand %vm736_vm9, %vm737_vm11 }
  0xad   :  { %v703_v40 = vsel %vm2053_vm15, %v699_v27, %v684_v2  ;;  %vm2353_vm10 = vcmp.ge.f32.partialorder %v1796_v62, 0.0  ;;  %v610_v61 = vsub.f32 1.5707964, %v609_v57  ;;  %v704_v58 = vsel %vm2053_vm15, %v701_v44, %v685_v46  ;;  %v851_v14 = vpop.eup %850 }
  0xae   :  { %vm2100_vm5 = vmand %vm2353_vm10, %vm731_vm2  ;;  %v708_v63 = vsel %vm2062_vm6, -0.40414518, %v702_v47  ;;  %v709_v0 = vsel %vm2062_vm6, 0.40414518, %v703_v40  ;;  %v710_v3 = vsel %vm2062_vm6, -0.40414518, %v704_v58  ;;  %v572_v17 = vmul.f32 %v1987_v31, %v1987_v31 }
  0xaf   :  { %v724_v27 = vadd.f32 -0.40414518, %v723_v8  ;;  %v726_v19 = vadd.f32 -0.40414518, %v725_v55  ;;  %v727_v37 = vsel %vm2078_vm0, %v722_v11, %v708_v63  ;;  %vm2358_vm2 = vcmp.lt.f32.partialorder %v2335_v7, 0.0  ;;  %vm2170_vm6 = vmand %vm127_vm4, %vm128_vm8 }
  0xb0   :  { %v322_v5 = vsel %vm2358_vm2, %v321_v22, %v1971_v42  ;;  %v733_v21 = vsel %vm2100_vm5, -0.40414518, %v727_v37  ;;  %v479_v13 = vsub.f32 3.1415927, %v477_v29  ;;  %vm2359_vm9 = vcmp.gt.f32.partialorder %v1719_v48, %v1725_v34 }
  0xb1   :  { %v728_v38 = vsel %vm2078_vm0, %v724_v27, %v709_v0  ;;  %v729_v6 = vsel %vm2078_vm0, %v726_v19, %v710_v3  ;;  %v739_v7 = vsel %vm2114_vm7, 0.40414518, %v733_v21  ;;  %v611_v42 = vsel %vm2359_vm9, %v610_v61, %v609_v57 }
  0xb2   :  { %v734_v22 = vsel %vm2100_vm5, -0.40414518, %v728_v38  ;;  %v735_v31 = vsel %vm2100_vm5, 0.40414518, %v729_v6  ;;  %v742_v28 = vsub.f32 %v1844_v51, %v739_v7  ;;  %v324_v45 = vsub.f32 0.0, %v322_v5 }
  0xb3   :  { %v435_v15 = vmin.f32 %v267_v50, %v1983_v25  ;;  %v740_v39 = vsel %vm2114_vm7, -0.40414518, %v734_v22  ;;  %v741_v33 = vsel %vm2114_vm7, -0.40414518, %v735_v31  ;;  %v573_v57 = vadd.f32 %v572_v17, %v571_v43 }
  0xb4   :  { %v743_v16 = vsub.f32 %v1891_v23, %v740_v39  ;;  %v744_v30 = vsub.f32 %v1894_v49, %v741_v33  ;;  %v745_v52 = vmul.f32 %v742_v28, %v742_v28  ;;  %vm326_vm12 = vcmp.eq.f32.partialorder %v2333_v26, 0.0 }
  0xb5   :  { %vm327_vm1 = vcmp.eq.f32.partialorder %v2332_v60, 0.0  ;;  %v480_v51 = vsel %vm478_vm3, %v479_v13, %v477_v29  ;;  %v613_v53 = vsub.f32 3.1415927, %v611_v42  ;;  %vm612_vm15 = vcmp.lt.f32.partialorder %v1707_v12, 0.0  ;;  %v2362_v60 = vld [vmem:[#allocation32_spill] sm:$0xff] }
  0xb6   :  { %v746_v50 = vmul.f32 %v743_v16, %v743_v16  ;;  %v748_v25 = vmul.f32 %v744_v30, %v744_v30  ;;  %v126_v23 = vsel %vm124_vm13, %v125_v59, %v1959_v20  ;;  %vm481_vm3 = vcmp.lt.f32.partialorder %v2362_v60, 0.0  ;;  %vm2177_vm11 = vmand %vm326_vm12, %vm327_vm1 }
  0xb7   :  { %v325_v12 = vsel %vm323_vm14, %v324_v45, %v322_v5  ;;  %v482_v41 = vsub.f32 0.0, %v480_v51  ;;  %v574_v36 = vmin.f32 %v435_v15, %v573_v57  ;;  %vm484_vm13 = vcmp.eq.f32.partialorder %v1493_v54, 0.0 }
  0xb8   :  { %v747_v20 = vadd.f32 %v746_v50, %v745_v52  ;;  %vm485_vm0 = vcmp.eq.f32.partialorder %v1486_v56, 0.0  ;;  %v614_v10 = vsel %vm612_vm15, %v613_v53, %v611_v42  ;;  %v760_v24 = vsub.f32 1.0, %v851_v14 }
  0xb9   :  { %v130_v8 = vsel %vm2170_vm6, 0.0, %v126_v23  ;;  %v329_v55 = vsel %vm2177_vm11, 0.0, %v325_v12  ;;  %v483_v35 = vsel %vm481_vm3, %v482_v41, %v480_v51  ;;  %vm2187_vm4 = vmand %vm484_vm13, %vm485_vm0  ;;  %v616_v2 = vsub.f32 0.0, %v614_v10 }
  0xba   :  { %v749_v59 = vadd.f32 %v748_v25, %v747_v20  ;;  %vm615_vm8 = vcmp.lt.f32.partialorder %v1690_v1, 0.0  ;;  %vm618_vm14 = vcmp.eq.f32.partialorder %v1725_v34, 0.0  ;;  %vm619_vm10 = vcmp.eq.f32.partialorder %v1719_v48, 0.0 }
  0xbb   :  { %v761_v56 = vmax.f32 %v760_v24, 0.0  ;;  %v131_v54 = vmul.f32 2.0, %v130_v8  ;;  %v330_v18 = vmul.f32 2.0, %v329_v55  ;;  %v487_v9 = vsel %vm2187_vm4, 0.0, %v483_v35  ;;  %vm620_vm5 = vmand %vm618_vm14, %vm619_vm10 }
  0xbc   :  { %v750_v44 = vmin.f32 %v574_v36, %v749_v59  ;;  %v617_v29 = vsel %vm615_vm8, %v616_v2, %v614_v10  ;;  %v488_v4 = vmul.f32 2.0, %v487_v9 }
  0xbd   :  { %v762_v47 = vmin.f32 %v761_v56, 1.1  ;;  %v331_v40 = vadd.f32 %v330_v18, %v131_v54  ;;  %v621_v58 = vsel %vm620_vm5, 0.0, %v617_v29 }
  0xbe   :  { %v752_v11 = vsub.f32 0.0, %v750_v44  ;;  %v622_v48 = vmul.f32 2.0, %v621_v58 }
  0xbf   :  { %v763_v1 = vmul.f32 4.59512, %v762_v47  ;;  %v766_v34 = vmul.f32 -4.59512, %v762_v47  ;;  %v489_v63 = vadd.f32 %v488_v4, %v331_v40 }
  0xc0   :  { %v753_v46 = vmul.f32 5.5555553, %v752_v11 }
  0xc1   :  { %v764_v0 = vadd.f32 -4.6051702, %v763_v1  ;;  %v767_v62 = vadd.f32 -0.010050336, %v766_v34  ;;  %v623_v3 = vadd.f32 %v622_v48, %v489_v63 }
  0xc2   :  { %v754_v61 = vmul.f32 1.442695, %v753_v46 }
  0xc3   :  { %v765_v27 = vsub.f32 0.0, %v764_v0  ;;  %v768_v19 = vsub.f32 0.0, %v767_v62  ;;  %vm751_vm7 = vcmp.gt.f32.partialorder %v623_v3, 6.2831855 }
  0xc4   :  { %852 = vpow2.f32 %v754_v61 }
  0xc5   :  { %v769_v5 = vsel %vm751_vm7, %v765_v27, %v768_v19 }
  0xd1   :  { %v853_v37 = vpop.eup %852 }
  0xd2   :  { %v756_v43 = vsub.f32 1.0, %v853_v37 }
  0xd4   :  { %v770_v17 = vmul.f32 %v769_v5, %v756_v43 }
  0xd6   :  { %771 = vadd.xlane.f32.xlu0 %v770_v17 }
 0x15f   :  { %v772_v21 = vpop.xlane.xlu0 %771 }
 0x160   :  { %v773_v13 = vrot.slane %v772_v21, 4 }
 0x162   :  { %v774_v38 = vadd.f32 %v773_v13, %v772_v21 }
 0x164   :  { %v775_v6 = vrot.slane %v774_v38, 2 }
 0x166   :  { %v776_v7 = vadd.f32 %v775_v6, %v774_v38 }
 0x168   :  { %v777_v42 = vrot.slane %v776_v7, 1 }
 0x16a   :  { %v778_v22 = vadd.f32 %v777_v42, %v776_v7 }
 0x16c   :  { %802 = vpush %v778_v22 }
 0x19d   :  { %s803_s0 = spop %802 }
 0x19e   :  { %781 = sst [smem:[#allocation5]] %s803_s0 }
 0x19f   :  { %789 = dma.smem_to_hbm %s892_s13, 16, %s2200_s1, [#allocation4]  }
 0x1a0   :  { %887 = dma.done.wait [#allocation4], 16  }
 0x1a1   :  { %888 = vsyncadd [#allocation4], 4294967280 }
 0x1a2   :  { %793 = sfence }
 0x1a3   :  { %794 = vsyncpa [#allocation3], 1 }
 0x1a4   :  { %795 = vsyncpa [#allocation4], 1 }

</bundles_post_ra>
